<compile_context>
chip_gen: v6e
topology: v6e:2x2x1
jax: 0.10.0
libtpu: 0.0.40
codegen_flags: <defaults>
</compile_context>

<pallas_src>
import functools
import math

import jax
import jax.numpy as jnp
import numpy as np
from jax.experimental import pallas as pl
from jax.experimental.pallas import tpu as pltpu

EPS = 1e-5  # nn.GroupNorm default eps


# --------------------------------------------------------------------------
# In-kernel helpers
# --------------------------------------------------------------------------

def _silu(x):
    return x * jax.nn.sigmoid(x)


def _group_norm_cl(h, A, gamma, beta, mask, inv_n, eps):
    """GroupNorm on (C, L) data (channels on sublanes, flat spatial on lanes).

    A: (C, C) group-averaging matrix (1/group_size within a group).
    mask: (1, L) 0/1 selector of valid lanes (None => all lanes valid).
    inv_n: 1 / (#valid spatial positions).  Stats are f32, biased variance,
    eps inside rsqrt -> matches nn.GroupNorm.
    """
    hm = h if mask is None else h * mask
    gm = jnp.sum(jnp.dot(A, hm, preferred_element_type=jnp.float32),
                 axis=1, keepdims=True) * inv_n            # (C, 1) per-group mean
    d = h - gm
    if mask is not None:
        d = d * mask                                        # junk lanes -> 0
    gv = jnp.sum(jnp.dot(A, d * d, preferred_element_type=jnp.float32),
                 axis=1, keepdims=True) * inv_n             # (C, 1) per-group var
    return d * jax.lax.rsqrt(gv + eps) * gamma + beta


# --------------------------------------------------------------------------
# Fully fused ResBlock kernel (one grid step per batch element)
# --------------------------------------------------------------------------

def resblock_kernel(xp_ref, xr_ref, ss_ref,
                    w1_ref, b1_ref, g1_ref, be1_ref,
                    w2_ref, b2_ref, g2_ref, be2_ref,
                    A_ref, mask_ref, S_ref, *rest,
                    H, W, eps, has_skip):
    if has_skip:
        skw_ref, skb_ref, o_ref = rest
    else:
        (o_ref,) = rest

    WP = W + 2                 # row stride of the zero-padded flat layout
    LQ = H * WP                # conv-output length in that layout (incl. junk cols)
    HW = H * W
    inv_hw = 1.0 / HW
    mask = mask_ref[...]       # (1, LQ): 1 where x < W, 0 on junk columns
    A = A_ref[...]             # (Cout, Cout) group-averaging matrix (f32)
    dt = w2_ref.dtype          # MXU operand dtype (f32 or bf16)

    # ---- conv1: 9 accumulated (Cout, Cp) @ (Cp, LQ) MXU dots on flat shifted slices ----
    xin = xp_ref[0]                                           # (Cp, LP), already dot dtype
    acc = None
    for ky in range(3):
        for kx in range(3):
            o = ky * WP + kx
            part = jnp.dot(w1_ref[3 * ky + kx], xin[:, o:o + LQ],
                           preferred_element_type=jnp.float32)
            acc = part if acc is None else acc + part
    h = acc + b1_ref[...]                                     # (Cout, LQ) f32

    # ---- GroupNorm1 (junk columns masked out of the statistics) ----
    n1 = _group_norm_cl(h, A, g1_ref[...], be1_ref[...], mask, inv_hw, eps)

    # ---- time-FiLM (scale/shift precomputed per batch element in XLA) + SiLU ----
    scale = ss_ref[0, 0]                                      # (Cout, 1)
    shift = ss_ref[0, 1]                                      # (Cout, 1)
    h1 = _silu(n1 * (1.0 + scale) + shift) * mask             # junk columns -> 0
    # TODO(synk): nn.Dropout(0.1) treated as identity (inference / eval mode).

    # ---- re-embed into the zero-padded flat layout for conv2 (stays on-chip) ----
    C = h1.shape[0]
    LP = xin.shape[-1]
    hp = jnp.concatenate(
        [jnp.zeros((C, WP + 1), dt), h1.astype(dt),
         jnp.zeros((C, LP - LQ - WP - 1), dt)], axis=1)       # (Cout, LP)

    # ---- conv2: same 9 accumulated dots ----
    acc2 = None
    for ky in range(3):
        for kx in range(3):
            o = ky * WP + kx
            part = jnp.dot(w2_ref[3 * ky + kx], hp[:, o:o + LQ],
                           preferred_element_type=jnp.float32)
            acc2 = part if acc2 is None else acc2 + part

    # ---- drop junk columns via selection matmul -> lane-dense (Cout, HW) ----
    y = jnp.dot(acc2, S_ref[...], preferred_element_type=jnp.float32) + b2_ref[...]

    # ---- GroupNorm2 + SiLU + residual / 1x1-conv skip ----
    n2 = _group_norm_cl(y, A, g2_ref[...], be2_ref[...], None, inv_hw, eps)
    out = _silu(n2)
    if has_skip:
        res = jnp.dot(skw_ref[...], xr_ref[0].astype(skw_ref.dtype),
                      preferred_element_type=jnp.float32) + skb_ref[...]
    else:
        res = xr_ref[0]
    o_ref[0] = out + res                                      # (Cout, HW) f32, lane-dense


# --------------------------------------------------------------------------
# Host-side constant matrices
# --------------------------------------------------------------------------

def num_groups_for(out_ch):
    return min(32, out_ch // 4) if out_ch >= 32 else min(8, out_ch)


def _aux_matrices(H, W, Cout, groups):
    WP = W + 2
    LQ = H * WP
    HW = H * W
    mask = (np.arange(LQ) % WP < W).astype(np.float32)[None, :]       # (1, LQ)
    S = np.zeros((LQ, HW), np.float32)                                # de-junk selector
    p = np.arange(HW)
    S[(p // W) * WP + (p % W), p] = 1.0
    gs = Cout // groups
    gidx = np.arange(Cout) // gs
    A = (gidx[:, None] == gidx[None, :]).astype(np.float32) / gs      # group averaging
    return jnp.asarray(mask), jnp.asarray(S), jnp.asarray(A)


# --------------------------------------------------------------------------
# Forward wrapper
# --------------------------------------------------------------------------

def res_block_forward(x_nchw, t_emb, params, *, dot_dtype=jnp.float32):
    """ResBlock forward.  x_nchw: (B, Cin, H, W), t_emb: (B, time_dim) -> (B, Cout, H, W)."""
    B, Cin, H, W = x_nchw.shape
    Cout = params['conv1_w'].shape[0]
    HW = H * W
    WP = W + 2
    LP = (H + 3) * WP                         # padded flat length (covers max tap offset)
    Cp = max(8, ((Cin + 7) // 8) * 8)         # pad tiny channel counts for clean MXU operands
    groups = num_groups_for(Cout)
    has_skip = 'skip_w' in params
    f32 = jnp.float32

    mask, S, A = _aux_matrices(H, W, Cout, groups)

    # conv weights (Cout, Cin, 3, 3) -> (9, Cout, Cin_padded), MXU operand dtype
    def prep_conv_w(w, cin_pad):
        w9 = jnp.transpose(w, (2, 3, 0, 1)).reshape(9, w.shape[0], w.shape[1])
        if w.shape[1] < cin_pad:
            w9 = jnp.pad(w9, ((0, 0), (0, 0), (0, cin_pad - w.shape[1])))
        return w9.astype(dot_dtype)

    w1 = prep_conv_w(params['conv1_w'], Cp)
    w2 = prep_conv_w(params['conv2_w'], Cout)

    col = lambda v: v.reshape(-1, 1).astype(f32)
    b1, b2 = col(params['conv1_b']), col(params['conv2_b'])
    g1, be1 = col(params['norm1_g']), col(params['norm1_b'])
    g2, be2 = col(params['norm2_g']), col(params['norm2_b'])

    # time MLP hoisted out of the per-batch grid: (B, 2*Cout) -> (B, 2, Cout, 1)
    ss = (jax.nn.silu(t_emb) @ params['time_w'] + params['time_b'])
    ss = ss.reshape(B, 2, Cout, 1).astype(f32)

    # padded flat conv input (channel pad folded into the same op); MXU operand dtype
    xp = jnp.pad(x_nchw, ((0, 0), (0, Cp - Cin), (1, 2), (1, 1))).reshape(B, Cp, LP)
    xp = xp.astype(dot_dtype)

    # residual in the (B, C, HW) orientation (free metadata reshape of NCHW)
    if has_skip:
        xr = jnp.pad(x_nchw.reshape(B, Cin, HW), ((0, 0), (0, Cp - Cin), (0, 0)))
        Cr = Cp
        skw = jnp.pad(params['skip_w'], ((0, 0), (0, Cp - Cin))).astype(dot_dtype)
        skb = col(params['skip_b'])
    else:
        xr = x_nchw.reshape(B, Cin, HW)
        Cr = Cin

    rep = lambda a: pl.BlockSpec(a.shape, lambda b, _nd=a.ndim: (0,) * _nd)

    in_specs = [
        pl.BlockSpec((1, Cp, LP), lambda b: (b, 0, 0)),
        pl.BlockSpec((1, Cr, HW), lambda b: (b, 0, 0)),
        pl.BlockSpec((1, 2, Cout, 1), lambda b: (b, 0, 0, 0)),
        rep(w1), rep(b1), rep(g1), rep(be1),
        rep(w2), rep(b2), rep(g2), rep(be2),
        rep(A), rep(mask), rep(S),
    ]
    args = [xp, xr, ss, w1, b1, g1, be1, w2, b2, g2, be2, A, mask, S]
    if has_skip:
        in_specs += [rep(skw), rep(skb)]
        args += [skw, skb]

    out = pl.pallas_call(
        functools.partial(resblock_kernel, H=H, W=W, eps=EPS, has_skip=has_skip),
        out_shape=jax.ShapeDtypeStruct((B, Cout, HW), f32),
        grid=(B,),
        in_specs=in_specs,
        out_specs=pl.BlockSpec((1, Cout, HW), lambda b: (b, 0, 0)),
        compiler_params=pltpu.CompilerParams(dimension_semantics=("parallel",)),
    )(*args)

    return out.reshape(B, Cout, H, W)          # metadata-only reshape to NCHW


# --------------------------------------------------------------------------
# Deterministic parameter construction (synthetic weights, PyTorch-like shapes)
# --------------------------------------------------------------------------

def make_params(key, in_ch, out_ch, time_dim):
    k = jax.random.split(key, 12)
    p = {
        'conv1_w': jax.random.normal(k[0], (out_ch, in_ch, 3, 3), jnp.float32) / math.sqrt(9 * in_ch),
        'conv1_b': 0.02 * jax.random.normal(k[1], (out_ch,), jnp.float32),
        'conv2_w': jax.random.normal(k[2], (out_ch, out_ch, 3, 3), jnp.float32) / math.sqrt(9 * out_ch),
        'conv2_b': 0.02 * jax.random.normal(k[3], (out_ch,), jnp.float32),
        'time_w': jax.random.normal(k[4], (time_dim, 2 * out_ch), jnp.float32) / math.sqrt(time_dim),
        'time_b': 0.02 * jax.random.normal(k[5], (2 * out_ch,), jnp.float32),
        'norm1_g': 1.0 + 0.1 * jax.random.normal(k[6], (out_ch,), jnp.float32),
        'norm1_b': 0.1 * jax.random.normal(k[7], (out_ch,), jnp.float32),
        'norm2_g': 1.0 + 0.1 * jax.random.normal(k[8], (out_ch,), jnp.float32),
        'norm2_b': 0.1 * jax.random.normal(k[9], (out_ch,), jnp.float32),
    }
    if in_ch != out_ch:
        p['skip_w'] = jax.random.normal(k[10], (out_ch, in_ch), jnp.float32) / math.sqrt(in_ch)
        p['skip_b'] = 0.02 * jax.random.normal(k[11], (out_ch,), jnp.float32)
    return p


# --------------------------------------------------------------------------
# Pure-JAX reference (mirrors the PyTorch forward semantics)
# --------------------------------------------------------------------------

def ref_res_block(x, t_emb, p, groups):
    def conv3x3(z, w, b):
        y = jax.lax.conv_general_dilated(z, w, (1, 1), ((1, 1), (1, 1)),
                                         dimension_numbers=('NCHW', 'OIHW', 'NCHW'))
        return y + b[None, :, None, None]

    def gn(z, g, be):
        B, C, H, W = z.shape
        zg = z.reshape(B, groups, C // groups, H, W)
        mu = zg.mean(axis=(2, 3, 4), keepdims=True)
        var = ((zg - mu) ** 2).mean(axis=(2, 3, 4), keepdims=True)
        zn = ((zg - mu) / jnp.sqrt(var + EPS)).reshape(B, C, H, W)
        return zn * g[None, :, None, None] + be[None, :, None, None]

    Cout = p['conv1_w'].shape[0]
    h = gn(conv3x3(x, p['conv1_w'], p['conv1_b']), p['norm1_g'], p['norm1_b'])
    t = jax.nn.silu(t_emb) @ p['time_w'] + p['time_b']
    scale, shift = t[:, :Cout], t[:, Cout:]
    h = jax.nn.silu(h * (1.0 + scale[:, :, None, None]) + shift[:, :, None, None])
    h = gn(conv3x3(h, p['conv2_w'], p['conv2_b']), p['norm2_g'], p['norm2_b'])
    h = jax.nn.silu(h)
    if 'skip_w' in p:
        res = jnp.einsum('oi,bihw->bohw', p['skip_w'], x) + p['skip_b'][None, :, None, None]
    else:
        res = x
    return h + res


# --------------------------------------------------------------------------
# Main
# --------------------------------------------------------------------------

if __name__ == "__main__":
    B, H, W, time_dim = 2, 16, 16, 32
    key = jax.random.PRNGKey(0)

    # (in_ch != out_ch) exercises the 1x1-conv skip; (in_ch == out_ch) the identity skip.
    for cfg_i, (in_ch, out_ch) in enumerate([(4, 32), (32, 32)]):
        key, kx, kt, kp = jax.random.split(key, 4)
        x = jax.random.normal(kx, (B, in_ch, H, W), jnp.float32)      # NCHW, like PyTorch
        t_emb = jax.random.normal(kt, (B, time_dim), jnp.float32)
        params = make_params(kp, in_ch, out_ch, time_dim)
        groups = num_groups_for(out_ch)

        out = jax.jit(res_block_forward)(x, t_emb, params)
        jax.block_until_ready(out)
        assert out.shape == (B, out_ch, H, W)

        ref = ref_res_block(x, t_emb, params, groups)
        np.testing.assert_allclose(np.asarray(out), np.asarray(ref), rtol=2e-2, atol=2e-2)

        if cfg_i == 0:
            # bf16 MXU-operand path (v6e/v7x); accumulation + GroupNorm stats stay f32.
            out_bf16 = jax.jit(functools.partial(res_block_forward, dot_dtype=jnp.bfloat16))(
                x, t_emb, params)
            jax.block_until_ready(out_bf16)
            np.testing.assert_allclose(np.asarray(out_bf16), np.asarray(ref),
                                       rtol=7e-2, atol=7e-2)

    print("KERNEL_OK")
</pallas_src>

<mosaic_0001>
module attributes {stable_mosaic.version = 11 : i64} {
  func.func @resblock_kernel(%arg0: i32, %arg1: memref<1x8x342xf32, #tpu.memory_space<vmem>>, %arg2: memref<1x8x256xf32, #tpu.memory_space<vmem>>, %arg3: memref<1x2x32x1xf32, #tpu.memory_space<vmem>>, %arg4: memref<9x32x8xf32, #tpu.memory_space<vmem>>, %arg5: memref<32x1xf32, #tpu.memory_space<vmem>>, %arg6: memref<32x1xf32, #tpu.memory_space<vmem>>, %arg7: memref<32x1xf32, #tpu.memory_space<vmem>>, %arg8: memref<9x32x32xf32, #tpu.memory_space<vmem>>, %arg9: memref<32x1xf32, #tpu.memory_space<vmem>>, %arg10: memref<32x1xf32, #tpu.memory_space<vmem>>, %arg11: memref<32x1xf32, #tpu.memory_space<vmem>>, %arg12: memref<32x32xf32, #tpu.memory_space<vmem>>, %arg13: memref<1x288xf32, #tpu.memory_space<vmem>>, %arg14: memref<288x256xf32, #tpu.memory_space<vmem>>, %arg15: memref<32x8xf32, #tpu.memory_space<vmem>>, %arg16: memref<32x1xf32, #tpu.memory_space<vmem>>, %arg17: memref<1x32x256xf32, #tpu.memory_space<vmem>>) attributes {dimension_semantics = [#tpu.dimension_semantics<parallel>], iteration_bounds = array<i64: 2>, scalar_prefetch = 0 : i64, scratch_operands = 0 : i64, tpu.core_type = #tpu.core_type<tc>, window_params = [{transform_indices = @transform_0, window_bounds = array<i64: 1, 8, 342>}, {transform_indices = @transform_1, window_bounds = array<i64: 1, 8, 256>}, {transform_indices = @transform_2, window_bounds = array<i64: 1, 2, 32, 1>}, {pipeline_mode = #tpu.pipeline_mode<synchronous>, transform_indices = @transform_3, window_bounds = array<i64: 9, 32, 8>}, {pipeline_mode = #tpu.pipeline_mode<synchronous>, transform_indices = @transform_4, window_bounds = array<i64: 32, 1>}, {pipeline_mode = #tpu.pipeline_mode<synchronous>, transform_indices = @transform_5, window_bounds = array<i64: 32, 1>}, {pipeline_mode = #tpu.pipeline_mode<synchronous>, transform_indices = @transform_6, window_bounds = array<i64: 32, 1>}, {pipeline_mode = #tpu.pipeline_mode<synchronous>, transform_indices = @transform_7, window_bounds = array<i64: 9, 32, 32>}, {pipeline_mode = #tpu.pipeline_mode<synchronous>, transform_indices = @transform_8, window_bounds = array<i64: 32, 1>}, {pipeline_mode = #tpu.pipeline_mode<synchronous>, transform_indices = @transform_9, window_bounds = array<i64: 32, 1>}, {pipeline_mode = #tpu.pipeline_mode<synchronous>, transform_indices = @transform_10, window_bounds = array<i64: 32, 1>}, {pipeline_mode = #tpu.pipeline_mode<synchronous>, transform_indices = @transform_11, window_bounds = array<i64: 32, 32>}, {pipeline_mode = #tpu.pipeline_mode<synchronous>, transform_indices = @transform_12, window_bounds = array<i64: 1, 288>}, {pipeline_mode = #tpu.pipeline_mode<synchronous>, transform_indices = @transform_13, window_bounds = array<i64: 288, 256>}, {pipeline_mode = #tpu.pipeline_mode<synchronous>, transform_indices = @transform_14, window_bounds = array<i64: 32, 8>}, {pipeline_mode = #tpu.pipeline_mode<synchronous>, transform_indices = @transform_15, window_bounds = array<i64: 32, 1>}, {transform_indices = @transform_16, window_bounds = array<i64: 1, 32, 256>}]} {
    %c0 = arith.constant 0 : index
    %c0_0 = arith.constant 0 : index
    %0 = vector.load %arg13[%c0, %c0_0] : memref<1x288xf32, #tpu.memory_space<vmem>>, vector<1x288xf32>
    %c0_1 = arith.constant 0 : index
    %c0_2 = arith.constant 0 : index
    %1 = vector.load %arg12[%c0_1, %c0_2] : memref<32x32xf32, #tpu.memory_space<vmem>>, vector<32x32xf32>
    %c0_3 = arith.constant 0 : index
    %c0_4 = arith.constant 0 : index
    %c0_5 = arith.constant 0 : index
    %2 = vector.load %arg1[%c0_3, %c0_4, %c0_5] : memref<1x8x342xf32, #tpu.memory_space<vmem>>, vector<1x8x342xf32>
    %3 = vector.shape_cast %2 : vector<1x8x342xf32> to vector<8x342xf32>
    %c0_6 = arith.constant 0 : index
    %c0_7 = arith.constant 0 : index
    %c0_8 = arith.constant 0 : index
    %4 = vector.load %arg4[%c0_6, %c0_7, %c0_8] : memref<9x32x8xf32, #tpu.memory_space<vmem>>, vector<1x32x8xf32>
    %5 = vector.shape_cast %4 : vector<1x32x8xf32> to vector<32x8xf32>
    %6 = vector.extract_strided_slice %3 {offsets = [0, 0], sizes = [8, 288], strides = [1, 1]} : vector<8x342xf32> to vector<8x288xf32>
    %cst = arith.constant dense<0.000000e+00> : vector<32x288xf32>
    %7 = tpu.matmul %5, %6, %cst {dimension_numbers = #tpu.dot_dimension_numbers<[1], [0], [0], [1], [0, 0, 1, 1], [], []>} : vector<32x8xf32>, vector<8x288xf32>, vector<32x288xf32> -> vector<32x288xf32>
    %c1 = arith.constant 1 : index
    %c0_9 = arith.constant 0 : index
    %c0_10 = arith.constant 0 : index
    %8 = vector.load %arg4[%c1, %c0_9, %c0_10] : memref<9x32x8xf32, #tpu.memory_space<vmem>>, vector<1x32x8xf32>
    %9 = vector.shape_cast %8 : vector<1x32x8xf32> to vector<32x8xf32>
    %10 = vector.extract_strided_slice %3 {offsets = [0, 1], sizes = [8, 288], strides = [1, 1]} : vector<8x342xf32> to vector<8x288xf32>
    %cst_11 = arith.constant dense<0.000000e+00> : vector<32x288xf32>
    %11 = tpu.matmul %9, %10, %cst_11 {dimension_numbers = #tpu.dot_dimension_numbers<[1], [0], [0], [1], [0, 0, 1, 1], [], []>} : vector<32x8xf32>, vector<8x288xf32>, vector<32x288xf32> -> vector<32x288xf32>
    %12 = arith.addf %7, %11 : vector<32x288xf32>
    %c2 = arith.constant 2 : index
    %c0_12 = arith.constant 0 : index
    %c0_13 = arith.constant 0 : index
    %13 = vector.load %arg4[%c2, %c0_12, %c0_13] : memref<9x32x8xf32, #tpu.memory_space<vmem>>, vector<1x32x8xf32>
    %14 = vector.shape_cast %13 : vector<1x32x8xf32> to vector<32x8xf32>
    %15 = vector.extract_strided_slice %3 {offsets = [0, 2], sizes = [8, 288], strides = [1, 1]} : vector<8x342xf32> to vector<8x288xf32>
    %cst_14 = arith.constant dense<0.000000e+00> : vector<32x288xf32>
    %16 = tpu.matmul %14, %15, %cst_14 {dimension_numbers = #tpu.dot_dimension_numbers<[1], [0], [0], [1], [0, 0, 1, 1], [], []>} : vector<32x8xf32>, vector<8x288xf32>, vector<32x288xf32> -> vector<32x288xf32>
    %17 = arith.addf %12, %16 : vector<32x288xf32>
    %c3 = arith.constant 3 : index
    %c0_15 = arith.constant 0 : index
    %c0_16 = arith.constant 0 : index
    %18 = vector.load %arg4[%c3, %c0_15, %c0_16] : memref<9x32x8xf32, #tpu.memory_space<vmem>>, vector<1x32x8xf32>
    %19 = vector.shape_cast %18 : vector<1x32x8xf32> to vector<32x8xf32>
    %20 = vector.extract_strided_slice %3 {offsets = [0, 18], sizes = [8, 288], strides = [1, 1]} : vector<8x342xf32> to vector<8x288xf32>
    %cst_17 = arith.constant dense<0.000000e+00> : vector<32x288xf32>
    %21 = tpu.matmul %19, %20, %cst_17 {dimension_numbers = #tpu.dot_dimension_numbers<[1], [0], [0], [1], [0, 0, 1, 1], [], []>} : vector<32x8xf32>, vector<8x288xf32>, vector<32x288xf32> -> vector<32x288xf32>
    %22 = arith.addf %17, %21 : vector<32x288xf32>
    %c4 = arith.constant 4 : index
    %c0_18 = arith.constant 0 : index
    %c0_19 = arith.constant 0 : index
    %23 = vector.load %arg4[%c4, %c0_18, %c0_19] : memref<9x32x8xf32, #tpu.memory_space<vmem>>, vector<1x32x8xf32>
    %24 = vector.shape_cast %23 : vector<1x32x8xf32> to vector<32x8xf32>
    %25 = vector.extract_strided_slice %3 {offsets = [0, 19], sizes = [8, 288], strides = [1, 1]} : vector<8x342xf32> to vector<8x288xf32>
    %cst_20 = arith.constant dense<0.000000e+00> : vector<32x288xf32>
    %26 = tpu.matmul %24, %25, %cst_20 {dimension_numbers = #tpu.dot_dimension_numbers<[1], [0], [0], [1], [0, 0, 1, 1], [], []>} : vector<32x8xf32>, vector<8x288xf32>, vector<32x288xf32> -> vector<32x288xf32>
    %27 = arith.addf %22, %26 : vector<32x288xf32>
    %c5 = arith.constant 5 : index
    %c0_21 = arith.constant 0 : index
    %c0_22 = arith.constant 0 : index
    %28 = vector.load %arg4[%c5, %c0_21, %c0_22] : memref<9x32x8xf32, #tpu.memory_space<vmem>>, vector<1x32x8xf32>
    %29 = vector.shape_cast %28 : vector<1x32x8xf32> to vector<32x8xf32>
    %30 = vector.extract_strided_slice %3 {offsets = [0, 20], sizes = [8, 288], strides = [1, 1]} : vector<8x342xf32> to vector<8x288xf32>
    %cst_23 = arith.constant dense<0.000000e+00> : vector<32x288xf32>
    %31 = tpu.matmul %29, %30, %cst_23 {dimension_numbers = #tpu.dot_dimension_numbers<[1], [0], [0], [1], [0, 0, 1, 1], [], []>} : vector<32x8xf32>, vector<8x288xf32>, vector<32x288xf32> -> vector<32x288xf32>
    %32 = arith.addf %27, %31 : vector<32x288xf32>
    %c6 = arith.constant 6 : index
    %c0_24 = arith.constant 0 : index
    %c0_25 = arith.constant 0 : index
    %33 = vector.load %arg4[%c6, %c0_24, %c0_25] : memref<9x32x8xf32, #tpu.memory_space<vmem>>, vector<1x32x8xf32>
    %34 = vector.shape_cast %33 : vector<1x32x8xf32> to vector<32x8xf32>
    %35 = vector.extract_strided_slice %3 {offsets = [0, 36], sizes = [8, 288], strides = [1, 1]} : vector<8x342xf32> to vector<8x288xf32>
    %cst_26 = arith.constant dense<0.000000e+00> : vector<32x288xf32>
    %36 = tpu.matmul %34, %35, %cst_26 {dimension_numbers = #tpu.dot_dimension_numbers<[1], [0], [0], [1], [0, 0, 1, 1], [], []>} : vector<32x8xf32>, vector<8x288xf32>, vector<32x288xf32> -> vector<32x288xf32>
    %37 = arith.addf %32, %36 : vector<32x288xf32>
    %c7 = arith.constant 7 : index
    %c0_27 = arith.constant 0 : index
    %c0_28 = arith.constant 0 : index
    %38 = vector.load %arg4[%c7, %c0_27, %c0_28] : memref<9x32x8xf32, #tpu.memory_space<vmem>>, vector<1x32x8xf32>
    %39 = vector.shape_cast %38 : vector<1x32x8xf32> to vector<32x8xf32>
    %40 = vector.extract_strided_slice %3 {offsets = [0, 37], sizes = [8, 288], strides = [1, 1]} : vector<8x342xf32> to vector<8x288xf32>
    %cst_29 = arith.constant dense<0.000000e+00> : vector<32x288xf32>
    %41 = tpu.matmul %39, %40, %cst_29 {dimension_numbers = #tpu.dot_dimension_numbers<[1], [0], [0], [1], [0, 0, 1, 1], [], []>} : vector<32x8xf32>, vector<8x288xf32>, vector<32x288xf32> -> vector<32x288xf32>
    %42 = arith.addf %37, %41 : vector<32x288xf32>
    %c8 = arith.constant 8 : index
    %c0_30 = arith.constant 0 : index
    %c0_31 = arith.constant 0 : index
    %43 = vector.load %arg4[%c8, %c0_30, %c0_31] : memref<9x32x8xf32, #tpu.memory_space<vmem>>, vector<1x32x8xf32>
    %44 = vector.shape_cast %43 : vector<1x32x8xf32> to vector<32x8xf32>
    %45 = vector.extract_strided_slice %3 {offsets = [0, 38], sizes = [8, 288], strides = [1, 1]} : vector<8x342xf32> to vector<8x288xf32>
    %cst_32 = arith.constant dense<0.000000e+00> : vector<32x288xf32>
    %46 = tpu.matmul %44, %45, %cst_32 {dimension_numbers = #tpu.dot_dimension_numbers<[1], [0], [0], [1], [0, 0, 1, 1], [], []>} : vector<32x8xf32>, vector<8x288xf32>, vector<32x288xf32> -> vector<32x288xf32>
    %47 = arith.addf %42, %46 : vector<32x288xf32>
    %c0_33 = arith.constant 0 : index
    %c0_34 = arith.constant 0 : index
    %48 = vector.load %arg5[%c0_33, %c0_34] : memref<32x1xf32, #tpu.memory_space<vmem>>, vector<32x1xf32>
    %49 = vector.broadcast %48 : vector<32x1xf32> to vector<32x288xf32>
    %50 = arith.addf %47, %49 : vector<32x288xf32>
    %c0_35 = arith.constant 0 : index
    %c0_36 = arith.constant 0 : index
    %51 = vector.load %arg6[%c0_35, %c0_36] : memref<32x1xf32, #tpu.memory_space<vmem>>, vector<32x1xf32>
    %c0_37 = arith.constant 0 : index
    %c0_38 = arith.constant 0 : index
    %52 = vector.load %arg7[%c0_37, %c0_38] : memref<32x1xf32, #tpu.memory_space<vmem>>, vector<32x1xf32>
    %53 = vector.broadcast %0 : vector<1x288xf32> to vector<32x288xf32>
    %54 = arith.mulf %50, %53 : vector<32x288xf32>
    %cst_39 = arith.constant dense<0.000000e+00> : vector<32x288xf32>
    %55 = tpu.matmul %1, %54, %cst_39 {dimension_numbers = #tpu.dot_dimension_numbers<[1], [0], [0], [1], [0, 0, 1, 1], [], []>} : vector<32x32xf32>, vector<32x288xf32>, vector<32x288xf32> -> vector<32x288xf32>
    %cst_40 = arith.constant dense<0.000000e+00> : vector<32xf32>
    %56 = vector.multi_reduction <add>, %55, %cst_40 [1] : vector<32x288xf32> to vector<32xf32>
    %57 = vector.shape_cast %56 : vector<32xf32> to vector<32x1xf32>
    %cst_41 = arith.constant 3.906250e-03 : f32
    %58 = vector.broadcast %cst_41 : f32 to vector<32x1xf32>
    %59 = arith.mulf %57, %58 : vector<32x1xf32>
    %60 = vector.broadcast %59 : vector<32x1xf32> to vector<32x288xf32>
    %61 = arith.subf %50, %60 : vector<32x288xf32>
    %62 = vector.broadcast %0 : vector<1x288xf32> to vector<32x288xf32>
    %63 = arith.mulf %61, %62 : vector<32x288xf32>
    %64 = arith.mulf %63, %63 : vector<32x288xf32>
    %cst_42 = arith.constant dense<0.000000e+00> : vector<32x288xf32>
    %65 = tpu.matmul %1, %64, %cst_42 {dimension_numbers = #tpu.dot_dimension_numbers<[1], [0], [0], [1], [0, 0, 1, 1], [], []>} : vector<32x32xf32>, vector<32x288xf32>, vector<32x288xf32> -> vector<32x288xf32>
    %cst_43 = arith.constant dense<0.000000e+00> : vector<32xf32>
    %66 = vector.multi_reduction <add>, %65, %cst_43 [1] : vector<32x288xf32> to vector<32xf32>
    %67 = vector.shape_cast %66 : vector<32xf32> to vector<32x1xf32>
    %cst_44 = arith.constant 3.906250e-03 : f32
    %68 = vector.broadcast %cst_44 : f32 to vector<32x1xf32>
    %69 = arith.mulf %67, %68 : vector<32x1xf32>
    %cst_45 = arith.constant 9.99999974E-6 : f32
    %70 = vector.broadcast %cst_45 : f32 to vector<32x1xf32>
    %71 = arith.addf %69, %70 : vector<32x1xf32>
    %72 = math.rsqrt %71 : vector<32x1xf32>
    %73 = vector.broadcast %72 : vector<32x1xf32> to vector<32x288xf32>
    %74 = arith.mulf %63, %73 : vector<32x288xf32>
    %75 = vector.broadcast %51 : vector<32x1xf32> to vector<32x288xf32>
    %76 = arith.mulf %74, %75 : vector<32x288xf32>
    %77 = vector.broadcast %52 : vector<32x1xf32> to vector<32x288xf32>
    %78 = arith.addf %76, %77 : vector<32x288xf32>
    %c0_46 = arith.constant 0 : index
    %c0_47 = arith.constant 0 : index
    %c0_48 = arith.constant 0 : index
    %c0_49 = arith.constant 0 : index
    %79 = vector.load %arg3[%c0_46, %c0_47, %c0_48, %c0_49] : memref<1x2x32x1xf32, #tpu.memory_space<vmem>>, vector<1x1x32x1xf32>
    %80 = vector.shape_cast %79 : vector<1x1x32x1xf32> to vector<32x1xf32>
    %c0_50 = arith.constant 0 : index
    %c1_51 = arith.constant 1 : index
    %c0_52 = arith.constant 0 : index
    %c0_53 = arith.constant 0 : index
    %81 = vector.load %arg3[%c0_50, %c1_51, %c0_52, %c0_53] : memref<1x2x32x1xf32, #tpu.memory_space<vmem>>, vector<1x1x32x1xf32>
    %82 = vector.shape_cast %81 : vector<1x1x32x1xf32> to vector<32x1xf32>
    %cst_54 = arith.constant 1.000000e+00 : f32
    %83 = vector.broadcast %cst_54 : f32 to vector<32x1xf32>
    %84 = arith.addf %83, %80 : vector<32x1xf32>
    %85 = vector.broadcast %84 : vector<32x1xf32> to vector<32x288xf32>
    %86 = arith.mulf %78, %85 : vector<32x288xf32>
    %87 = vector.broadcast %82 : vector<32x1xf32> to vector<32x288xf32>
    %88 = arith.addf %86, %87 : vector<32x288xf32>
    %89 = arith.negf %88 : vector<32x288xf32>
    %90 = math.exp %89 : vector<32x288xf32>
    %cst_55 = arith.constant 1.000000e+00 : f32
    %91 = vector.broadcast %cst_55 : f32 to vector<32x288xf32>
    %92 = arith.addf %91, %90 : vector<32x288xf32>
    %93 = arith.divf %91, %92 : vector<32x288xf32>
    %94 = arith.mulf %88, %93 : vector<32x288xf32>
    %95 = vector.broadcast %0 : vector<1x288xf32> to vector<32x288xf32>
    %96 = arith.mulf %94, %95 : vector<32x288xf32>
    %cst_56 = arith.constant 0.000000e+00 : f32
    %97 = vector.broadcast %cst_56 : f32 to vector<32x19xf32>
    %cst_57 = arith.constant 0.000000e+00 : f32
    %98 = vector.broadcast %cst_57 : f32 to vector<32x35xf32>
    %99 = tpu.concatenate %97, %96, %98 in 1 : vector<32x19xf32>, vector<32x288xf32>, vector<32x35xf32> -> vector<32x342xf32>
    %c0_58 = arith.constant 0 : index
    %c0_59 = arith.constant 0 : index
    %c0_60 = arith.constant 0 : index
    %100 = vector.load %arg8[%c0_58, %c0_59, %c0_60] : memref<9x32x32xf32, #tpu.memory_space<vmem>>, vector<1x32x32xf32>
    %101 = vector.shape_cast %100 : vector<1x32x32xf32> to vector<32x32xf32>
    %102 = vector.extract_strided_slice %99 {offsets = [0, 0], sizes = [32, 288], strides = [1, 1]} : vector<32x342xf32> to vector<32x288xf32>
    %cst_61 = arith.constant dense<0.000000e+00> : vector<32x288xf32>
    %103 = tpu.matmul %101, %102, %cst_61 {dimension_numbers = #tpu.dot_dimension_numbers<[1], [0], [0], [1], [0, 0, 1, 1], [], []>} : vector<32x32xf32>, vector<32x288xf32>, vector<32x288xf32> -> vector<32x288xf32>
    %c1_62 = arith.constant 1 : index
    %c0_63 = arith.constant 0 : index
    %c0_64 = arith.constant 0 : index
    %104 = vector.load %arg8[%c1_62, %c0_63, %c0_64] : memref<9x32x32xf32, #tpu.memory_space<vmem>>, vector<1x32x32xf32>
    %105 = vector.shape_cast %104 : vector<1x32x32xf32> to vector<32x32xf32>
    %106 = vector.extract_strided_slice %99 {offsets = [0, 1], sizes = [32, 288], strides = [1, 1]} : vector<32x342xf32> to vector<32x288xf32>
    %cst_65 = arith.constant dense<0.000000e+00> : vector<32x288xf32>
    %107 = tpu.matmul %105, %106, %cst_65 {dimension_numbers = #tpu.dot_dimension_numbers<[1], [0], [0], [1], [0, 0, 1, 1], [], []>} : vector<32x32xf32>, vector<32x288xf32>, vector<32x288xf32> -> vector<32x288xf32>
    %108 = arith.addf %103, %107 : vector<32x288xf32>
    %c2_66 = arith.constant 2 : index
    %c0_67 = arith.constant 0 : index
    %c0_68 = arith.constant 0 : index
    %109 = vector.load %arg8[%c2_66, %c0_67, %c0_68] : memref<9x32x32xf32, #tpu.memory_space<vmem>>, vector<1x32x32xf32>
    %110 = vector.shape_cast %109 : vector<1x32x32xf32> to vector<32x32xf32>
    %111 = vector.extract_strided_slice %99 {offsets = [0, 2], sizes = [32, 288], strides = [1, 1]} : vector<32x342xf32> to vector<32x288xf32>
    %cst_69 = arith.constant dense<0.000000e+00> : vector<32x288xf32>
    %112 = tpu.matmul %110, %111, %cst_69 {dimension_numbers = #tpu.dot_dimension_numbers<[1], [0], [0], [1], [0, 0, 1, 1], [], []>} : vector<32x32xf32>, vector<32x288xf32>, vector<32x288xf32> -> vector<32x288xf32>
    %113 = arith.addf %108, %112 : vector<32x288xf32>
    %c3_70 = arith.constant 3 : index
    %c0_71 = arith.constant 0 : index
    %c0_72 = arith.constant 0 : index
    %114 = vector.load %arg8[%c3_70, %c0_71, %c0_72] : memref<9x32x32xf32, #tpu.memory_space<vmem>>, vector<1x32x32xf32>
    %115 = vector.shape_cast %114 : vector<1x32x32xf32> to vector<32x32xf32>
    %116 = vector.extract_strided_slice %99 {offsets = [0, 18], sizes = [32, 288], strides = [1, 1]} : vector<32x342xf32> to vector<32x288xf32>
    %cst_73 = arith.constant dense<0.000000e+00> : vector<32x288xf32>
    %117 = tpu.matmul %115, %116, %cst_73 {dimension_numbers = #tpu.dot_dimension_numbers<[1], [0], [0], [1], [0, 0, 1, 1], [], []>} : vector<32x32xf32>, vector<32x288xf32>, vector<32x288xf32> -> vector<32x288xf32>
    %118 = arith.addf %113, %117 : vector<32x288xf32>
    %c4_74 = arith.constant 4 : index
    %c0_75 = arith.constant 0 : index
    %c0_76 = arith.constant 0 : index
    %119 = vector.load %arg8[%c4_74, %c0_75, %c0_76] : memref<9x32x32xf32, #tpu.memory_space<vmem>>, vector<1x32x32xf32>
    %120 = vector.shape_cast %119 : vector<1x32x32xf32> to vector<32x32xf32>
    %121 = vector.extract_strided_slice %99 {offsets = [0, 19], sizes = [32, 288], strides = [1, 1]} : vector<32x342xf32> to vector<32x288xf32>
    %cst_77 = arith.constant dense<0.000000e+00> : vector<32x288xf32>
    %122 = tpu.matmul %120, %121, %cst_77 {dimension_numbers = #tpu.dot_dimension_numbers<[1], [0], [0], [1], [0, 0, 1, 1], [], []>} : vector<32x32xf32>, vector<32x288xf32>, vector<32x288xf32> -> vector<32x288xf32>
    %123 = arith.addf %118, %122 : vector<32x288xf32>
    %c5_78 = arith.constant 5 : index
    %c0_79 = arith.constant 0 : index
    %c0_80 = arith.constant 0 : index
    %124 = vector.load %arg8[%c5_78, %c0_79, %c0_80] : memref<9x32x32xf32, #tpu.memory_space<vmem>>, vector<1x32x32xf32>
    %125 = vector.shape_cast %124 : vector<1x32x32xf32> to vector<32x32xf32>
    %126 = vector.extract_strided_slice %99 {offsets = [0, 20], sizes = [32, 288], strides = [1, 1]} : vector<32x342xf32> to vector<32x288xf32>
    %cst_81 = arith.constant dense<0.000000e+00> : vector<32x288xf32>
    %127 = tpu.matmul %125, %126, %cst_81 {dimension_numbers = #tpu.dot_dimension_numbers<[1], [0], [0], [1], [0, 0, 1, 1], [], []>} : vector<32x32xf32>, vector<32x288xf32>, vector<32x288xf32> -> vector<32x288xf32>
    %128 = arith.addf %123, %127 : vector<32x288xf32>
    %c6_82 = arith.constant 6 : index
    %c0_83 = arith.constant 0 : index
    %c0_84 = arith.constant 0 : index
    %129 = vector.load %arg8[%c6_82, %c0_83, %c0_84] : memref<9x32x32xf32, #tpu.memory_space<vmem>>, vector<1x32x32xf32>
    %130 = vector.shape_cast %129 : vector<1x32x32xf32> to vector<32x32xf32>
    %131 = vector.extract_strided_slice %99 {offsets = [0, 36], sizes = [32, 288], strides = [1, 1]} : vector<32x342xf32> to vector<32x288xf32>
    %cst_85 = arith.constant dense<0.000000e+00> : vector<32x288xf32>
    %132 = tpu.matmul %130, %131, %cst_85 {dimension_numbers = #tpu.dot_dimension_numbers<[1], [0], [0], [1], [0, 0, 1, 1], [], []>} : vector<32x32xf32>, vector<32x288xf32>, vector<32x288xf32> -> vector<32x288xf32>
    %133 = arith.addf %128, %132 : vector<32x288xf32>
    %c7_86 = arith.constant 7 : index
    %c0_87 = arith.constant 0 : index
    %c0_88 = arith.constant 0 : index
    %134 = vector.load %arg8[%c7_86, %c0_87, %c0_88] : memref<9x32x32xf32, #tpu.memory_space<vmem>>, vector<1x32x32xf32>
    %135 = vector.shape_cast %134 : vector<1x32x32xf32> to vector<32x32xf32>
    %136 = vector.extract_strided_slice %99 {offsets = [0, 37], sizes = [32, 288], strides = [1, 1]} : vector<32x342xf32> to vector<32x288xf32>
    %cst_89 = arith.constant dense<0.000000e+00> : vector<32x288xf32>
    %137 = tpu.matmul %135, %136, %cst_89 {dimension_numbers = #tpu.dot_dimension_numbers<[1], [0], [0], [1], [0, 0, 1, 1], [], []>} : vector<32x32xf32>, vector<32x288xf32>, vector<32x288xf32> -> vector<32x288xf32>
    %138 = arith.addf %133, %137 : vector<32x288xf32>
    %c8_90 = arith.constant 8 : index
    %c0_91 = arith.constant 0 : index
    %c0_92 = arith.constant 0 : index
    %139 = vector.load %arg8[%c8_90, %c0_91, %c0_92] : memref<9x32x32xf32, #tpu.memory_space<vmem>>, vector<1x32x32xf32>
    %140 = vector.shape_cast %139 : vector<1x32x32xf32> to vector<32x32xf32>
    %141 = vector.extract_strided_slice %99 {offsets = [0, 38], sizes = [32, 288], strides = [1, 1]} : vector<32x342xf32> to vector<32x288xf32>
    %cst_93 = arith.constant dense<0.000000e+00> : vector<32x288xf32>
    %142 = tpu.matmul %140, %141, %cst_93 {dimension_numbers = #tpu.dot_dimension_numbers<[1], [0], [0], [1], [0, 0, 1, 1], [], []>} : vector<32x32xf32>, vector<32x288xf32>, vector<32x288xf32> -> vector<32x288xf32>
    %143 = arith.addf %138, %142 : vector<32x288xf32>
    %c0_94 = arith.constant 0 : index
    %c0_95 = arith.constant 0 : index
    %144 = vector.load %arg14[%c0_94, %c0_95] : memref<288x256xf32, #tpu.memory_space<vmem>>, vector<288x256xf32>
    %cst_96 = arith.constant dense<0.000000e+00> : vector<32x256xf32>
    %145 = tpu.matmul %143, %144, %cst_96 {dimension_numbers = #tpu.dot_dimension_numbers<[1], [0], [0], [1], [0, 0, 1, 1], [], []>} : vector<32x288xf32>, vector<288x256xf32>, vector<32x256xf32> -> vector<32x256xf32>
    %c0_97 = arith.constant 0 : index
    %c0_98 = arith.constant 0 : index
    %146 = vector.load %arg9[%c0_97, %c0_98] : memref<32x1xf32, #tpu.memory_space<vmem>>, vector<32x1xf32>
    %147 = vector.broadcast %146 : vector<32x1xf32> to vector<32x256xf32>
    %148 = arith.addf %145, %147 : vector<32x256xf32>
    %c0_99 = arith.constant 0 : index
    %c0_100 = arith.constant 0 : index
    %149 = vector.load %arg10[%c0_99, %c0_100] : memref<32x1xf32, #tpu.memory_space<vmem>>, vector<32x1xf32>
    %c0_101 = arith.constant 0 : index
    %c0_102 = arith.constant 0 : index
    %150 = vector.load %arg11[%c0_101, %c0_102] : memref<32x1xf32, #tpu.memory_space<vmem>>, vector<32x1xf32>
    %cst_103 = arith.constant dense<0.000000e+00> : vector<32x256xf32>
    %151 = tpu.matmul %1, %148, %cst_103 {dimension_numbers = #tpu.dot_dimension_numbers<[1], [0], [0], [1], [0, 0, 1, 1], [], []>} : vector<32x32xf32>, vector<32x256xf32>, vector<32x256xf32> -> vector<32x256xf32>
    %cst_104 = arith.constant dense<0.000000e+00> : vector<32xf32>
    %152 = vector.multi_reduction <add>, %151, %cst_104 [1] : vector<32x256xf32> to vector<32xf32>
    %153 = vector.shape_cast %152 : vector<32xf32> to vector<32x1xf32>
    %cst_105 = arith.constant 3.906250e-03 : f32
    %154 = vector.broadcast %cst_105 : f32 to vector<32x1xf32>
    %155 = arith.mulf %153, %154 : vector<32x1xf32>
    %156 = vector.broadcast %155 : vector<32x1xf32> to vector<32x256xf32>
    %157 = arith.subf %148, %156 : vector<32x256xf32>
    %158 = arith.mulf %157, %157 : vector<32x256xf32>
    %cst_106 = arith.constant dense<0.000000e+00> : vector<32x256xf32>
    %159 = tpu.matmul %1, %158, %cst_106 {dimension_numbers = #tpu.dot_dimension_numbers<[1], [0], [0], [1], [0, 0, 1, 1], [], []>} : vector<32x32xf32>, vector<32x256xf32>, vector<32x256xf32> -> vector<32x256xf32>
    %cst_107 = arith.constant dense<0.000000e+00> : vector<32xf32>
    %160 = vector.multi_reduction <add>, %159, %cst_107 [1] : vector<32x256xf32> to vector<32xf32>
    %161 = vector.shape_cast %160 : vector<32xf32> to vector<32x1xf32>
    %cst_108 = arith.constant 3.906250e-03 : f32
    %162 = vector.broadcast %cst_108 : f32 to vector<32x1xf32>
    %163 = arith.mulf %161, %162 : vector<32x1xf32>
    %cst_109 = arith.constant 9.99999974E-6 : f32
    %164 = vector.broadcast %cst_109 : f32 to vector<32x1xf32>
    %165 = arith.addf %163, %164 : vector<32x1xf32>
    %166 = math.rsqrt %165 : vector<32x1xf32>
    %167 = vector.broadcast %166 : vector<32x1xf32> to vector<32x256xf32>
    %168 = arith.mulf %157, %167 : vector<32x256xf32>
    %169 = vector.broadcast %149 : vector<32x1xf32> to vector<32x256xf32>
    %170 = arith.mulf %168, %169 : vector<32x256xf32>
    %171 = vector.broadcast %150 : vector<32x1xf32> to vector<32x256xf32>
    %172 = arith.addf %170, %171 : vector<32x256xf32>
    %173 = arith.negf %172 : vector<32x256xf32>
    %174 = math.exp %173 : vector<32x256xf32>
    %cst_110 = arith.constant 1.000000e+00 : f32
    %175 = vector.broadcast %cst_110 : f32 to vector<32x256xf32>
    %176 = arith.addf %175, %174 : vector<32x256xf32>
    %177 = arith.divf %175, %176 : vector<32x256xf32>
    %178 = arith.mulf %172, %177 : vector<32x256xf32>
    %c0_111 = arith.constant 0 : index
    %c0_112 = arith.constant 0 : index
    %179 = vector.load %arg15[%c0_111, %c0_112] : memref<32x8xf32, #tpu.memory_space<vmem>>, vector<32x8xf32>
    %c0_113 = arith.constant 0 : index
    %c0_114 = arith.constant 0 : index
    %c0_115 = arith.constant 0 : index
    %180 = vector.load %arg2[%c0_113, %c0_114, %c0_115] : memref<1x8x256xf32, #tpu.memory_space<vmem>>, vector<1x8x256xf32>
    %181 = vector.shape_cast %180 : vector<1x8x256xf32> to vector<8x256xf32>
    %cst_116 = arith.constant dense<0.000000e+00> : vector<32x256xf32>
    %182 = tpu.matmul %179, %181, %cst_116 {dimension_numbers = #tpu.dot_dimension_numbers<[1], [0], [0], [1], [0, 0, 1, 1], [], []>} : vector<32x8xf32>, vector<8x256xf32>, vector<32x256xf32> -> vector<32x256xf32>
    %c0_117 = arith.constant 0 : index
    %c0_118 = arith.constant 0 : index
    %183 = vector.load %arg16[%c0_117, %c0_118] : memref<32x1xf32, #tpu.memory_space<vmem>>, vector<32x1xf32>
    %184 = vector.broadcast %183 : vector<32x1xf32> to vector<32x256xf32>
    %185 = arith.addf %182, %184 : vector<32x256xf32>
    %186 = arith.addf %178, %185 : vector<32x256xf32>
    %c0_119 = arith.constant 0 : index
    %c0_120 = arith.constant 0 : index
    %c0_121 = arith.constant 0 : index
    %187 = vector.load %arg17[%c0_119, %c0_120, %c0_121] : memref<1x32x256xf32, #tpu.memory_space<vmem>>, vector<1x32x256xf32>
    %188 = vector.shape_cast %187 : vector<1x32x256xf32> to vector<32x256xf32>
    %189 = vector.shape_cast %186 : vector<32x256xf32> to vector<1x32x256xf32>
    tpu.vector_store %arg17[%c0_119, %c0_120, %c0_121], %189 {strides = array<i32>} : memref<1x32x256xf32, #tpu.memory_space<vmem>>, vector<1x32x256xf32>,
    return
  }
  func.func @transform_0(%arg0: i32) -> (i32, i32, i32) {
    %c0_i32 = arith.constant 0 : i32
    %c0_i32_0 = arith.constant 0 : i32
    %c0_i32_1 = arith.constant 0 : i32
    return %arg0, %c0_i32, %c0_i32_0 : i32, i32, i32
  }
  func.func @transform_1(%arg0: i32) -> (i32, i32, i32) {
    %c0_i32 = arith.constant 0 : i32
    %c0_i32_0 = arith.constant 0 : i32
    %c0_i32_1 = arith.constant 0 : i32
    return %arg0, %c0_i32, %c0_i32_0 : i32, i32, i32
  }
  func.func @transform_2(%arg0: i32) -> (i32, i32, i32, i32) {
    %c0_i32 = arith.constant 0 : i32
    %c0_i32_0 = arith.constant 0 : i32
    %c0_i32_1 = arith.constant 0 : i32
    %c0_i32_2 = arith.constant 0 : i32
    return %arg0, %c0_i32, %c0_i32_0, %c0_i32_1 : i32, i32, i32, i32
  }
  func.func @transform_3(%arg0: i32) -> (i32, i32, i32) {
    %c0_i32 = arith.constant 0 : i32
    %c0_i32_0 = arith.constant 0 : i32
    %c0_i32_1 = arith.constant 0 : i32
    %c0_i32_2 = arith.constant 0 : i32
    return %c0_i32, %c0_i32_0, %c0_i32_1 : i32, i32, i32
  }
  func.func @transform_4(%arg0: i32) -> (i32, i32) {
    %c0_i32 = arith.constant 0 : i32
    %c0_i32_0 = arith.constant 0 : i32
    %c0_i32_1 = arith.constant 0 : i32
    return %c0_i32, %c0_i32_0 : i32, i32
  }
  func.func @transform_5(%arg0: i32) -> (i32, i32) {
    %c0_i32 = arith.constant 0 : i32
    %c0_i32_0 = arith.constant 0 : i32
    %c0_i32_1 = arith.constant 0 : i32
    return %c0_i32, %c0_i32_0 : i32, i32
  }
  func.func @transform_6(%arg0: i32) -> (i32, i32) {
    %c0_i32 = arith.constant 0 : i32
    %c0_i32_0 = arith.constant 0 : i32
    %c0_i32_1 = arith.constant 0 : i32
    return %c0_i32, %c0_i32_0 : i32, i32
  }
  func.func @transform_7(%arg0: i32) -> (i32, i32, i32) {
    %c0_i32 = arith.constant 0 : i32
    %c0_i32_0 = arith.constant 0 : i32
    %c0_i32_1 = arith.constant 0 : i32
    %c0_i32_2 = arith.constant 0 : i32
    return %c0_i32, %c0_i32_0, %c0_i32_1 : i32, i32, i32
  }
  func.func @transform_8(%arg0: i32) -> (i32, i32) {
    %c0_i32 = arith.constant 0 : i32
    %c0_i32_0 = arith.constant 0 : i32
    %c0_i32_1 = arith.constant 0 : i32
    return %c0_i32, %c0_i32_0 : i32, i32
  }
  func.func @transform_9(%arg0: i32) -> (i32, i32) {
    %c0_i32 = arith.constant 0 : i32
    %c0_i32_0 = arith.constant 0 : i32
    %c0_i32_1 = arith.constant 0 : i32
    return %c0_i32, %c0_i32_0 : i32, i32
  }
  func.func @transform_10(%arg0: i32) -> (i32, i32) {
    %c0_i32 = arith.constant 0 : i32
    %c0_i32_0 = arith.constant 0 : i32
    %c0_i32_1 = arith.constant 0 : i32
    return %c0_i32, %c0_i32_0 : i32, i32
  }
  func.func @transform_11(%arg0: i32) -> (i32, i32) {
    %c0_i32 = arith.constant 0 : i32
    %c0_i32_0 = arith.constant 0 : i32
    %c0_i32_1 = arith.constant 0 : i32
    return %c0_i32, %c0_i32_0 : i32, i32
  }
  func.func @transform_12(%arg0: i32) -> (i32, i32) {
    %c0_i32 = arith.constant 0 : i32
    %c0_i32_0 = arith.constant 0 : i32
    %c0_i32_1 = arith.constant 0 : i32
    return %c0_i32, %c0_i32_0 : i32, i32
  }
  func.func @transform_13(%arg0: i32) -> (i32, i32) {
    %c0_i32 = arith.constant 0 : i32
    %c0_i32_0 = arith.constant 0 : i32
    %c0_i32_1 = arith.constant 0 : i32
    return %c0_i32, %c0_i32_0 : i32, i32
  }
  func.func @transform_14(%arg0: i32) -> (i32, i32) {
    %c0_i32 = arith.constant 0 : i32
    %c0_i32_0 = arith.constant 0 : i32
    %c0_i32_1 = arith.constant 0 : i32
    return %c0_i32, %c0_i32_0 : i32, i32
  }
  func.func @transform_15(%arg0: i32) -> (i32, i32) {
    %c0_i32 = arith.constant 0 : i32
    %c0_i32_0 = arith.constant 0 : i32
    %c0_i32_1 = arith.constant 0 : i32
    return %c0_i32, %c0_i32_0 : i32, i32
  }
  func.func @transform_16(%arg0: i32) -> (i32, i32, i32) {
    %c0_i32 = arith.constant 0 : i32
    %c0_i32_0 = arith.constant 0 : i32
    %c0_i32_1 = arith.constant 0 : i32
    return %arg0, %c0_i32, %c0_i32_0 : i32, i32, i32
  }
}

</mosaic_0001>

<bundles_post_ra>
// kernel: res_block_forward.1
= control target key start
LH: loop header
LB: loop body
LE: loop exit
PB: predicated region body
PF: predicated region fallthrough
CT: control target
= control target key end

     0   :  { %s7226_s21 = smov 0   ;;  %s9659_s0 = inlined_call_operand.vmem [shape: f32[2,8,342], index: 0, kind: input, shape index: {}]   ;;  %s9660_s1 = inlined_call_operand.vmem [shape: f32[2,8,256], index: 1, kind: input, shape index: {}]   ;;  %s9661_s2 = inlined_call_operand.vmem [shape: f32[2,2,32,1], index: 2, kind: input, shape index: {}]   ;;  %s9662_s3 = inlined_call_operand.vmem [shape: f32[9,32,8], index: 3, kind: input, shape index: {}]   ;;  %s9663_s4 = inlined_call_operand.vmem [shape: f32[32,1], index: 4, kind: input, shape index: {}]   ;;  %s9664_s5 = inlined_call_operand.vmem [shape: f32[32,1], index: 5, kind: input, shape index: {}]   ;;  %s9665_s6 = inlined_call_operand.vmem [shape: f32[32,1], index: 6, kind: input, shape index: {}]   ;;  %s9666_s7 = inlined_call_operand.vmem [shape: f32[9,32,32], index: 7, kind: input, shape index: {}]   ;;  %s9667_s8 = inlined_call_operand.vmem [shape: f32[32,1], index: 8, kind: input, shape index: {}]   ;;  %s9668_s9 = inlined_call_operand.vmem [shape: f32[32,1], index: 9, kind: input, shape index: {}]   ;;  %s9669_s10 = inlined_call_operand.vmem [shape: f32[32,1], index: 10, kind: input, shape index: {}]   ;;  %s9670_s11 = inlined_call_operand.vmem [shape: f32[32,32], index: 11, kind: input, shape index: {}]   ;;  %s9671_s12 = inlined_call_operand.vmem [shape: f32[1,288], index: 12, kind: input, shape index: {}]   ;;  %s9672_s13 = inlined_call_operand.vmem [shape: f32[288,256], index: 13, kind: input, shape index: {}]   ;;  %s9673_s14 = inlined_call_operand.vmem [shape: f32[32,8], index: 14, kind: input, shape index: {}]   ;;  %s9674_s15 = inlined_call_operand.vmem [shape: f32[32,1], index: 15, kind: input, shape index: {}]   ;;  %s9675_s16 = inlined_call_operand.vmem [shape: f32[2,32,256], index: 16, kind: output, shape index: {}]  }
   0x1   :  { %9692 = sst [smem:[#allocation27_spill]] %s9659_s0 }
   0x2 LB: > { %s6348_s22 = sadd.s32 4294967295, %s7128_s21   ;;  %p6352_p0 = scmp.ge.s32.totalorder %s7128_s21, 1  ;;  %s7128_s21 = sphi %s7226_s21, %s26_s21  }
   0x3   : > { %p482_p1 = scmp.lt.s32.totalorder %s7128_s21, 3 }
   0x5   : > { %p483_p2 = pnand %p6352_p0, %p482_p1 }
   0x7   : > { %486 = sbr.rel (%p483_p2) target bundleno = 2861 (0xb2d), region = 84 }
   0xc   : > { %p542_p3 = scmp.lt.s32.totalorder %s6348_s22, 1  ;;  %v7237_v0 = vld [vmem:[%s9662_s3 + $0x20] sm:$0xff]  ;;  %vm594_vm0 = vcmask 64512   ;;  %v9682_v1 = vmov 0.0   ;;  %s9693_s28 = sld [smem:[#allocation27_spill]]  ;;  %v2474_v5 = vld [vmem:[%s9663_s4 + $0x10] sm:$0xff] }
   0xd   : > { %6776 = vmatprep.mubr.msk.f32.mxu1 %vm594_vm0, %v7237_v0  ;;  %671 = vmatprep.mubr.f32.mxu0 %v9682_v1  ;;  %s7131_s30 = smov 127   ;;  %s7132_s0 = smov 126   ;;  %v2475_v6 = vld [vmem:[%s9663_s4 + $0x18] sm:$0xff]  ;;  %v7139_v7 = vmov 0   ;;  %v2473_v8 = vld [vmem:[%s9663_s4 + $0x8] sm:$0xff]  ;;  %v2472_v9 = vld [vmem:[%s9663_s4] sm:$0xff] }
   0xe   : > { %s9794_s22 = smov (!%p542_p3, %s6348_s22), 1  ;;  %s7133_s17 = smov 110   ;;  %7021 = vset.pattern.permute.xlu1 %v7139_v7  ;;  %7020 = vset.pattern.permute.xlu0 %v7139_v7  ;;  %vm588_vm1 = vcmask 1039360   ;;  %v6361_v13 = vld [vmem:[%s9662_s3 + $0x28] sm:$0xff]  ;;  %v6362_v16 = vld [vmem:[%s9662_s3 + $0x30] sm:$0xff]  ;;  %vm978_vm2 = vcmask 1031168  }
   0xf   : > { %s7000_s25 = smul.u32 24, %s9794_s22  ;;  %s9688_s18 = smov 109   ;;  %v6363_v18 = vld [vmem:[%s9662_s3 + $0x38] sm:$0xff]  ;;  %v570_v22 = vld [vmem:[%s9662_s3] sm:$0xff]  ;;  %vm1193_vm3 = vcmask 900096   ;;  %v571_v26 = vld [vmem:[%s9662_s3 + $0x8] sm:$0xff] }
  0x10   : > { %s9680_s19 = smov 108   ;;  %s9678_s20 = smov 92   ;;  %v572_v27 = vld [vmem:[%s9662_s3 + $0x10] sm:$0xff]  ;;  %v573_v29 = vld [vmem:[%s9662_s3 + $0x18] sm:$0xff]  ;;  %v6380_v30 = vld [vmem:[%s9662_s3 + $0x40] sm:$0xff]  ;;  %vm1408_vm4 = vcmask 891904  }
  0x11   : > { %s9676_s23 = smov 91   ;;  %s9686_s24 = smov 90   ;;  %v6381_v33 = vld [vmem:[%s9662_s3 + $0x48] sm:$0xff]  ;;  %v6382_v34 = vld [vmem:[%s9662_s3 + $0x50] sm:$0xff]  ;;  %v6383_v37 = vld [vmem:[%s9662_s3 + $0x58] sm:$0xff]  ;;  %vm1623_vm5 = vcmask 883712  }
  0x12   : > { %s546_s29 = scalar_lea.vmem %s9693_s28, %s7000_s25  ;;  %v6392_v40 = vld [vmem:[%s9662_s3 + $0x60] sm:$0xff]  ;;  %v6393_v44 = vld [vmem:[%s9662_s3 + $0x68] sm:$0xff]  ;;  %v6394_v45 = vld [vmem:[%s9662_s3 + $0x70] sm:$0xff]  ;;  %vm1838_vm6 = vcmask 752640   ;;  %vm2053_vm7 = vcmask 744448   ;;  %vm2268_vm8 = vcmask 736256  }
  0x13   : > { %v7248_v2 = vld [vmem:[%s546_s29 + $0x8] sm:$0xff]  ;;  %v7250_v3 = vld [vmem:[%s546_s29] sm:$0xff]  ;;  %v7256_v4 = vld [vmem:[%s546_s29 + $0x10] sm:$0xff]  ;;  %vm2544_vm9 = vcmask 261120   ;;  %s6639_s25 = sshll.u32 %s9794_s22, 6  ;;  %vm3282_vm10 = vcmask 154624  }
  0x14   : > { %584 = vrot.lane.b32.xlu0 %v7248_v2, %s7131_s30  ;;  %582 = vrot.lane.b32.xlu1 %v7250_v3, %s7131_s30  ;;  %v6395_v47 = vld [vmem:[%s9662_s3 + $0x78] sm:$0xff]  ;;  %v6404_v48 = vld [vmem:[%s9662_s3 + $0x80] sm:$0xff]  ;;  %s7906_s29 = scalar_lea.vmem %s9661_s2, %s6639_s25  ;;  %vm3307_vm11 = vcmask 416768   ;;  %s9745_s27 = smov 109   ;;  %vm8531_vm12 = vmneg %vm3282_vm10 }
  0x15   : > { %v6405_v51 = vld [vmem:[%s9662_s3 + $0x88] sm:$0xff]  ;;  %v6406_v52 = vld [vmem:[%s9662_s3 + $0x90] sm:$0xff]  ;;  %v6407_v55 = vld [vmem:[%s9662_s3 + $0x98] sm:$0xff]  ;;  %s6638_s26 = sshll.u32 %s9794_s22, 4 }
  0x16   : > { %v6416_v58 = vld [vmem:[%s9662_s3 + $0xa0] sm:$0xff]  ;;  %v6417_v62 = vld [vmem:[%s9662_s3 + $0xa8] sm:$0xff]  ;;  %v6418_v63 = vld [vmem:[%s9662_s3 + $0xb0] sm:$0xff] }
  0x18   : > { %586 = vrot.lane.b32.xlu0 %v7256_v4, %s7131_s30  ;;  %974 = vrot.lane.b32.xlu1 %v7248_v2, %s7132_s0 }
  0x1c   : > { %976 = vrot.lane.b32.xlu0 %v7256_v4, %s7132_s0  ;;  %972 = vrot.lane.b32.xlu1 %v7250_v3, %s7132_s0 }
  0x20   : > { %1191 = vrot.lane.b32.xlu0 %v7256_v4, %s7133_s17  ;;  %1189 = vrot.lane.b32.xlu1 %v7248_v2, %s7133_s17 }
  0x24   : > { %1187 = vrot.lane.b32.xlu0 %v7250_v3, %s7133_s17  ;;  %1404 = vrot.lane.b32.xlu1 %v7248_v2, %s9688_s18 }
  0x28   : > { %1406 = vrot.lane.b32.xlu0 %v7256_v4, %s9688_s18  ;;  %1402 = vrot.lane.b32.xlu1 %v7250_v3, %s9688_s18 }
  0x2c   : > { %1621 = vrot.lane.b32.xlu0 %v7256_v4, %s9680_s19  ;;  %1619 = vrot.lane.b32.xlu1 %v7248_v2, %s9680_s19 }
  0x30   : > { %1617 = vrot.lane.b32.xlu0 %v7250_v3, %s9680_s19  ;;  %1834 = vrot.lane.b32.xlu1 %v7248_v2, %s9678_s20  ;;  %s9746_s19 = smov 108  }
  0x34   : > { %1836 = vrot.lane.b32.xlu0 %v7256_v4, %s9678_s20  ;;  %1832 = vrot.lane.b32.xlu1 %v7250_v3, %s9678_s20 }
  0x38   : > { %2051 = vrot.lane.b32.xlu0 %v7256_v4, %s9676_s23  ;;  %2049 = vrot.lane.b32.xlu1 %v7248_v2, %s9676_s23 }
  0x3c   : > { %2047 = vrot.lane.b32.xlu0 %v7250_v3, %s9676_s23  ;;  %2264 = vrot.lane.b32.xlu1 %v7248_v2, %s9686_s24 }
  0x40   : > { %2266 = vrot.lane.b32.xlu0 %v7256_v4, %s9686_s24  ;;  %2262 = vrot.lane.b32.xlu1 %v7250_v3, %s9686_s24 }
  0x44   : > { %2488 = vperm.xlu1 %7021, %v2474_v5   ;;  %2493 = vperm.xlu0 %7020, %v2475_v6   ;;  %v6429_v5 = vld [vmem:[%s9662_s3 + $0xc8] sm:$0xff]  ;;  %v6430_v6 = vld [vmem:[%s9662_s3 + $0xd0] sm:$0xff] }
  0x48   : > { %2483 = vperm.xlu1 %7021, %v2473_v8   ;;  %2478 = vperm.xlu0 %7020, %v2472_v9  }
  0x86   : > { %v585_v10 = vpop.permute.xlu0 %584  ;;  %v583_v11 = vpop.permute.xlu1 %582 }
  0x87   : > { %v589_v17 = vsel %vm588_vm1, %v583_v11, %v585_v10 }
  0x8a   : > { %v587_v12 = vpop.permute.xlu0 %586  ;;  %v975_v14 = vpop.permute.xlu1 %974 }
  0x8b   : > { %6774 = vmatprep.subr.mxu1 %v587_v12  ;;  %v590_v15 = vsel %vm588_vm1, %v585_v10, %v587_v12  ;;  %v6431_v10 = vld [vmem:[%s9662_s3 + $0xd8] sm:$0xff] }
  0x8c   : > { %637 = vmatprep.subr.mxu0 %v590_v15  ;;  %6775 = vmatpush3.msra.mxu1 %v587_v12  ;;  %v6440_v12 = vld [vmem:[%s9662_s3 + $0xe0] sm:$0xff]  ;;  %v6442_v15 = vld [vmem:[%s9662_s3 + $0xf0] sm:$0xff] }
  0x8d   : > { %638 = vmatpush1.msra.mxu0 %v589_v17  ;;  %6777 = vmatmul.mubr.msk.f32.vlgmr.msra.gmra.mxu1 %vm594_vm0, %v6361_v13  ;;  %v6443_v17 = vld [vmem:[%s9662_s3 + $0xf8] sm:$0xff] }
  0x8e   : > { %6364 = vmatmul.mubr.msk.f32.vlgmr.msra.gmra.mxu0 %vm594_vm0, %v7237_v0  ;;  %6779 = vmatprep.mubr.msk.f32.mxu1 %vm594_vm0, %v6362_v16  ;;  %v977_v19 = vpop.permute.xlu0 %976  ;;  %v973_v20 = vpop.permute.xlu1 %972 }
  0x8f   : > { %677 = vmatprep.mubr.f32.mxu0 %v9682_v1  ;;  %823 = vmatprep.subr.mxu1 %v7248_v2  ;;  %v980_v21 = vsel %vm978_vm2, %v975_v14, %v977_v19  ;;  %v979_v28 = vsel %vm978_vm2, %v973_v20, %v975_v14  ;;  %v6419_v2 = vld [vmem:[%s9662_s3 + $0xb8] sm:$0xff]  ;;  %v6454_v20 = vld [vmem:[%s9662_s3 + $0x110] sm:$0xff] }
  0x90   : > { %824 = vmatpush1.msra.mxu1 %v7250_v3  ;;  %6782 = vmatprep.subr.mxu0 %v7256_v4  ;;  %v6428_v3 = vld [vmem:[%s9662_s3 + $0xc0] sm:$0xff] }
  0x91   : > { %6780 = vmatmul.mubr.msk.f32.gmra.mxu1 %vm594_vm0, %v6363_v18  ;;  %6783 = vmatpush3.msra.mxu0 %v7256_v4 }
  0x92   : > { %6365 = vmatmul.mubr.msk.f32.gmra.mxu0 %vm594_vm0, %v6361_v13  ;;  %857 = vmatprep.mubr.f32.mxu1 %v9682_v1  ;;  %v1190_v23 = vpop.permute.xlu1 %1189  ;;  %v1192_v24 = vpop.permute.xlu0 %1191  ;;  %v6441_v13 = vld [vmem:[%s9662_s3 + $0xe8] sm:$0xff] }
  0x93   : > { %683 = vmatprep.mubr.f32.mxu0 %v9682_v1  ;;  %1026 = vmatprep.subr.mxu0 %v980_v21  ;;  %v1195_v25 = vsel %vm1193_vm3, %v1190_v23, %v1192_v24  ;;  %v6455_v21 = vld [vmem:[%s9662_s3 + $0x118] sm:$0xff] }
  0x94   : > { %6790 = vmatprep.subr.mxu1 %v977_v19 }
  0x95   : > { %6372 = vmatmul.mubr.msk.f32.vlgmr.msra.gmra.mxu1 %vm594_vm0, %v570_v22 }
  0x96   : > { %6366 = vmatmul.mubr.msk.f32.gmra.mxu0 %vm594_vm0, %v6362_v16  ;;  %863 = vmatprep.mubr.f32.mxu1 %v9682_v1  ;;  %v1188_v31 = vpop.permute.xlu0 %1187  ;;  %v1405_v32 = vpop.permute.xlu1 %1404 }
  0x97   : > { %689 = vmatprep.mubr.f32.mxu0 %v9682_v1  ;;  %6791 = vmatpush3.msra.mxu1 %v977_v19  ;;  %v1194_v36 = vsel %vm1193_vm3, %v1188_v31, %v1190_v23  ;;  %v6453_v19 = vld [vmem:[%s9662_s3 + $0x108] sm:$0xff] }
  0x98   : > { %1241 = vmatprep.subr.mxu1 %v1195_v25 }
  0x99   : > { %6373 = vmatmul.mubr.msk.f32.gmra.mxu1 %vm594_vm0, %v571_v26 }
  0x9a   : > { %6367 = vmatmul.mubr.msk.f32.gmra.mxu0 %vm594_vm0, %v6363_v18  ;;  %869 = vmatprep.mubr.f32.mxu1 %v9682_v1  ;;  %v1407_v35 = vpop.permute.xlu0 %1406  ;;  %v1403_v38 = vpop.permute.xlu1 %1402  ;;  %v6452_v18 = vld [vmem:[%s9662_s3 + $0x100] sm:$0xff] }
  0x9b   : > { %6784 = vmatprep.mubr.msk.f32.mxu0 %vm594_vm0, %v570_v22  ;;  %v1410_v39 = vsel %vm1408_vm4, %v1405_v32, %v1407_v35  ;;  %v1409_v46 = vsel %vm1408_vm4, %v1403_v38, %v1405_v32  ;;  %v7550_v22 = vld [vmem:[%s9670_s11] sm:$0xff] }
  0x9c   : > { %9694 = vst [vmem:[#allocation2_spill] sm:$0xff] %v7550_v22 }
  0x9d   : > { %6374 = vmatmul.mubr.msk.f32.gmra.mxu1 %vm594_vm0, %v572_v27 }
  0x9e   : > { %6785 = vmatmul.mubr.msk.f32.vlgmr.msra.gmra.mxu0 %vm594_vm0, %v571_v26  ;;  %875 = vmatprep.mubr.f32.mxu1 %v9682_v1  ;;  %v1620_v41 = vpop.permute.xlu1 %1619  ;;  %v1622_v42 = vpop.permute.xlu0 %1621 }
  0x9f   : > { %6787 = vmatprep.mubr.msk.f32.mxu0 %vm594_vm0, %v572_v27  ;;  %1027 = vmatpush1.msra.mxu0 %v979_v28  ;;  %v1625_v43 = vsel %vm1623_vm5, %v1620_v41, %v1622_v42 }
  0xa0   : > { %6798 = vmatprep.subr.mxu0 %v1192_v24 }
  0xa1   : > { %6375 = vmatmul.mubr.msk.f32.gmra.mxu1 %vm594_vm0, %v573_v29 }
  0xa2   : > { %6788 = vmatmul.mubr.msk.f32.gmra.mxu0 %vm594_vm0, %v573_v29  ;;  %6792 = vmatprep.mubr.msk.f32.mxu1 %vm594_vm0, %v6380_v30  ;;  %v1618_v49 = vpop.permute.xlu0 %1617  ;;  %v1835_v50 = vpop.permute.xlu1 %1834 }
  0xa3   : > { %1060 = vmatprep.mubr.f32.mxu0 %v9682_v1  ;;  %v1624_v54 = vsel %vm1623_vm5, %v1618_v49, %v1620_v41 }
  0xa5   : > { %6793 = vmatmul.mubr.msk.f32.vlgmr.msra.gmra.mxu1 %vm594_vm0, %v6381_v33 }
  0xa6   : > { %6384 = vmatmul.mubr.msk.f32.vlgmr.msra.gmra.mxu0 %vm594_vm0, %v6380_v30  ;;  %6795 = vmatprep.mubr.msk.f32.mxu1 %vm594_vm0, %v6382_v34  ;;  %v1837_v53 = vpop.permute.xlu0 %1836  ;;  %v1833_v56 = vpop.permute.xlu1 %1832 }
  0xa7   : > { %1066 = vmatprep.mubr.f32.mxu0 %v9682_v1  ;;  %1242 = vmatpush1.msra.mxu1 %v1194_v36  ;;  %v1840_v57 = vsel %vm1838_vm6, %v1835_v50, %v1837_v53  ;;  %v1839_v0 = vsel %vm1838_vm6, %v1833_v56, %v1835_v50 }
  0xa8   : > { %6799 = vmatpush3.msra.mxu0 %v1192_v24  ;;  %6806 = vmatprep.subr.mxu1 %v1407_v35 }
  0xa9   : > { %6796 = vmatmul.mubr.msk.f32.gmra.mxu1 %vm594_vm0, %v6383_v37  ;;  %1456 = vmatprep.subr.mxu0 %v1410_v39 }
  0xaa   : > { %6385 = vmatmul.mubr.msk.f32.gmra.mxu0 %vm594_vm0, %v6381_v33  ;;  %1275 = vmatprep.mubr.f32.mxu1 %v9682_v1  ;;  %v2050_v59 = vpop.permute.xlu1 %2049  ;;  %v2052_v60 = vpop.permute.xlu0 %2051 }
  0xab   : > { %1072 = vmatprep.mubr.f32.mxu0 %v9682_v1  ;;  %v2055_v61 = vsel %vm2053_vm7, %v2050_v59, %v2052_v60 }
  0xad   : > { %6396 = vmatmul.mubr.msk.f32.vlgmr.msra.gmra.mxu1 %vm594_vm0, %v6392_v40 }
  0xae   : > { %6386 = vmatmul.mubr.msk.f32.gmra.mxu0 %vm594_vm0, %v6382_v34  ;;  %1281 = vmatprep.mubr.f32.mxu1 %v9682_v1  ;;  %v2048_v4 = vpop.permute.xlu0 %2047  ;;  %v2265_v9 = vpop.permute.xlu1 %2264 }
  0xaf   : > { %1078 = vmatprep.mubr.f32.mxu0 %v9682_v1  ;;  %6807 = vmatpush3.msra.mxu1 %v1407_v35  ;;  %v2054_v8 = vsel %vm2053_vm7, %v2048_v4, %v2050_v59 }
  0xb0   : > { %1671 = vmatprep.subr.mxu1 %v1625_v43 }
  0xb1   : > { %6397 = vmatmul.mubr.msk.f32.gmra.mxu1 %vm594_vm0, %v6393_v44 }
  0xb2   : > { %6387 = vmatmul.mubr.msk.f32.gmra.mxu0 %vm594_vm0, %v6383_v37  ;;  %1287 = vmatprep.mubr.f32.mxu1 %v9682_v1  ;;  %v2267_v7 = vpop.permute.xlu0 %2266  ;;  %v2263_v14 = vpop.permute.xlu1 %2262 }
  0xb3   : > { %6800 = vmatprep.mubr.msk.f32.mxu0 %vm594_vm0, %v6392_v40  ;;  %v2270_v11 = vsel %vm2268_vm8, %v2265_v9, %v2267_v7  ;;  %v2269_v16 = vsel %vm2268_vm8, %v2263_v14, %v2265_v9 }
  0xb5   : > { %6398 = vmatmul.mubr.msk.f32.gmra.mxu1 %vm594_vm0, %v6394_v45 }
  0xb6   : > { %6801 = vmatmul.mubr.msk.f32.vlgmr.msra.gmra.mxu0 %vm594_vm0, %v6393_v44  ;;  %1293 = vmatprep.mubr.f32.mxu1 %v9682_v1 }
  0xb7   : > { %6803 = vmatprep.mubr.msk.f32.mxu0 %vm594_vm0, %v6394_v45  ;;  %1457 = vmatpush1.msra.mxu0 %v1409_v46 }
  0xb8   : > { %6814 = vmatprep.subr.mxu0 %v1622_v42 }
  0xb9   : > { %6399 = vmatmul.mubr.msk.f32.gmra.mxu1 %vm594_vm0, %v6395_v47 }
  0xba   : > { %6804 = vmatmul.mubr.msk.f32.gmra.mxu0 %vm594_vm0, %v6395_v47  ;;  %6808 = vmatprep.mubr.msk.f32.mxu1 %vm594_vm0, %v6404_v48 }
  0xbb   : > { %1490 = vmatprep.mubr.f32.mxu0 %v9682_v1 }
  0xbd   : > { %6809 = vmatmul.mubr.msk.f32.vlgmr.msra.gmra.mxu1 %vm594_vm0, %v6405_v51 }
  0xbe   : > { %6408 = vmatmul.mubr.msk.f32.vlgmr.msra.gmra.mxu0 %vm594_vm0, %v6404_v48  ;;  %6811 = vmatprep.mubr.msk.f32.mxu1 %vm594_vm0, %v6406_v52 }
  0xbf   : > { %1496 = vmatprep.mubr.f32.mxu0 %v9682_v1  ;;  %1672 = vmatpush1.msra.mxu1 %v1624_v54 }
  0xc0   : > { %6815 = vmatpush3.msra.mxu0 %v1622_v42  ;;  %6822 = vmatprep.subr.mxu1 %v1837_v53 }
  0xc1   : > { %6812 = vmatmul.mubr.msk.f32.gmra.mxu1 %vm594_vm0, %v6407_v55  ;;  %1886 = vmatprep.subr.mxu0 %v1840_v57 }
  0xc2   : > { %6409 = vmatmul.mubr.msk.f32.gmra.mxu0 %vm594_vm0, %v6405_v51  ;;  %1705 = vmatprep.mubr.f32.mxu1 %v9682_v1 }
  0xc3   : > { %1502 = vmatprep.mubr.f32.mxu0 %v9682_v1 }
  0xc5   : > { %6420 = vmatmul.mubr.msk.f32.vlgmr.msra.gmra.mxu1 %vm594_vm0, %v6416_v58 }
  0xc6   : > { %6410 = vmatmul.mubr.msk.f32.gmra.mxu0 %vm594_vm0, %v6406_v52  ;;  %1711 = vmatprep.mubr.f32.mxu1 %v9682_v1 }
  0xc7   : > { %1508 = vmatprep.mubr.f32.mxu0 %v9682_v1  ;;  %6823 = vmatpush3.msra.mxu1 %v1837_v53 }
  0xc8   : > { %2101 = vmatprep.subr.mxu1 %v2055_v61 }
  0xc9   : > { %6421 = vmatmul.mubr.msk.f32.gmra.mxu1 %vm594_vm0, %v6417_v62 }
  0xca   : > { %6411 = vmatmul.mubr.msk.f32.gmra.mxu0 %vm594_vm0, %v6407_v55  ;;  %1717 = vmatprep.mubr.f32.mxu1 %v9682_v1 }
  0xcb   : > { %6816 = vmatprep.mubr.msk.f32.mxu0 %vm594_vm0, %v6416_v58 }
  0xcd   : > { %6422 = vmatmul.mubr.msk.f32.gmra.mxu1 %vm594_vm0, %v6418_v63 }
  0xce   : > { %6817 = vmatmul.mubr.msk.f32.vlgmr.msra.gmra.mxu0 %vm594_vm0, %v6417_v62  ;;  %1723 = vmatprep.mubr.f32.mxu1 %v9682_v1 }
  0xcf   : > { %6819 = vmatprep.mubr.msk.f32.mxu0 %vm594_vm0, %v6418_v63  ;;  %1887 = vmatpush1.msra.mxu0 %v1839_v0 }
  0xd0   : > { %6830 = vmatprep.subr.mxu0 %v2052_v60 }
  0xd1   : > { %6423 = vmatmul.mubr.msk.f32.gmra.mxu1 %vm594_vm0, %v6419_v2 }
  0xd2   : > { %6820 = vmatmul.mubr.msk.f32.gmra.mxu0 %vm594_vm0, %v6419_v2  ;;  %6824 = vmatprep.mubr.msk.f32.mxu1 %vm594_vm0, %v6428_v3 }
  0xd3   : > { %1920 = vmatprep.mubr.f32.mxu0 %v9682_v1 }
  0xd5   : > { %6825 = vmatmul.mubr.msk.f32.vlgmr.msra.gmra.mxu1 %vm594_vm0, %v6429_v5 }
  0xd6   : > { %6432 = vmatmul.mubr.msk.f32.vlgmr.msra.gmra.mxu0 %vm594_vm0, %v6428_v3  ;;  %6827 = vmatprep.mubr.msk.f32.mxu1 %vm594_vm0, %v6430_v6 }
  0xd7   : > { %1926 = vmatprep.mubr.f32.mxu0 %v9682_v1  ;;  %2102 = vmatpush1.msra.mxu1 %v2054_v8 }
  0xd8   : > { %6831 = vmatpush3.msra.mxu0 %v2052_v60  ;;  %6838 = vmatprep.subr.mxu1 %v2267_v7 }
  0xd9   : > { %6828 = vmatmul.mubr.msk.f32.gmra.mxu1 %vm594_vm0, %v6431_v10  ;;  %2316 = vmatprep.subr.mxu0 %v2270_v11 }
  0xda   : > { %6433 = vmatmul.mubr.msk.f32.gmra.mxu0 %vm594_vm0, %v6429_v5  ;;  %2135 = vmatprep.mubr.f32.mxu1 %v9682_v1 }
  0xdb   : > { %1932 = vmatprep.mubr.f32.mxu0 %v9682_v1 }
  0xdd   : > { %6444 = vmatmul.mubr.msk.f32.vlgmr.msra.gmra.mxu1 %vm594_vm0, %v6440_v12 }
  0xde   : > { %6434 = vmatmul.mubr.msk.f32.gmra.mxu0 %vm594_vm0, %v6430_v6  ;;  %2141 = vmatprep.mubr.f32.mxu1 %v9682_v1 }
  0xdf   : > { %1938 = vmatprep.mubr.f32.mxu0 %v9682_v1  ;;  %6839 = vmatpush3.msra.mxu1 %v2267_v7 }
  0xe1   : > { %6445 = vmatmul.mubr.msk.f32.gmra.mxu1 %vm594_vm0, %v6441_v13 }
  0xe2   : > { %6435 = vmatmul.mubr.msk.f32.gmra.mxu0 %vm594_vm0, %v6431_v10  ;;  %2147 = vmatprep.mubr.f32.mxu1 %v9682_v1 }
  0xe3   : > { %6832 = vmatprep.mubr.msk.f32.mxu0 %vm594_vm0, %v6440_v12 }
  0xe5   : > { %6446 = vmatmul.mubr.msk.f32.gmra.mxu1 %vm594_vm0, %v6442_v15 }
  0xe6   : > { %6833 = vmatmul.mubr.msk.f32.vlgmr.msra.gmra.mxu0 %vm594_vm0, %v6441_v13  ;;  %2153 = vmatprep.mubr.f32.mxu1 %v9682_v1 }
  0xe7   : > { %6835 = vmatprep.mubr.msk.f32.mxu0 %vm594_vm0, %v6442_v15  ;;  %2317 = vmatpush1.msra.mxu0 %v2269_v16 }
  0xe9   : > { %6447 = vmatmul.mubr.msk.f32.gmra.mxu1 %vm594_vm0, %v6443_v17 }
  0xea   : > { %6836 = vmatmul.mubr.msk.f32.gmra.mxu0 %vm594_vm0, %v6443_v17  ;;  %6840 = vmatprep.mubr.msk.f32.mxu1 %vm594_vm0, %v6452_v18 }
  0xeb   : > { %2350 = vmatprep.mubr.f32.mxu0 %v9682_v1 }
  0xed   : > { %6841 = vmatmul.mubr.msk.f32.vlgmr.msra.gmra.mxu1 %vm594_vm0, %v6453_v19 }
  0xee   : > { %6456 = vmatmul.mubr.msk.f32.vlgmr.msra.gmra.mxu0 %vm594_vm0, %v6452_v18  ;;  %6843 = vmatprep.mubr.msk.f32.mxu1 %vm594_vm0, %v6454_v20 }
  0xef   : > { %2356 = vmatprep.mubr.f32.mxu0 %v9682_v1 }
  0xf1   : > { %6844 = vmatmul.mubr.msk.f32.gmra.mxu1 %vm594_vm0, %v6455_v21 }
  0xf2   : > { %6457 = vmatmul.mubr.msk.f32.gmra.mxu0 %vm594_vm0, %v6453_v19  ;;  %2621 = vmatprep.mubr.f32.mxu1 %v9682_v1 }
  0xf3   : > { %2362 = vmatprep.mubr.f32.mxu0 %v9682_v1 }
  0xf6   : > { %6458 = vmatmul.mubr.msk.f32.gmra.mxu0 %vm594_vm0, %v6454_v20 }
  0xf7   : > { %2368 = vmatprep.mubr.f32.mxu0 %v9682_v1 }
  0xfa   : > { %6459 = vmatmul.mubr.msk.f32.gmra.mxu0 %vm594_vm0, %v6455_v21 }
  0xfb   : > { %6854 = vmatprep.mubr.msk.f32.mxu0 %vm2544_vm9, %v7550_v22 }
 0x14d   : > { %v6778_v23 = vpop.f32.mrf.mxu1 }
 0x14e   : > { %v673_v24 = vpop.f32.mrf.mxu0 }
 0x14f   : > { %v7554_v25 = vpop.f32.mrf.mxu1 }
 0x150   : > { %v7556_v26 = vpop.f32.mrf.mxu0 }
 0x151   : > { %v6781_v27 = vpop.f32.mrf.mxu1 }
 0x152   : > { %v679_v28 = vpop.f32.mrf.mxu0 }
 0x153   : > { %v7558_v29 = vpop.f32.mrf.mxu1 }
 0x154   : > { %v7560_v30 = vpop.f32.mrf.mxu0 }
 0x155   : > { %v859_v31 = vpop.f32.mrf.mxu1 }
 0x156   : > { %v860_v32 = vadd.f32 %v859_v31, %v673_v24  ;;  %v685_v33 = vpop.f32.mrf.mxu0 }
 0x157   : > { %v7562_v34 = vpop.f32.mrf.mxu1 }
 0x158   : > { %v7564_v35 = vpop.f32.mrf.mxu0 }
 0x159   : > { %v865_v36 = vpop.f32.mrf.mxu1 }
 0x15a   : > { %v866_v37 = vadd.f32 %v865_v36, %v679_v28  ;;  %v691_v38 = vpop.f32.mrf.mxu0 }
 0x15b   : > { %v7566_v39 = vpop.f32.mrf.mxu1 }
 0x15c   : > { %v7568_v40 = vpop.f32.mrf.mxu0 }
 0x15d   : > { %v871_v41 = vpop.f32.mrf.mxu1 }
 0x15e   : > { %v872_v42 = vadd.f32 %v871_v41, %v685_v33  ;;  %v6786_v43 = vpop.f32.mrf.mxu0 }
 0x15f   : > { %v954_v44 = vadd.f32 %v6786_v43, %v6778_v23  ;;  %v7570_v45 = vpop.f32.mrf.mxu1 }
 0x160   : > { %v7572_v46 = vpop.f32.mrf.mxu0 }
 0x161   : > { %v877_v47 = vpop.f32.mrf.mxu1 }
 0x162   : > { %v7574_v48 = vadd.f32 %v877_v47, %v691_v38  ;;  %v6789_v49 = vpop.f32.mrf.mxu0 }
 0x163   : > { %v7576_v50 = vadd.f32 %v6789_v49, %v6781_v27  ;;  %v7578_v51 = vpop.f32.mrf.mxu1 }
 0x164   : > { %v7580_v52 = vpop.f32.mrf.mxu0 }
 0x165   : > { %v6794_v53 = vpop.f32.mrf.mxu1 }
 0x166   : > { %v7582_v54 = vadd.f32 %v6794_v53, %v954_v44  ;;  %v1062_v55 = vpop.f32.mrf.mxu0 }
 0x167   : > { %v1170_v56 = vadd.f32 %v1062_v55, %v860_v32  ;;  %v7584_v57 = vpop.f32.mrf.mxu1 }
 0x168   : > { %v7586_v58 = vpop.f32.mrf.mxu0 }
 0x169   : > { %v7588_v59 = vpop.f32.mrf.mxu1 }
 0x16a   : > { %v1068_v60 = vpop.f32.mrf.mxu0 }
 0x16b   : > { %v1173_v61 = vadd.f32 %v1068_v60, %v866_v37  ;;  %v7590_v62 = vpop.f32.mrf.mxu1 }
 0x16c   : > { %v7592_v63 = vpop.f32.mrf.mxu0 }
 0x16d   : > { %v1277_v0 = vpop.f32.mrf.mxu1 }
 0x16e   : > { %v7594_v2 = vadd.f32 %v1277_v0, %v1170_v56  ;;  %v1074_v3 = vpop.f32.mrf.mxu0 }
 0x16f   : > { %v1176_v4 = vadd.f32 %v1074_v3, %v872_v42  ;;  %v7596_v5 = vpop.f32.mrf.mxu1 }
 0x170   : > { %v7598_v6 = vpop.f32.mrf.mxu0 }
 0x171   : > { %v1283_v7 = vpop.f32.mrf.mxu1 }
 0x172   : > { %v7600_v8 = vadd.f32 %v1283_v7, %v1173_v61  ;;  %v7602_v9 = vpop.f32.mrf.mxu0 }
 0x173   : > { %v7604_v10 = vpop.f32.mrf.mxu1 }
 0x174   : > { %v7606_v11 = vpop.f32.mrf.mxu0 }
 0x175   : > { %v1289_v12 = vpop.f32.mrf.mxu1 }
 0x176   : > { %v7608_v13 = vadd.f32 %v1289_v12, %v1176_v4  ;;  %v6802_v14 = vpop.f32.mrf.mxu0 }
 0x177   : > { %v7610_v15 = vpop.f32.mrf.mxu1 }
 0x178   : > { %9695 = vst [vmem:[#allocation3_spill] sm:$0xff] %v7608_v13  ;;  %v7612_v16 = vpop.f32.mrf.mxu0 }
 0x179   : > { %v7614_v17 = vpop.f32.mrf.mxu1 }
 0x17a   : > { %v6805_v18 = vpop.f32.mrf.mxu0 }
 0x17b   : > { %v7616_v19 = vpop.f32.mrf.mxu1 }
 0x17c   : > { %v1376_v20 = vpop.f32.mrf.mxu0 }
 0x17d   : > { %v6810_v21 = vpop.f32.mrf.mxu1 }
 0x17e   : > { %v7618_v23 = vpop.f32.mrf.mxu0 }
 0x17f   : > { %v7620_v24 = vpop.f32.mrf.mxu1 }
 0x180   : > { %v7622_v27 = vpop.f32.mrf.mxu0 }
 0x181   : > { %v6813_v28 = vpop.f32.mrf.mxu1 }
 0x182   : > { %v7624_v31 = vpop.f32.mrf.mxu0 }
 0x183   : > { %v7626_v32 = vpop.f32.mrf.mxu1 }
 0x184   : > { %v7628_v33 = vpop.f32.mrf.mxu0 }
 0x185   : > { %v7630_v36 = vpop.f32.mrf.mxu1 }
 0x186   : > { %v7632_v37 = vpop.f32.mrf.mxu0 }
 0x187   : > { %9696 = vst [vmem:[#allocation4_spill] sm:$0xff] %v7632_v37  ;;  %v7634_v38 = vpop.f32.mrf.mxu1 }
 0x188   : > { %9697 = vst [vmem:[#allocation5_spill] sm:$0xff] %v7634_v38  ;;  %v7636_v41 = vpop.f32.mrf.mxu0 }
 0x189   : > { %v7638_v42 = vpop.f32.mrf.mxu1 }
 0x18a   : > { %9698 = vst [vmem:[#allocation6_spill] sm:$0xff] %v7638_v42  ;;  %v7640_v43 = vpop.f32.mrf.mxu0 }
 0x18b   : > { %v7642_v44 = vpop.f32.mrf.mxu1 }
 0x18c   : > { %9699 = vst [vmem:[#allocation7_spill] sm:$0xff] %v7642_v44  ;;  %v7644_v47 = vpop.f32.mrf.mxu0 }
 0x18d   : > { %9700 = vst [vmem:[#allocation8_spill] sm:$0xff] %v7644_v47  ;;  %v7646_v49 = vpop.f32.mrf.mxu1 }
 0x18e   : > { %9701 = vst [vmem:[#allocation9_spill] sm:$0xff] %v7646_v49  ;;  %v6818_v53 = vpop.f32.mrf.mxu0 }
 0x18f   : > { %v7648_v55 = vpop.f32.mrf.mxu1 }
 0x190   : > { %9702 = vst [vmem:[#allocation10_spill] sm:$0xff] %v7648_v55  ;;  %v1796_v56 = vpop.f32.mrf.mxu0 }
 0x191   : > { %v7650_v60 = vpop.f32.mrf.mxu1 }
 0x192   : > { %9703 = vst [vmem:[#allocation11_spill] sm:$0xff] %v7650_v60  ;;  %v6821_v61 = vpop.f32.mrf.mxu0  ;;  %v2517_v60 = vlaneseq }
 0x193   : > { %v7652_v0 = vpop.f32.mrf.mxu1 }
 0x194   : > { %9704 = vst [vmem:[#allocation12_spill] sm:$0xff] %v7652_v0  ;;  %v1806_v3 = vpop.f32.mrf.mxu0  ;;  %v7676_v37 = vshrl.u32 %v2517_v60, 7  ;;  %v1181_v60 = vadd.f32 %v7588_v59, %v7576_v50 }
 0x195   : > { %v6826_v4 = vpop.f32.mrf.mxu1 }
 0x196   : > { %v7654_v7 = vpop.f32.mrf.mxu0 }
 0x197   : > { %9705 = vst [vmem:[#allocation13_spill] sm:$0xff] %v7654_v7  ;;  %v7656_v12 = vpop.f32.mrf.mxu1 }
 0x198   : > { %v7658_v1 = vpop.f32.mrf.mxu0 }
 0x199   : > { %9706 = vst [vmem:[#allocation14_spill] sm:$0xff] %v7658_v1  ;;  %v6829_v22 = vpop.f32.mrf.mxu1 }
 0x19a   : > { %v7660_v42 = vpop.f32.mrf.mxu0 }
 0x19b   : > { %9707 = vst [vmem:[#allocation15_spill] sm:$0xff] %v7660_v42  ;;  %v7662_v44 = vpop.f32.mrf.mxu1 }
 0x19c   : > { %v7664_v49 = vpop.f32.mrf.mxu0 }
 0x19d   : > { %9708 = vst [vmem:[#allocation16_spill] sm:$0xff] %v7664_v49  ;;  %v7666_v55 = vpop.f32.mrf.mxu1 }
 0x19e   : > { %9709 = vst [vmem:[#allocation17_spill] sm:$0xff] %v7666_v55  ;;  %v7668_v47 = vpop.f32.mrf.mxu0  ;;  %v2527_v55 = vsub.s32 2, %v7676_v37 }
 0x19f   : > { %9710 = vst [vmem:[#allocation18_spill] sm:$0xff] %v7668_v47  ;;  %v7670_v0 = vpop.f32.mrf.mxu1  ;;  %v949_v47 = vadd.f32 %v7572_v46, %v7554_v25  ;;  %v1390_v25 = vadd.f32 %v6802_v14, %v7582_v54  ;;  %v1396_v46 = vadd.f32 %v6805_v18, %v1181_v60  ;;  %v868_v14 = vadd.f32 %v7566_v39, %v7560_v30 }
 0x1a0   : > { %9711 = vst [vmem:[#allocation19_spill] sm:$0xff] %v7670_v0  ;;  %v7672_v38 = vpop.f32.mrf.mxu0  ;;  %v959_v0 = vadd.f32 %v7580_v52, %v7558_v29  ;;  %v862_v29 = vadd.f32 %v7562_v34, %v7556_v26  ;;  %v2519_v52 = vsub.s32 0, %v7676_v37  ;;  %v874_v26 = vadd.f32 %v7570_v45, %v7564_v35 }
 0x1a1   : > { %9712 = vst [vmem:[#allocation20_spill] sm:$0xff] %v7672_v38  ;;  %v7674_v7 = vpop.f32.mrf.mxu1  ;;  %v880_v34 = vadd.f32 %v7578_v51, %v7568_v40  ;;  %v1179_v39 = vadd.f32 %v7602_v9, %v7574_v48  ;;  %v7729_v40 = vpop.permute.xlu1 %2488 }
 0x1a2   : > { %9713 = vst [vmem:[#allocation21_spill] sm:$0xff] %v7674_v7  ;;  %v7678_v1 = vpop.f32.mrf.mxu0  ;;  %v1171_v18 = vadd.f32 %v7586_v58, %v862_v29  ;;  %v1177_v35 = vadd.f32 %v7598_v6, %v874_v26  ;;  %v9721_v26 = vld [vmem:[#allocation5_spill] sm:$0xff] }
 0x1a3   : > { %9714 = vst [vmem:[#allocation22_spill] sm:$0xff] %v7678_v1  ;;  %v7680_v42 = vpop.f32.mrf.mxu1  ;;  %v1178_v1 = vadd.f32 %v7590_v62, %v959_v0  ;;  %v1605_v62 = vadd.f32 %v6810_v21, %v1390_v25  ;;  %v1611_v0 = vadd.f32 %v6813_v28, %v1396_v46  ;;  %v1174_v28 = vadd.f32 %v7592_v63, %v868_v14 }
 0x1a4   : > { %9715 = vst [vmem:[#allocation23_spill] sm:$0xff] %v7680_v42  ;;  %v7682_v13 = vpop.f32.mrf.mxu0  ;;  %v7696_v42 = vld [vmem:[%s9671_s12] sm:$0x7]  ;;  %v1386_v30 = vadd.f32 %v7596_v5, %v1171_v18  ;;  %v1180_v63 = vadd.f32 %v7606_v11, %v880_v34  ;;  %v1392_v5 = vadd.f32 %v7610_v15, %v1177_v35  ;;  %v1394_v6 = vadd.f32 %v7614_v17, %v1179_v39  ;;  %v9722_v34 = vld [vmem:[#allocation8_spill] sm:$0xff]  ;;  %v9726_v39 = vld [vmem:[#allocation7_spill] sm:$0xff] }
 0x1a5   : > { %9716 = vst [vmem:[#allocation24_spill] sm:$0xff] %v7682_v13  ;;  %v7684_v49 = vpop.f32.mrf.mxu1  ;;  %v7709_v59 = vrot.slane %v7696_v42, %v2527_v55  ;;  %v1603_v15 = vadd.f32 %v7624_v31, %v7600_v8  ;;  %v9723_v18 = vld [vmem:[#allocation10_spill] sm:$0xff] }
 0x1a6   : > { %9717 = vst [vmem:[#allocation25_spill] sm:$0xff] %v7684_v49  ;;  %v6834_v7 = vpop.f32.mrf.mxu0  ;;  %v1172_v49 = vadd.f32 %v7584_v57, %v949_v47  ;;  %v1393_v47 = vadd.f32 %v1376_v20, %v1178_v1  ;;  %v1826_v20 = vadd.f32 %v6821_v61, %v1611_v0  ;;  %v7737_v61 = vpop.permute.xlu0 %2493  ;;  %v1395_v25 = vadd.f32 %v7616_v19, %v1180_v63  ;;  %v9720_v0 = vld [vmem:[#allocation4_spill] sm:$0xff] }
 0x1a7   : > { %v7698_v13 = vpop.f32.mrf.mxu1  ;;  %v1601_v11 = vadd.f32 %v7622_v27, %v1386_v30  ;;  %v1607_v19 = vadd.f32 %v7636_v41, %v1392_v5  ;;  %v9719_v27 = vld [vmem:[#allocation3_spill] sm:$0xff]  ;;  %v9730_v5 = vld [vmem:[#allocation6_spill] sm:$0xff] }
 0x1a8   : > { %9718 = vst [vmem:[#allocation26_spill] sm:$0xff] %v7698_v13  ;;  %v2226_v38 = vpop.f32.mrf.mxu0  ;;  %v2523_v13 = vsub.s32 1, %v7676_v37  ;;  %v1387_v57 = vadd.f32 %v7612_v16, %v1172_v49  ;;  %v1608_v1 = vadd.f32 %v7626_v32, %v1393_v47  ;;  %v1820_v16 = vadd.f32 %v6818_v53, %v1605_v62  ;;  %v7849_v37 = vld [vmem:[%s9670_s11 + $0x18] sm:$0xff] }
 0x1a9   : > { %v7705_v50 = vpop.f32.mrf.mxu1  ;;  %v2041_v49 = vadd.f32 %v6829_v22, %v1826_v20  ;;  %v1389_v53 = vadd.f32 %v7604_v10, %v1174_v28  ;;  %v1600_v10 = vadd.f32 %v7618_v23, %v7594_v2  ;;  %v1609_v62 = vadd.f32 %v7640_v43, %v1394_v6  ;;  %v7753_v2 = vpop.permute.xlu1 %2483 }
 0x1aa   : > { %v6837_v54 = vpop.f32.mrf.mxu0  ;;  %v1602_v60 = vadd.f32 %v7620_v24, %v1387_v57  ;;  %v1823_v58 = vadd.f32 %v1806_v3, %v1608_v1  ;;  %v2035_v24 = vadd.f32 %v6826_v4, %v1820_v16  ;;  %v1606_v8 = vadd.f32 %v9720_v0, %v9719_v27  ;;  %v7764_v1 = vpop.permute.xlu0 %2478  ;;  %v9725_v16 = vld [vmem:[#allocation9_spill] sm:$0xff] }
 0x1ab   : > { %v7720_v55 = vpop.f32.mrf.mxu1  ;;  %v2256_v4 = vadd.f32 %v6837_v54, %v2041_v49  ;;  %v1815_v47 = vadd.f32 %v7630_v36, %v1600_v10  ;;  %v1610_v36 = vadd.f32 %v9722_v34, %v1395_v25  ;;  %v1822_v41 = vadd.f32 %v9723_v18, %v1607_v19  ;;  %v9732_v25 = vld [vmem:[#allocation16_spill] sm:$0xff]  ;;  %v9740_v18 = vld [vmem:[#allocation21_spill] sm:$0xff] }
 0x1ac   : > { %v2236_v21 = vpop.f32.mrf.mxu0  ;;  %v1817_v51 = vadd.f32 %v1796_v56, %v1602_v60  ;;  %v2038_v56 = vadd.f32 %v7662_v44, %v1823_v58  ;;  %v2250_v3 = vadd.f32 %v6834_v7, %v2035_v24  ;;  %v1604_v7 = vadd.f32 %v7628_v33, %v1389_v53  ;;  %v9724_v60 = vld [vmem:[#allocation11_spill] sm:$0xff]  ;;  %v9728_v24 = vld [vmem:[#allocation20_spill] sm:$0xff]  ;;  %v9729_v53 = vld [vmem:[#allocation22_spill] sm:$0xff] }
 0x1ad   : > { %v6842_v45 = vpop.f32.mrf.mxu1  ;;  %v1816_v33 = vadd.f32 %v9721_v26, %v1601_v11  ;;  %v1824_v43 = vadd.f32 %v9724_v60, %v1609_v62  ;;  %v1821_v20 = vadd.f32 %v9725_v16, %v1606_v8  ;;  %v2037_v49 = vadd.f32 %v9728_v24, %v1822_v41  ;;  %v9733_v11 = vld [vmem:[#allocation24_spill] sm:$0xff]  ;;  %v9737_v62 = vld [vmem:[#allocation25_spill] sm:$0xff]  ;;  %v9738_v8 = vld [vmem:[#allocation23_spill] sm:$0xff] }
 0x1ae   : > { %v7731_v32 = vpop.f32.mrf.mxu0  ;;  %v2032_v9 = vadd.f32 %v7656_v12, %v1817_v51  ;;  %v2253_v29 = vadd.f32 %v2236_v21, %v2038_v56  ;;  %v2465_v12 = vadd.f32 %v6842_v45, %v2250_v3  ;;  %v1819_v45 = vadd.f32 %v9726_v39, %v1604_v7  ;;  %v9727_v51 = vld [vmem:[#allocation12_spill] sm:$0xff]  ;;  %v9736_v7 = vld [vmem:[#allocation15_spill] sm:$0xff] }
 0x1af   : > { %v2441_v48 = vpop.f32.mrf.mxu1  ;;  %v1825_v58 = vadd.f32 %v9727_v51, %v1610_v36  ;;  %v2039_v63 = vadd.f32 %v9729_v53, %v1824_v43  ;;  %v1818_v6 = vadd.f32 %v9730_v5, %v1603_v15  ;;  %v9735_v15 = vld [vmem:[#allocation14_spill] sm:$0xff]  ;;  %v9741_v16 = vld [vmem:[#allocation19_spill] sm:$0xff] }
 0x1b0   : > { %v7741_v22 = vpop.f32.mrf.mxu0  ;;  %v2247_v46 = vadd.f32 %v2226_v38, %v2032_v9  ;;  %v7768_v21 = vadd.f32 %v7753_v2, %v2465_v12  ;;  %v2034_v10 = vadd.f32 %v9732_v25, %v1819_v45  ;;  %v9742_v45 = vld [vmem:[#allocation17_spill] sm:$0xff] }
 0x1b1   : > { %v6845_v17 = vpop.f32.mrf.mxu1  ;;  %v2254_v12 = vadd.f32 %v7705_v50, %v2039_v63  ;;  %v2033_v19 = vadd.f32 %v9736_v7, %v1818_v6  ;;  %v9739_v50 = vld [vmem:[#allocation13_spill] sm:$0xff]  ;;  %v7832_v63 = vrot.slane %v7696_v42, %v2519_v52 }
 0x1b2   : > { %v2471_v57 = vadd.f32 %v6845_v17, %v2256_v4  ;;  %v2358_v44 = vpop.f32.mrf.mxu0  ;;  %v2462_v31 = vadd.f32 %v2441_v48, %v2247_v46  ;;  %v9731_v48 = vld [vmem:[#allocation18_spill] sm:$0xff]  ;;  %v2040_v17 = vadd.f32 %v9733_v11, %v1825_v58  ;;  %v2537_v0 = vmul.f32 %v7709_v59, %v7768_v21  ;;  %v7814_v58 = vld [vmem:[%s9670_s11 + $0x10] sm:$0xff] }
 0x1b3   : > { %v2451_v23 = vpop.f32.mrf.mxu1  ;;  %v2036_v9 = vadd.f32 %v9731_v48, %v1821_v20  ;;  %v9734_v46 = vld [vmem:[#allocation26_spill] sm:$0xff]  ;;  %v2030_v36 = vadd.f32 %v9739_v50, %v1815_v47  ;;  %v9743_v48 = vmov 0.0  }
 0x1b4   : > { %v7758_v38 = vadd.f32 %v7737_v61, %v2471_v57  ;;  %v2468_v54 = vadd.f32 %v2451_v23, %v2253_v29  ;;  %v2360_v14 = vpop.f32.mrf.mxu0  ;;  %v7782_v56 = vadd.f32 %v7764_v1, %v2462_v31  ;;  %v2252_v29 = vadd.f32 %v9734_v46, %v2037_v49 }
 0x1b5   : > { %v2031_v57 = vadd.f32 %v9735_v15, %v1816_v33  ;;  %v2251_v23 = vadd.f32 %v9737_v62, %v2036_v9  ;;  %v2249_v31 = vadd.f32 %v9738_v8, %v2034_v10  ;;  %v2248_v33 = vadd.f32 %v9740_v18, %v2033_v19 }
 0x1b6   : > { %v7771_v28 = vadd.f32 %v7729_v40, %v2468_v54  ;;  %v2364_v30 = vpop.f32.mrf.mxu0  ;;  %v2543_v35 = vmul.f32 %v7709_v59, %v7758_v38  ;;  %v2255_v54 = vadd.f32 %v7720_v55, %v2040_v17  ;;  %v2534_v43 = vmul.f32 %v7709_v59, %v7782_v56  ;;  %v7805_v55 = vld [vmem:[%s9670_s11 + $0x8] sm:$0xff] }
 0x1b7   : > { %v2466_v41 = vadd.f32 %v2364_v30, %v2251_v23  ;;  %v2246_v20 = vadd.f32 %v9741_v16, %v2031_v57  ;;  %v2245_v47 = vadd.f32 %v9742_v45, %v2030_v36  ;;  %v2463_v51 = vadd.f32 %v2358_v44, %v2248_v33  ;;  %v2509_v16 = vld [vmem:[%s9664_s5 + $0x8] sm:$0xff]  ;;  %v2508_v45 = vld [vmem:[%s9664_s5] sm:$0xff] }
 0x1b8   : > { %v2366_v3 = vpop.f32.mrf.mxu0  ;;  %6846 = vmatprep.subr.mxu0 %v2543_v35  ;;  %v2540_v4 = vmul.f32 %v7709_v59, %v7771_v28  ;;  %v7826_v44 = vrot.slane %v7696_v42, %v2523_v13 }
 0x1b9   : > { %6847 = vmatpush3.msra.mxu0 %v2543_v35  ;;  %v2467_v26 = vadd.f32 %v2366_v3, %v2252_v29  ;;  %v2464_v35 = vadd.f32 %v2360_v14, %v2249_v31  ;;  %v2461_v14 = vadd.f32 %v7741_v22, %v2246_v20  ;;  %v2460_v53 = vadd.f32 %v7731_v32, %v2245_v47  ;;  %v3076_v20 = vld [vmem:[%s7906_s29 + $0x18] sm:$0xff]  ;;  %v3075_v47 = vld [vmem:[%s7906_s29 + $0x10] sm:$0xff] }
 0x1ba   : > { %v2370_v27 = vpop.f32.mrf.mxu0  ;;  %6848 = vmatprep.subr.mxu0 %v2540_v4  ;;  %v7835_v22 = vadd.f32 %v7729_v40, %v2466_v41  ;;  %v7852_v42 = vadd.f32 %v7753_v2, %v2463_v51  ;;  %v2510_v41 = vld [vmem:[%s9664_s5 + $0x10] sm:$0xff]  ;;  %v2513_v51 = vld [vmem:[%s9665_s6 + $0x8] sm:$0xff] }
 0x1bb   : > { %v2469_v34 = vadd.f32 %v2370_v27, %v2254_v12  ;;  %6849 = vmatpush3.msra.mxu0 %v2540_v4  ;;  %v7818_v24 = vadd.f32 %v7729_v40, %v2467_v26  ;;  %v7857_v40 = vadd.f32 %v7764_v1, %v2461_v14  ;;  %v7862_v5 = vadd.f32 %v7764_v1, %v2460_v53  ;;  %v9744_v4 = vld [vmem:[#allocation2_spill] sm:$0xff]  ;;  %v6483_v53 = vld [vmem:[%s7906_s29 + $0x38] sm:$0xff] }
 0x1bc   : > { %v2372_v60 = vpop.f32.mrf.mxu0  ;;  %6850 = vmatprep.subr.mxu0 %v2537_v0  ;;  %v2538_v6 = vmul.f32 %v7832_v63, %v7835_v22  ;;  %v2535_v9 = vmul.f32 %v7832_v63, %v7852_v42  ;;  %v3084_v14 = vadd.f32 1.0, %v3075_v47 }
 0x1bd   : > { %v2470_v39 = vadd.f32 %v2372_v60, %v2255_v54  ;;  %6851 = vmatpush3.msra.mxu0 %v2537_v0  ;;  %v7809_v30 = vadd.f32 %v7737_v61, %v2469_v34  ;;  %v2539_v32 = vmul.f32 %v7826_v44, %v7818_v24  ;;  %v2533_v1 = vmul.f32 %v7826_v44, %v7857_v40  ;;  %v2511_v60 = vld [vmem:[%s9664_s5 + $0x18] sm:$0xff] }
 0x1be   : > { %6852 = vmatprep.subr.mxu0 %v2534_v43  ;;  %v2532_v3 = vmul.f32 %v7832_v63, %v7862_v5 }
 0x1bf   : > { %v7821_v49 = vadd.f32 %v7737_v61, %v2470_v39  ;;  %6853 = vmatpush3.msra.mxu0 %v2534_v43  ;;  %v7840_v61 = vadd.f32 %v7753_v2, %v2464_v35  ;;  %v2541_v52 = vmul.f32 %v7832_v63, %v7809_v30  ;;  %v2515_v43 = vld [vmem:[%s9665_s6 + $0x18] sm:$0xff]  ;;  %v2514_v35 = vld [vmem:[%s9665_s6 + $0x10] sm:$0xff]  ;;  %v3085_v39 = vadd.f32 1.0, %v3076_v20 }
 0x1c0   : > { %6855 = vmatmul.mubr.msk.f32.vlgmr.msra.gmra.mxu0 %vm2544_vm9, %v7805_v55 }
 0x1c1   : > { %v2542_v13 = vmul.f32 %v7826_v44, %v7821_v49  ;;  %6857 = vmatprep.mubr.msk.f32.mxu0 %vm2544_vm9, %v7814_v58  ;;  %v2536_v2 = vmul.f32 %v7826_v44, %v7840_v61 }
 0x1c3   : > { %2581 = vmatprep.subr.mxu1 %v2542_v13  ;;  %v2512_v13 = vld [vmem:[%s9665_s6] sm:$0xff] }
 0x1c4   : > { %2582 = vmatpush1.msra.mxu1 %v2541_v52  ;;  %6858 = vmatmul.mubr.msk.f32.gmra.mxu0 %vm2544_vm9, %v7849_v37 }
 0x1c5   : > { %2583 = vmatprep.subr.mxu1 %v2539_v32  ;;  %2855 = vmatprep.mubr.f32.mxu0 %v9743_v48 }
 0x1c6   : > { %2584 = vmatpush1.msra.mxu1 %v2538_v6 }
 0x1c7   : > { %2585 = vmatprep.subr.mxu1 %v2536_v2 }
 0x1c8   : > { %2586 = vmatpush1.msra.mxu1 %v2535_v9 }
 0x1c9   : > { %2587 = vmatprep.subr.mxu1 %v2533_v1 }
 0x1ca   : > { %2588 = vmatpush1.msra.mxu1 %v2532_v3 }
 0x1cb   : > { %6464 = vmatmul.mubr.msk.f32.vlgmr.msra.gmra.mxu1 %vm2544_vm9, %v9744_v4 }
 0x1cc   : > { %2627 = vmatprep.mubr.f32.mxu1 %v9743_v48 }
 0x1cf   : > { %6465 = vmatmul.mubr.msk.f32.gmra.mxu1 %vm2544_vm9, %v7805_v55 }
 0x1d0   : > { %2633 = vmatprep.mubr.f32.mxu1 %v9743_v48 }
 0x1d3   : > { %6466 = vmatmul.mubr.msk.f32.gmra.mxu1 %vm2544_vm9, %v7814_v58 }
 0x1d4   : > { %2639 = vmatprep.mubr.f32.mxu1 %v9743_v48 }
 0x1d7   : > { %6467 = vmatmul.mubr.msk.f32.gmra.mxu1 %vm2544_vm9, %v7849_v37 }
 0x1d8   : > { %6868 = vmatprep.mubr.msk.f32.mxu1 %vm2544_vm9, %v9744_v4 }
 0x280   : > { %v6856_v25 = vpop.f32.mrf.mxu0 }
 0x281   : > { %v2737_v8 = vsel %vm2544_vm9, %v6856_v25, 0.0 }
 0x282   : > { %v2712_v11 = vpop.f32.mrf.mxu0 }
 0x283   : > { %v2732_v18 = vsel %vm2544_vm9, %v2712_v11, 0.0 }
 0x284   : > { %v6859_v46 = vpop.f32.mrf.mxu0 }
 0x285   : > { %v2747_v26 = vsel %vm2544_vm9, %v6859_v46, 0.0 }
 0x286   : > { %v2722_v15 = vpop.f32.mrf.mxu0 }
 0x287   : > { %v2742_v19 = vsel %vm2544_vm9, %v2722_v15, 0.0 }
 0x28b   : > { %v2623_v10 = vpop.f32.mrf.mxu1 }
 0x28d   : > { %v2625_v17 = vpop.f32.mrf.mxu1 }
 0x28e   : > { %v2731_v34 = vadd.f32 %v2625_v17, %v2623_v10 }
 0x28f   : > { %v2629_v29 = vpop.f32.mrf.mxu1 }
 0x290   : > { %v2733_v33 = vadd.f32 %v2732_v18, %v2731_v34 }
 0x291   : > { %v2631_v12 = vpop.f32.mrf.mxu1 }
 0x292   : > { %v2736_v27 = vadd.f32 %v2631_v12, %v2629_v29 }
 0x293   : > { %v2635_v57 = vpop.f32.mrf.mxu1 }
 0x294   : > { %v2738_v50 = vadd.f32 %v2737_v8, %v2736_v27 }
 0x295   : > { %v2637_v7 = vpop.f32.mrf.mxu1 }
 0x296   : > { %v2741_v62 = vadd.f32 %v2637_v7, %v2635_v57 }
 0x297   : > { %v2641_v23 = vpop.f32.mrf.mxu1 }
 0x298   : > { %v2743_v0 = vadd.f32 %v2742_v19, %v2741_v62 }
 0x299   : > { %v2643_v31 = vpop.f32.mrf.mxu1 }
 0x29a   : > { %v2746_v54 = vadd.f32 %v2643_v31, %v2641_v23  ;;  %2744 = vadd.xlane.f32.xlu0 %v2743_v0 }
 0x29c   : > { %v2748_v36 = vadd.f32 %v2747_v26, %v2746_v54 }
 0x29e   : > { %2739 = vadd.xlane.f32.xlu0 %v2738_v50  ;;  %2749 = vadd.xlane.f32.xlu1 %v2748_v36 }
 0x2a2   : > { %2734 = vadd.xlane.f32.xlu1 %v2733_v33 }
 0x2b3   : > { %3021 = vperm.xlu1 %7021, %v2510_v41  }
 0x2b4   : > { %3026 = vperm.xlu0 %7020, %v2511_v60  }
 0x2b7   : > { %3058 = vperm.xlu1 %7021, %v2515_v43  }
 0x2b8   : > { %3016 = vperm.xlu0 %7020, %v2509_v16  }
 0x2bb   : > { %3053 = vperm.xlu1 %7021, %v2514_v35  }
 0x2bc   : > { %3103 = vperm.xlu0 %7020, %v3085_v39  }
 0x2bf   : > { %3011 = vperm.xlu1 %7021, %v2508_v45  }
 0x2c0   : > { %3048 = vperm.xlu0 %7020, %v2513_v51  }
 0x2c3   : > { %3098 = vperm.xlu1 %7021, %v3084_v14  }
 0x2c4   : > { %3135 = vperm.xlu0 %7020, %v6483_v53  }
 0x2c7   : > { %3043 = vperm.xlu1 %7021, %v2512_v13  }
 0x323   : > { %v2745_v52 = vpop.xlane.xlu0 %2744 }
 0x324   : > { %v2753_v32 = vmul.f32 0.00390625, %v2745_v52 }
 0x326   : > { %v2762_v9 = vsub.f32 %v7818_v24, %v2753_v32  ;;  %v2761_v25 = vsub.f32 %v7835_v22, %v2753_v32  ;;  %v2763_v10 = vsub.f32 %v7771_v28, %v2753_v32 }
 0x327   : > { %v2740_v6 = vpop.xlane.xlu0 %2739  ;;  %v2750_v2 = vpop.xlane.xlu1 %2749 }
 0x328   : > { %v2752_v1 = vmul.f32 0.00390625, %v2740_v6  ;;  %v2754_v3 = vmul.f32 0.00390625, %v2750_v2  ;;  %v7942_v22 = vmul.f32 %v2762_v9, %v7826_v44  ;;  %v7945_v28 = vmul.f32 %v2761_v25, %v7832_v63 }
 0x32a   : > { %v2764_v11 = vsub.f32 %v7809_v30, %v2754_v3  ;;  %v2759_v17 = vsub.f32 %v7840_v61, %v2752_v1  ;;  %v2760_v46 = vsub.f32 %v7768_v21, %v2752_v1  ;;  %v2765_v29 = vsub.f32 %v7821_v49, %v2754_v3 }
 0x32b   : > { %v2766_v12 = vsub.f32 %v7758_v38, %v2754_v3  ;;  %v2735_v15 = vpop.xlane.xlu1 %2734  ;;  %v2758_v57 = vsub.f32 %v7852_v42, %v2752_v1  ;;  %v7954_v38 = vmul.f32 %v2763_v10, %v7709_v59  ;;  %v2785_v26 = vmul.f32 %v7945_v28, %v7945_v28  ;;  %v6482_v10 = vld [vmem:[%s7906_s29 + $0x30] sm:$0xff] }
 0x32c   : > { %v7939_v24 = vmul.f32 %v2764_v11, %v7832_v63  ;;  %v2751_v7 = vmul.f32 0.00390625, %v2735_v15  ;;  %v7948_v30 = vmul.f32 %v2765_v29, %v7826_v44  ;;  %v7966_v27 = vmul.f32 %v2759_v17, %v7826_v44  ;;  %v6481_v11 = vld [vmem:[%s7906_s29 + $0x28] sm:$0xff]  ;;  %v3073_v29 = vld [vmem:[%s7906_s29] sm:$0xff] }
 0x32d   : > { %v7951_v21 = vmul.f32 %v2766_v12, %v7709_v59  ;;  %v7969_v0 = vmul.f32 %v2760_v46, %v7709_v59  ;;  %v3074_v17 = vld [vmem:[%s7906_s29 + $0x8] sm:$0xff]  ;;  %v3082_v12 = vadd.f32 1.0, %v3073_v29  ;;  %v6480_v15 = vld [vmem:[%s7906_s29 + $0x20] sm:$0xff]  ;;  %s7140_s29 = smov 19  }
 0x32e   : > { %v2755_v49 = vsub.f32 %v7862_v5, %v2751_v7  ;;  %v2756_v61 = vsub.f32 %v7857_v40, %v2751_v7  ;;  %v2757_v42 = vsub.f32 %v7782_v56, %v2751_v7  ;;  %v2788_v19 = vmul.f32 %v7939_v24, %v7939_v24 }
 0x32f   : > { %v2789_v62 = vmul.f32 %v7948_v30, %v7948_v30  ;;  %v2790_v23 = vmul.f32 %v7951_v21, %v7951_v21  ;;  %v7972_v5 = vmul.f32 %v2758_v57, %v7832_v63  ;;  %v2786_v56 = vmul.f32 %v7942_v22, %v7942_v22  ;;  %v3022_v57 = vpop.permute.xlu1 %3021 }
 0x330   : > { %v2787_v40 = vmul.f32 %v7954_v38, %v7954_v38  ;;  %v7979_v8 = vmul.f32 %v2756_v61, %v7826_v44  ;;  %v7982_v31 = vmul.f32 %v2757_v42, %v7709_v59  ;;  %v7985_v54 = vmul.f32 %v2755_v49, %v7832_v63  ;;  %v8030_v49 = vpop.permute.xlu0 %3026 }
 0x331   : > { %2815 = vmatprep.subr.mxu0 %v2789_v62  ;;  %6860 = vmatprep.subr.mxu1 %v2790_v23  ;;  %v2783_v34 = vmul.f32 %v7966_v27, %v7966_v27  ;;  %v2784_v50 = vmul.f32 %v7969_v0, %v7969_v0  ;;  %v2782_v36 = vmul.f32 %v7972_v5, %v7972_v5  ;;  %v3083_v46 = vadd.f32 1.0, %v3074_v17 }
 0x332   : > { %2816 = vmatpush1.msra.mxu0 %v2788_v19  ;;  %6861 = vmatpush3.msra.mxu1 %v2790_v23  ;;  %v2780_v18 = vmul.f32 %v7979_v8, %v7979_v8  ;;  %v2781_v33 = vmul.f32 %v7982_v31, %v7982_v31  ;;  %v2779_v41 = vmul.f32 %v7985_v54, %v7985_v54 }
 0x333   : > { %2817 = vmatprep.subr.mxu0 %v2786_v56  ;;  %6862 = vmatprep.subr.mxu1 %v2787_v40  ;;  %v8028_v7 = vpop.permute.xlu1 %3058 }
 0x334   : > { %2818 = vmatpush1.msra.mxu0 %v2785_v26  ;;  %6863 = vmatpush3.msra.mxu1 %v2787_v40  ;;  %v3017_v42 = vpop.permute.xlu0 %3016 }
 0x335   : > { %2819 = vmatprep.subr.mxu0 %v2783_v34  ;;  %6864 = vmatprep.subr.mxu1 %v2784_v50 }
 0x336   : > { %2820 = vmatpush1.msra.mxu0 %v2782_v36  ;;  %6865 = vmatpush3.msra.mxu1 %v2784_v50 }
 0x337   : > { %2821 = vmatprep.subr.mxu0 %v2780_v18  ;;  %6866 = vmatprep.subr.mxu1 %v2781_v33  ;;  %v8032_v61 = vpop.permute.xlu1 %3053 }
 0x338   : > { %2822 = vmatpush1.msra.mxu0 %v2779_v41  ;;  %6867 = vmatpush3.msra.mxu1 %v2781_v33  ;;  %v8034_v62 = vpop.permute.xlu0 %3103 }
 0x339   : > { %6472 = vmatmul.mubr.msk.f32.vlgmr.msra.gmra.mxu0 %vm2544_vm9, %v9744_v4  ;;  %6869 = vmatmul.mubr.msk.f32.vlgmr.msra.gmra.mxu1 %vm2544_vm9, %v7805_v55 }
 0x33a   : > { %2861 = vmatprep.mubr.f32.mxu0 %v9743_v48  ;;  %6871 = vmatprep.mubr.msk.f32.mxu1 %vm2544_vm9, %v7814_v58 }
 0x33b   : > { %v3012_v19 = vpop.permute.xlu1 %3011 }
 0x33c   : > { %v3049_v56 = vpop.permute.xlu0 %3048 }
 0x33d   : > { %6473 = vmatmul.mubr.msk.f32.gmra.mxu0 %vm2544_vm9, %v7805_v55  ;;  %6872 = vmatmul.mubr.msk.f32.gmra.mxu1 %vm2544_vm9, %v7849_v37 }
 0x33e   : > { %2867 = vmatprep.mubr.f32.mxu0 %v9743_v48  ;;  %3449 = vmatprep.mubr.f32.mxu1 %v9743_v48 }
 0x33f   : > { %v8036_v23 = vpop.permute.xlu1 %3098 }
 0x340   : > { %v8038_v26 = vpop.permute.xlu0 %3135 }
 0x341   : > { %6474 = vmatmul.mubr.msk.f32.gmra.mxu0 %vm2544_vm9, %v7814_v58 }
 0x342   : > { %2873 = vmatprep.mubr.f32.mxu0 %v9743_v48 }
 0x343   : > { %v3044_v40 = vpop.permute.xlu1 %3043 }
 0x345   : > { %6475 = vmatmul.mubr.msk.f32.gmra.mxu0 %vm2544_vm9, %v7849_v37 }
 0x3f9   : > { %v2857_v4 = vpop.f32.mrf.mxu0  ;;  %v6870_v60 = vpop.f32.mrf.mxu1 }
 0x3fa   : > { %v2971_v58 = vsel %vm2544_vm9, %v6870_v60, 0.0 }
 0x3fb   : > { %v2859_v43 = vpop.f32.mrf.mxu0  ;;  %v2946_v16 = vpop.f32.mrf.mxu1 }
 0x3fc   : > { %v2965_v55 = vadd.f32 %v2859_v43, %v2857_v4  ;;  %v2966_v20 = vsel %vm2544_vm9, %v2946_v16, 0.0 }
 0x3fd   : > { %v2863_v35 = vpop.f32.mrf.mxu0  ;;  %v6873_v39 = vpop.f32.mrf.mxu1 }
 0x3fe   : > { %v2967_v45 = vadd.f32 %v2966_v20, %v2965_v55  ;;  %v2981_v9 = vsel %vm2544_vm9, %v6873_v39, 0.0 }
 0x3ff   : > { %v2865_v47 = vpop.f32.mrf.mxu0  ;;  %v2956_v14 = vpop.f32.mrf.mxu1 }
 0x400   : > { %v2970_v51 = vadd.f32 %v2865_v47, %v2863_v35  ;;  %2968 = vadd.xlane.f32.xlu1 %v2967_v45  ;;  %v2976_v52 = vsel %vm2544_vm9, %v2956_v14, 0.0 }
 0x401   : > { %v2869_v53 = vpop.f32.mrf.mxu0 }
 0x402   : > { %v2972_v37 = vadd.f32 %v2971_v58, %v2970_v51 }
 0x403   : > { %v2871_v13 = vpop.f32.mrf.mxu0 }
 0x404   : > { %v2975_v32 = vadd.f32 %v2871_v13, %v2869_v53  ;;  %2973 = vadd.xlane.f32.xlu0 %v2972_v37 }
 0x405   : > { %v2875_v6 = vpop.f32.mrf.mxu0 }
 0x406   : > { %v2977_v2 = vadd.f32 %v2976_v52, %v2975_v32 }
 0x407   : > { %v2877_v1 = vpop.f32.mrf.mxu0 }
 0x408   : > { %v2980_v3 = vadd.f32 %v2877_v1, %v2875_v6  ;;  %2978 = vadd.xlane.f32.xlu1 %v2977_v2 }
 0x40a   : > { %v2982_v25 = vadd.f32 %v2981_v9, %v2980_v3 }
 0x40c   : > { %2983 = vadd.xlane.f32.xlu0 %v2982_v25 }
 0x419   : > { %3130 = vperm.xlu1 %7021, %v6482_v10  }
 0x41d   : > { %3125 = vperm.xlu1 %7021, %v6481_v11  }
 0x422   : > { %3093 = vperm.xlu0 %7020, %v3083_v46  }
 0x426   : > { %3088 = vperm.xlu0 %7020, %v3082_v12  }
 0x42a   : > { %3120 = vperm.xlu0 %7020, %v6480_v15  }
 0x489   : > { %v2969_v34 = vpop.xlane.xlu1 %2968 }
 0x48a   : > { %v2985_v50 = vmul.f32 0.00390625, %v2969_v34 }
 0x48c   : > { %v2989_v36 = vadd.f32 1e-05, %v2985_v50 }
 0x48d   : > { %v2974_v18 = vpop.xlane.xlu0 %2973 }
 0x48e   : > { %7022 = vrsqrt.f32 %v2989_v36  ;;  %v2986_v33 = vmul.f32 0.00390625, %v2974_v18 }
 0x490   : > { %v2990_v41 = vadd.f32 1e-05, %v2986_v33 }
 0x491   : > { %v2979_v4 = vpop.xlane.xlu1 %2978 }
 0x492   : > { %7024 = vrsqrt.f32 %v2990_v41  ;;  %v2987_v60 = vmul.f32 0.00390625, %v2979_v4 }
 0x494   : > { %v2991_v43 = vadd.f32 1e-05, %v2987_v60 }
 0x495   : > { %v2984_v16 = vpop.xlane.xlu0 %2983  ;;  %v3131_v2 = vpop.permute.xlu1 %3130 }
 0x496   : > { %7026 = vrsqrt.f32 %v2991_v43  ;;  %v2988_v55 = vmul.f32 0.00390625, %v2984_v16 }
 0x498   : > { %v2992_v20 = vadd.f32 1e-05, %v2988_v55 }
 0x499   : > { %v3126_v36 = vpop.permute.xlu1 %3125 }
 0x49a   : > { %7028 = vrsqrt.f32 %v2992_v20 }
 0x49b   : > { %v7023_v35 = vpop.eup %7022 }
 0x49c   : > { %v2997_v39 = vmul.f32 %v7023_v35, %v7985_v54  ;;  %v2998_v45 = vmul.f32 %v7023_v35, %v7979_v8  ;;  %v2999_v47 = vmul.f32 %v7023_v35, %v7982_v31 }
 0x49d   : > { %v3094_v51 = vpop.permute.xlu0 %3093 }
 0x49e   : > { %v3029_v14 = vmul.f32 %v3012_v19, %v2997_v39  ;;  %v3030_v58 = vmul.f32 %v3012_v19, %v2998_v45  ;;  %v3031_v53 = vmul.f32 %v3012_v19, %v2999_v47 }
 0x49f   : > { %v7025_v37 = vpop.eup %7024 }
 0x4a0   : > { %v3000_v13 = vmul.f32 %v7025_v37, %v7972_v5  ;;  %v3001_v52 = vmul.f32 %v7025_v37, %v7966_v27  ;;  %v3002_v32 = vmul.f32 %v7025_v37, %v7969_v0  ;;  %v3061_v6 = vadd.f32 %v3044_v40, %v3029_v14 }
 0x4a1   : > { %v3089_v9 = vpop.permute.xlu0 %3088  ;;  %v3062_v54 = vadd.f32 %v3044_v40, %v3030_v58  ;;  %v3063_v1 = vadd.f32 %v3044_v40, %v3031_v53 }
 0x4a2   : > { %v3032_v8 = vmul.f32 %v3017_v42, %v3000_v13  ;;  %v3033_v3 = vmul.f32 %v3017_v42, %v3001_v52  ;;  %v3034_v31 = vmul.f32 %v3017_v42, %v3002_v32  ;;  %v3106_v10 = vmul.f32 %v3089_v9, %v3061_v6 }
 0x4a3   : > { %v7027_v25 = vpop.eup %7026  ;;  %v3107_v0 = vmul.f32 %v3089_v9, %v3062_v54  ;;  %v3108_v12 = vmul.f32 %v3089_v9, %v3063_v1 }
 0x4a4   : > { %v3003_v11 = vmul.f32 %v7027_v25, %v7945_v28  ;;  %v3004_v17 = vmul.f32 %v7027_v25, %v7942_v22  ;;  %v3005_v5 = vmul.f32 %v7027_v25, %v7954_v38  ;;  %v3064_v46 = vadd.f32 %v3049_v56, %v3032_v8 }
 0x4a5   : > { %v3065_v27 = vadd.f32 %v3049_v56, %v3033_v3  ;;  %v3066_v29 = vadd.f32 %v3049_v56, %v3034_v31  ;;  %v3121_v15 = vpop.permute.xlu0 %3120 }
 0x4a6   : > { %v3035_v19 = vmul.f32 %v3022_v57, %v3003_v11  ;;  %v3036_v34 = vmul.f32 %v3022_v57, %v3004_v17  ;;  %v3037_v40 = vmul.f32 %v3022_v57, %v3005_v5  ;;  %v3109_v50 = vmul.f32 %v3094_v51, %v3064_v46 }
 0x4a7   : > { %v3110_v42 = vmul.f32 %v3094_v51, %v3065_v27  ;;  %v3111_v18 = vmul.f32 %v3094_v51, %v3066_v29  ;;  %v8049_v33 = vadd.f32 %v3121_v15, %v3106_v10  ;;  %v8051_v28 = vadd.f32 %v3121_v15, %v3107_v0  ;;  %v7029_v43 = vpop.eup %7028 }
 0x4a8   : > { %v3067_v22 = vadd.f32 %v8032_v61, %v3035_v19  ;;  %v3068_v38 = vadd.f32 %v8032_v61, %v3036_v34  ;;  %v3069_v56 = vadd.f32 %v8032_v61, %v3037_v40  ;;  %v8056_v41 = vadd.f32 %v3126_v36, %v3109_v50 }
 0x4a9   : > { %v8058_v4 = vadd.f32 %v3126_v36, %v3110_v42  ;;  %v8060_v60 = vadd.f32 %v3126_v36, %v3111_v18  ;;  %v6484_v57 = vmul.f32 -1.442695, %v8049_v33  ;;  %v8066_v35 = vadd.f32 %v3121_v15, %v3108_v12 }
 0x4aa   : > { %v3112_v16 = vmul.f32 %v8036_v23, %v3067_v22  ;;  %v3113_v55 = vmul.f32 %v8036_v23, %v3068_v38  ;;  %v3114_v20 = vmul.f32 %v8036_v23, %v3069_v56  ;;  %v6485_v45 = vmul.f32 -1.442695, %v8051_v28 }
 0x4ab   : > { %v6488_v39 = vmul.f32 -1.442695, %v8058_v4  ;;  %v6489_v61 = vmul.f32 -1.442695, %v8060_v60  ;;  %7030 = vpow2.f32 %v6484_v57  ;;  %v6487_v51 = vmul.f32 -1.442695, %v8056_v41 }
 0x4ac   : > { %v8071_v47 = vadd.f32 %v3131_v2, %v3113_v55  ;;  %v8074_v14 = vadd.f32 %v3131_v2, %v3112_v16  ;;  %v3007_v58 = vmul.f32 %v7029_v43, %v7948_v30  ;;  %v3008_v23 = vmul.f32 %v7029_v43, %v7951_v21 }
 0x4ad   : > { %7032 = vpow2.f32 %v6488_v39  ;;  %v8078_v53 = vadd.f32 %v3131_v2, %v3114_v20  ;;  %v6486_v13 = vmul.f32 -1.442695, %v8066_v35  ;;  %v3006_v6 = vmul.f32 %v7029_v43, %v7939_v24 }
 0x4ae   : > { %v6491_v37 = vmul.f32 -1.442695, %v8071_v47  ;;  %7034 = vpow2.f32 %v6489_v61  ;;  %v3039_v52 = vmul.f32 %v8030_v49, %v3007_v58  ;;  %v3040_v32 = vmul.f32 %v8030_v49, %v3008_v23 }
 0x4af   : > { %7036 = vpow2.f32 %v6485_v45  ;;  %v3038_v21 = vmul.f32 %v8030_v49, %v3006_v6  ;;  %v6490_v2 = vmul.f32 -1.442695, %v8074_v14  ;;  %v6492_v54 = vmul.f32 -1.442695, %v8078_v53 }
 0x4b0   : > { %7038 = vpow2.f32 %v6487_v51  ;;  %v3071_v9 = vadd.f32 %v8028_v7, %v3039_v52  ;;  %v3072_v30 = vadd.f32 %v8028_v7, %v3040_v32 }
 0x4b1   : > { %7040 = vpow2.f32 %v6491_v37  ;;  %v3070_v3 = vadd.f32 %v8028_v7, %v3038_v21 }
 0x4b2   : > { %7042 = vpow2.f32 %v6486_v13  ;;  %v3116_v1 = vmul.f32 %v8034_v62, %v3071_v9  ;;  %v3117_v8 = vmul.f32 %v8034_v62, %v3072_v30 }
 0x4b3   : > { %7044 = vpow2.f32 %v6490_v2  ;;  %v3115_v11 = vmul.f32 %v8034_v62, %v3070_v3 }
 0x4b4   : > { %v8094_v24 = vadd.f32 %v8038_v26, %v3116_v1  ;;  %v8097_v31 = vadd.f32 %v8038_v26, %v3117_v8  ;;  %7046 = vpow2.f32 %v6492_v54 }
 0x4b5   : > { %v8103_v27 = vadd.f32 %v8038_v26, %v3115_v11 }
 0x4b6   : > { %v6494_v49 = vmul.f32 -1.442695, %v8094_v24  ;;  %v6495_v25 = vmul.f32 -1.442695, %v8097_v31 }
 0x4b7   : > { %v6493_v40 = vmul.f32 -1.442695, %v8103_v27 }
 0x4b8   : > { %v7031_v10 = vpop.eup %7030  ;;  %7048 = vpow2.f32 %v6494_v49 }
 0x4b9   : > { %v3186_v5 = vadd.f32 1.0, %v7031_v10  ;;  %7050 = vpow2.f32 %v6495_v25 }
 0x4ba   : > { %v7033_v17 = vpop.eup %7032 }
 0x4bb   : > { %v7035_v46 = vpop.eup %7034  ;;  %v3190_v29 = vadd.f32 1.0, %v7033_v17  ;;  %7052 = vrcp.f32 %v3186_v5 }
 0x4bc   : > { %v7037_v7 = vpop.eup %7036  ;;  %v3191_v15 = vadd.f32 1.0, %v7035_v46 }
 0x4bd   : > { %v3187_v0 = vadd.f32 1.0, %v7037_v7  ;;  %v7039_v12 = vpop.eup %7038 }
 0x4be   : > { %v7041_v19 = vpop.eup %7040  ;;  %v3189_v50 = vadd.f32 1.0, %v7039_v12 }
 0x4bf   : > { %7054 = vrcp.f32 %v3187_v0  ;;  %v7043_v34 = vpop.eup %7042  ;;  %v3193_v42 = vadd.f32 1.0, %v7041_v19 }
 0x4c0   : > { %7056 = vrcp.f32 %v3190_v29  ;;  %v3188_v62 = vadd.f32 1.0, %v7043_v34  ;;  %v7045_v36 = vpop.eup %7044 }
 0x4c1   : > { %7058 = vrcp.f32 %v3191_v15  ;;  %v7047_v18 = vpop.eup %7046  ;;  %v3192_v26 = vadd.f32 1.0, %v7045_v36 }
 0x4c2   : > { %7060 = vrcp.f32 %v3188_v62  ;;  %v3194_v38 = vadd.f32 1.0, %v7047_v18 }
 0x4c3   : > { %7062 = vpow2.f32 %v6493_v40 }
 0x4c4   : > { %7064 = vrcp.f32 %v3189_v50 }
 0x4c5   : > { %v7049_v22 = vpop.eup %7048  ;;  %7066 = vrcp.f32 %v3193_v42 }
 0x4c6   : > { %v7051_v56 = vpop.eup %7050  ;;  %7068 = vrcp.f32 %v3192_v26  ;;  %v3196_v57 = vadd.f32 1.0, %v7049_v22 }
 0x4c7   : > { %7070 = vrcp.f32 %v3194_v38  ;;  %v3197_v16 = vadd.f32 1.0, %v7051_v56 }
 0x4c8   : > { %v7053_v43 = vpop.eup %7052  ;;  %7072 = vrcp.f32 %v3196_v57 }
 0x4c9   : > { %v3222_v51 = vmul.f32 %v7053_v43, %v8049_v33  ;;  %7074 = vrcp.f32 %v3197_v16 }
 0x4cc   : > { %v7055_v55 = vpop.eup %7054 }
 0x4cd   : > { %v3223_v20 = vmul.f32 %v7055_v55, %v8051_v28  ;;  %v7057_v39 = vpop.eup %7056  ;;  %v3234_v28 = vmul.f32 %v3222_v51, %v7832_v63  ;;  %v8286_v55 = vld [vmem:[%s9666_s7 + $0x20] sm:$0xff] }
 0x4ce   : > { %v7059_v61 = vpop.eup %7058  ;;  %v3226_v6 = vmul.f32 %v7057_v39, %v8058_v4  ;;  %6882 = vmatprep.mubr.msk.f32.mxu0 %vm2544_vm9, %v8286_v55 }
 0x4cf   : > { %v3235_v45 = vmul.f32 %v3223_v20, %v7826_v44  ;;  %v7061_v58 = vpop.eup %7060  ;;  %v3227_v9 = vmul.f32 %v7059_v61, %v8060_v60 }
 0x4d0   : > { %v7063_v23 = vpop.eup %7062  ;;  %v3224_v37 = vmul.f32 %v7061_v58, %v8066_v35  ;;  %v3238_v35 = vmul.f32 %v3226_v6, %v7826_v44 }
 0x4d1   : > { %3260 = vrot.lane.b32.xlu0 %v3235_v45, %s7140_s29  ;;  %v3195_v13 = vadd.f32 1.0, %v7063_v23  ;;  %v7065_v52 = vpop.eup %7064  ;;  %v3239_v21 = vmul.f32 %v3227_v9, %v7709_v59 }
 0x4d2   : > { %v3236_v32 = vmul.f32 %v3224_v37, %v7709_v59  ;;  %v7067_v30 = vpop.eup %7066  ;;  %v3225_v2 = vmul.f32 %v7065_v52, %v8056_v41 }
 0x4d3   : > { %7076 = vrcp.f32 %v3195_v13  ;;  %v7069_v33 = vpop.eup %7068  ;;  %v3229_v54 = vmul.f32 %v7067_v30, %v8071_v47 }
 0x4d4   : > { %3262 = vrot.lane.b32.xlu1 %v3236_v32, %s7140_s29  ;;  %v7071_v1 = vpop.eup %7070  ;;  %v3237_v60 = vmul.f32 %v3225_v2, %v7832_v63  ;;  %v3228_v49 = vmul.f32 %v7069_v33, %v8074_v14 }
 0x4d5   : > { %3258 = vrot.lane.b32.xlu0 %v3234_v28, %s7140_s29  ;;  %v7073_v4 = vpop.eup %7072  ;;  %v3241_v8 = vmul.f32 %v3229_v54, %v7826_v44  ;;  %v3230_v3 = vmul.f32 %v7071_v1, %v8078_v53 }
 0x4d6   : > { %v7075_v25 = vpop.eup %7074  ;;  %v3240_v47 = vmul.f32 %v3228_v49, %v7832_v63  ;;  %v3232_v10 = vmul.f32 %v7073_v4, %v8094_v24 }
 0x4d7   : > { %v3242_v41 = vmul.f32 %v3230_v3, %v7709_v59  ;;  %v3233_v11 = vmul.f32 %v7075_v25, %v8097_v31 }
 0x4d8   : > { %3266 = vrot.lane.b32.xlu1 %v3238_v35, %s7140_s29  ;;  %v3244_v14 = vmul.f32 %v3232_v10, %v7826_v44 }
 0x4d9   : > { %3268 = vrot.lane.b32.xlu0 %v3239_v21, %s7140_s29  ;;  %v3245_v53 = vmul.f32 %v3233_v11, %v7709_v59 }
 0x4dc   : > { %3264 = vrot.lane.b32.xlu1 %v3237_v60, %s7140_s29 }
 0x4dd   : > { %3272 = vrot.lane.b32.xlu0 %v3241_v8, %s7140_s29 }
 0x4e0   : > { %v7077_v17 = vpop.eup %7076  ;;  %3274 = vrot.lane.b32.xlu1 %v3242_v41, %s7140_s29 }
 0x4e1   : > { %3270 = vrot.lane.b32.xlu0 %v3240_v47, %s7140_s29  ;;  %v3231_v5 = vmul.f32 %v7077_v17, %v8103_v27 }
 0x4e3   : > { %v3243_v46 = vmul.f32 %v3231_v5, %v7832_v63 }
 0x4e4   : > { %3278 = vrot.lane.b32.xlu1 %v3244_v14, %s7140_s29 }
 0x4e5   : > { %3280 = vrot.lane.b32.xlu0 %v3245_v53, %s7140_s29 }
 0x4e8   : > { %3276 = vrot.lane.b32.xlu1 %v3243_v46, %s7140_s29  ;;  %s9639_s29 = scalar_lea.vmem %s9675_s16, %s6639_s25 }
 0x543   : > { %v3261_v24 = vpop.permute.xlu0 %3260 }
 0x546   : > { %v3263_v31 = vpop.permute.xlu1 %3262 }
 0x547   : > { %v8142_v7 = vpop.permute.xlu0 %3258  ;;  %v8145_v44 = vsel %vm3282_vm10, %v3261_v24, %v3263_v31 }
 0x548   : > { %v8149_v59 = vsel %vm3282_vm10, %v8142_v7, %v3261_v24  ;;  %v8153_v27 = vsel %vm3307_vm11, %v8145_v44, 0.0  ;;  %v8161_v63 = vsel %vm3282_vm10, 0.0, %v8142_v7 }
 0x549   : > { %3331 = vrot.lane.b32.xlu0 %v8149_v59, %s7131_s30  ;;  %3333 = vrot.lane.b32.xlu1 %v8153_v27, %s7131_s30 }
 0x54a   : > { %v3267_v29 = vpop.permute.xlu1 %3266 }
 0x54b   : > { %v3269_v19 = vpop.permute.xlu0 %3268 }
 0x54c   : > { %v8198_v34 = vsel %vm3282_vm10, %v3267_v29, %v3269_v19 }
 0x54d   : > { %3329 = vrot.lane.b32.xlu0 %v8161_v63, %s7131_s30  ;;  %3754 = vrot.lane.b32.xlu1 %v8153_v27, %s7132_s0  ;;  %v8206_v40 = vsel %vm3307_vm11, %v8198_v34, 0.0 }
 0x54e   : > { %v8173_v0 = vpop.permute.xlu1 %3264 }
 0x54f   : > { %v8179_v12 = vsel %vm3282_vm10, %v8173_v0, %v3267_v29  ;;  %v8187_v15 = vsel %vm3282_vm10, 0.0, %v8173_v0  ;;  %v3273_v62 = vpop.permute.xlu0 %3272 }
 0x551   : > { %3752 = vrot.lane.b32.xlu0 %v8149_v59, %s7132_s0  ;;  %4001 = vrot.lane.b32.xlu1 %v8153_v27, %s7133_s17 }
 0x552   : > { %v3275_v50 = vpop.permute.xlu1 %3274 }
 0x553   : > { %v8220_v36 = vpop.permute.xlu0 %3270  ;;  %v8225_v42 = vsel %vm3282_vm10, %v3273_v62, %v3275_v50 }
 0x554   : > { %v8231_v18 = vsel %vm3282_vm10, %v8220_v36, %v3273_v62  ;;  %v8235_v26 = vsel %vm3307_vm11, %v8225_v42, 0.0  ;;  %v8243_v22 = vsel %vm3282_vm10, 0.0, %v8220_v36  ;;  %v5549_v62 = vld [vmem:[%s9667_s8 + $0x18] sm:$0xff] }
 0x555   : > { %3750 = vrot.lane.b32.xlu0 %v8161_v63, %s7132_s0  ;;  %4248 = vrot.lane.b32.xlu1 %v8153_v27, %s9745_s27 }
 0x556   : > { %v3279_v38 = vpop.permute.xlu1 %3278 }
 0x557   : > { %v3281_v16 = vpop.permute.xlu0 %3280 }
 0x558   : > { %v8289_v20 = vsel %vm3282_vm10, %v3279_v38, %v3281_v16 }
 0x559   : > { %3999 = vrot.lane.b32.xlu0 %v8149_v59, %s7133_s17  ;;  %3337 = vrot.lane.b32.xlu1 %v8179_v12, %s7131_s30  ;;  %v8299_v39 = vsel %vm3307_vm11, %v8289_v20, 0.0 }
 0x55a   : > { %v8259_v56 = vpop.permute.xlu1 %3276 }
 0x55b   : > { %v8265_v57 = vsel %vm3282_vm10, %v8259_v56, %v3279_v38  ;;  %v8273_v43 = vsel %vm3282_vm10, 0.0, %v8259_v56 }
 0x55d   : > { %3997 = vrot.lane.b32.xlu0 %v8161_v63, %s7133_s17  ;;  %3335 = vrot.lane.b32.xlu1 %v8187_v15, %s7131_s30 }
 0x561   : > { %4246 = vrot.lane.b32.xlu0 %v8149_v59, %s9745_s27  ;;  %3758 = vrot.lane.b32.xlu1 %v8179_v12, %s7132_s0 }
 0x565   : > { %4244 = vrot.lane.b32.xlu0 %v8161_v63, %s9745_s27  ;;  %3756 = vrot.lane.b32.xlu1 %v8187_v15, %s7132_s0 }
 0x569   : > { %3339 = vrot.lane.b32.xlu0 %v8206_v40, %s7131_s30  ;;  %4005 = vrot.lane.b32.xlu1 %v8179_v12, %s7133_s17 }
 0x56d   : > { %3760 = vrot.lane.b32.xlu0 %v8206_v40, %s7132_s0  ;;  %4003 = vrot.lane.b32.xlu1 %v8187_v15, %s7133_s17 }
 0x571   : > { %4007 = vrot.lane.b32.xlu0 %v8206_v40, %s7133_s17  ;;  %4252 = vrot.lane.b32.xlu1 %v8179_v12, %s9745_s27 }
 0x575   : > { %4254 = vrot.lane.b32.xlu0 %v8206_v40, %s9745_s27  ;;  %4250 = vrot.lane.b32.xlu1 %v8187_v15, %s9745_s27 }
 0x579   : > { %3343 = vrot.lane.b32.xlu0 %v8231_v18, %s7131_s30  ;;  %3345 = vrot.lane.b32.xlu1 %v8235_v26, %s7131_s30 }
 0x57d   : > { %3341 = vrot.lane.b32.xlu0 %v8243_v22, %s7131_s30  ;;  %3766 = vrot.lane.b32.xlu1 %v8235_v26, %s7132_s0 }
 0x581   : > { %3764 = vrot.lane.b32.xlu0 %v8231_v18, %s7132_s0  ;;  %4013 = vrot.lane.b32.xlu1 %v8235_v26, %s7133_s17 }
 0x585   : > { %3762 = vrot.lane.b32.xlu0 %v8243_v22, %s7132_s0  ;;  %4260 = vrot.lane.b32.xlu1 %v8235_v26, %s9745_s27 }
 0x589   : > { %4011 = vrot.lane.b32.xlu0 %v8231_v18, %s7133_s17  ;;  %4507 = vrot.lane.b32.xlu1 %v8235_v26, %s9746_s19 }
 0x58d   : > { %4009 = vrot.lane.b32.xlu0 %v8243_v22, %s7133_s17  ;;  %3349 = vrot.lane.b32.xlu1 %v8265_v57, %s7131_s30 }
 0x591   : > { %4258 = vrot.lane.b32.xlu0 %v8231_v18, %s9745_s27  ;;  %3347 = vrot.lane.b32.xlu1 %v8273_v43, %s7131_s30 }
 0x595   : > { %4256 = vrot.lane.b32.xlu0 %v8243_v22, %s9745_s27  ;;  %3770 = vrot.lane.b32.xlu1 %v8265_v57, %s7132_s0 }
 0x599   : > { %4505 = vrot.lane.b32.xlu0 %v8231_v18, %s9746_s19  ;;  %3768 = vrot.lane.b32.xlu1 %v8273_v43, %s7132_s0 }
 0x59d   : > { %3351 = vrot.lane.b32.xlu0 %v8299_v39, %s7131_s30  ;;  %4017 = vrot.lane.b32.xlu1 %v8265_v57, %s7133_s17  ;;  %s9747_s30 = smov 92  }
 0x5a1   : > { %4503 = vrot.lane.b32.xlu0 %v8243_v22, %s9746_s19  ;;  %4015 = vrot.lane.b32.xlu1 %v8273_v43, %s7133_s17 }
 0x5a5   : > { %4501 = vrot.lane.b32.xlu0 %v8206_v40, %s9746_s19  ;;  %4264 = vrot.lane.b32.xlu1 %v8265_v57, %s9745_s27 }
 0x5a9   : > { %4493 = vrot.lane.b32.xlu0 %v8149_v59, %s9746_s19  ;;  %4262 = vrot.lane.b32.xlu1 %v8273_v43, %s9745_s27 }
 0x5ad   : > { %4491 = vrot.lane.b32.xlu0 %v8161_v63, %s9746_s19  ;;  %4511 = vrot.lane.b32.xlu1 %v8265_v57, %s9746_s19 }
 0x5b1   : > { %4752 = vrot.lane.b32.xlu0 %v8231_v18, %s9747_s30  ;;  %4509 = vrot.lane.b32.xlu1 %v8273_v43, %s9746_s19 }
 0x5b5   : > { %3772 = vrot.lane.b32.xlu0 %v8299_v39, %s7132_s0  ;;  %4499 = vrot.lane.b32.xlu1 %v8179_v12, %s9746_s19  ;;  %s9748_s0 = smov 91  }
 0x5b9   : > { %4750 = vrot.lane.b32.xlu0 %v8243_v22, %s9747_s30  ;;  %4497 = vrot.lane.b32.xlu1 %v8187_v15, %s9746_s19 }
 0x5bb   : > { %v8333_v61 = vpop.permute.xlu0 %3331  ;;  %v8335_v45 = vpop.permute.xlu1 %3333 }
 0x5bd   : > { %4748 = vrot.lane.b32.xlu0 %v8206_v40, %s9747_s30  ;;  %4495 = vrot.lane.b32.xlu1 %v8153_v27, %s9746_s19 }
 0x5bf   : > { %v8341_v51 = vpop.permute.xlu0 %3329  ;;  %v8343_v58 = vpop.permute.xlu1 %3754 }
 0x5c1   : > { %4019 = vrot.lane.b32.xlu0 %v8299_v39, %s7133_s17  ;;  %4758 = vrot.lane.b32.xlu1 %v8265_v57, %s9747_s30  ;;  %s9749_s17 = smov 90  }
 0x5c3   : > { %v8349_v23 = vpop.permute.xlu0 %3752  ;;  %v8351_v37 = vpop.permute.xlu1 %4001 }
 0x5c5   : > { %4740 = vrot.lane.b32.xlu0 %v8149_v59, %s9747_s30  ;;  %4756 = vrot.lane.b32.xlu1 %v8273_v43, %s9747_s30 }
 0x5c7   : > { %v8357_v13 = vpop.permute.xlu0 %3750  ;;  %v8359_v52 = vpop.permute.xlu1 %4248 }
 0x5c9   : > { %4738 = vrot.lane.b32.xlu0 %v8161_v63, %s9747_s30  ;;  %4754 = vrot.lane.b32.xlu1 %v8235_v26, %s9747_s30 }
 0x5cb   : > { %v8365_v32 = vpop.permute.xlu0 %3999  ;;  %v8367_v28 = vpop.permute.xlu1 %3337 }
 0x5cd   : > { %4266 = vrot.lane.b32.xlu0 %v8299_v39, %s9745_s27  ;;  %4746 = vrot.lane.b32.xlu1 %v8179_v12, %s9747_s30  ;;  %s551_s27 = scalar_lea.vmem %s9660_s1, %s6638_s26 }
 0x5cf   : > { %v8373_v6 = vpop.permute.xlu0 %3997  ;;  %v8375_v9 = vpop.permute.xlu1 %3335 }
 0x5d1   : > { %4999 = vrot.lane.b32.xlu0 %v8231_v18, %s9748_s0  ;;  %4744 = vrot.lane.b32.xlu1 %v8187_v15, %s9747_s30 }
 0x5d3   : > { %v8381_v30 = vpop.permute.xlu0 %4246  ;;  %v8383_v33 = vpop.permute.xlu1 %3758 }
 0x5d5   : > { %4997 = vrot.lane.b32.xlu0 %v8243_v22, %s9748_s0  ;;  %4742 = vrot.lane.b32.xlu1 %v8153_v27, %s9747_s30 }
 0x5d7   : > { %v8389_v35 = vpop.permute.xlu0 %4244  ;;  %v8391_v21 = vpop.permute.xlu1 %3756 }
 0x5d9   : > { %4513 = vrot.lane.b32.xlu0 %v8299_v39, %s9746_s19  ;;  %5005 = vrot.lane.b32.xlu1 %v8265_v57, %s9748_s0 }
 0x5db   : > { %v8397_v2 = vpop.permute.xlu0 %3339  ;;  %v8399_v54 = vpop.permute.xlu1 %4005 }
 0x5dd   : > { %4995 = vrot.lane.b32.xlu0 %v8206_v40, %s9748_s0  ;;  %5003 = vrot.lane.b32.xlu1 %v8273_v43, %s9748_s0 }
 0x5df   : > { %v8405_v1 = vpop.permute.xlu0 %3760  ;;  %v8407_v4 = vpop.permute.xlu1 %4003 }
 0x5e1   : > { %4987 = vrot.lane.b32.xlu0 %v8149_v59, %s9748_s0  ;;  %5001 = vrot.lane.b32.xlu1 %v8235_v26, %s9748_s0 }
 0x5e3   : > { %v8413_v60 = vpop.permute.xlu0 %4007  ;;  %v8415_v8 = vpop.permute.xlu1 %4252 }
 0x5e5   : > { %4760 = vrot.lane.b32.xlu0 %v8299_v39, %s9747_s30  ;;  %4993 = vrot.lane.b32.xlu1 %v8179_v12, %s9748_s0 }
 0x5e7   : > { %v8421_v3 = vpop.permute.xlu0 %4254  ;;  %v8423_v49 = vpop.permute.xlu1 %4250 }
 0x5e9   : > { %4985 = vrot.lane.b32.xlu0 %v8161_v63, %s9748_s0  ;;  %4991 = vrot.lane.b32.xlu1 %v8187_v15, %s9748_s0 }
 0x5eb   : > { %v3344_v25 = vpop.permute.xlu0 %3343  ;;  %v3346_v41 = vpop.permute.xlu1 %3345 }
 0x5ed   : > { %5246 = vrot.lane.b32.xlu0 %v8231_v18, %s9749_s17  ;;  %4989 = vrot.lane.b32.xlu1 %v8153_v27, %s9748_s0 }
 0x5ef   : > { %v3342_v47 = vpop.permute.xlu0 %3341  ;;  %v8433_v10 = vpop.permute.xlu1 %3766 }
 0x5f1   : > { %5007 = vrot.lane.b32.xlu0 %v8299_v39, %s9748_s0  ;;  %5252 = vrot.lane.b32.xlu1 %v8265_v57, %s9749_s17 }
 0x5f3   : > { %v8439_v11 = vpop.permute.xlu0 %3764  ;;  %v8441_v17 = vpop.permute.xlu1 %4013 }
 0x5f5   : > { %5244 = vrot.lane.b32.xlu0 %v8243_v22, %s9749_s17  ;;  %5250 = vrot.lane.b32.xlu1 %v8273_v43, %s9749_s17 }
 0x5f7   : > { %v8447_v14 = vpop.permute.xlu0 %3762  ;;  %v8449_v53 = vpop.permute.xlu1 %4260 }
 0x5f9   : > { %5242 = vrot.lane.b32.xlu0 %v8206_v40, %s9749_s17  ;;  %5248 = vrot.lane.b32.xlu1 %v8235_v26, %s9749_s17  ;;  %v5548_v40 = vld [vmem:[%s9667_s8 + $0x10] sm:$0xff] }
 0x5fb   : > { %v8455_v5 = vpop.permute.xlu0 %4011  ;;  %v8457_v46 = vpop.permute.xlu1 %4507 }
 0x5fc   : > { %9750 = vst [vmem:[#allocation3_spill] sm:$0xff] %v8457_v46 }
 0x5fd   : > { %5254 = vrot.lane.b32.xlu0 %v8299_v39, %s9749_s17  ;;  %5240 = vrot.lane.b32.xlu1 %v8179_v12, %s9749_s17 }
 0x5ff   : > { %v8463_v24 = vpop.permute.xlu0 %4009  ;;  %v3350_v31 = vpop.permute.xlu1 %3349 }
 0x601   : > { %5234 = vrot.lane.b32.xlu0 %v8149_v59, %s9749_s17  ;;  %5238 = vrot.lane.b32.xlu1 %v8187_v15, %s9749_s17 }
 0x603   : > { %v8469_v29 = vpop.permute.xlu0 %4258  ;;  %v3348_v19 = vpop.permute.xlu1 %3347 }
 0x605   : > { %5232 = vrot.lane.b32.xlu0 %v8161_v63, %s9749_s17  ;;  %5236 = vrot.lane.b32.xlu1 %v8153_v27, %s9749_s17  ;;  %v5546_v27 = vld [vmem:[%s9667_s8] sm:$0xff]  ;;  %v5547_v63 = vld [vmem:[%s9667_s8 + $0x8] sm:$0xff] }
 0x607   : > { %v4257_v50 = vpop.permute.xlu0 %4256  ;;  %v8481_v26 = vpop.permute.xlu1 %3770 }
 0x608   : > { %v8485_v15 = vsel %vm1408_vm4, %v4257_v50, %v8469_v29  ;;  %v3357_v50 = vsel %vm588_vm1, %v3342_v47, %v3344_v25  ;;  %v3354_v47 = vsel %vm588_vm1, %v8333_v61, %v8335_v45 }
 0x609   : > { %5562 = vperm.xlu0 %7020, %v5548_v40   ;;  %5567 = vperm.xlu1 %7021, %v5549_v62   ;;  %v3359_v40 = vsel %vm588_vm1, %v3348_v19, %v3350_v31  ;;  %v3358_v62 = vsel %vm588_vm1, %v3344_v25, %v3346_v41  ;;  %v3355_v25 = vsel %vm588_vm1, %v8375_v9, %v8367_v28 }
 0x60b   : > { %v8493_v22 = vpop.permute.xlu0 %4505  ;;  %v8495_v38 = vpop.permute.xlu1 %3768 }
 0x60d   : > { %5552 = vperm.xlu0 %7020, %v5546_v27   ;;  %5557 = vperm.xlu1 %7021, %v5547_v63  }
 0x60f   : > { %v3352_v43 = vpop.permute.xlu0 %3351  ;;  %v8497_v16 = vpop.permute.xlu1 %4017 }
 0x610   : > { %6874 = vmatprep.subr.mxu0 %v3352_v43  ;;  %v3360_v39 = vsel %vm588_vm1, %v3350_v31, %v3352_v43  ;;  %v3356_v31 = vsel %vm588_vm1, %v8367_v28, %v8397_v2  ;;  %v4025_v28 = vsel %vm1193_vm3, %v8463_v24, %v8455_v5 }
 0x611   : > { %3409 = vmatprep.subr.mxu1 %v3360_v39  ;;  %6875 = vmatpush3.msra.mxu0 %v3352_v43  ;;  %v3315_v43 = vld [vmem:[%s9666_s7 + $0x18] sm:$0xff]  ;;  %v3779_v39 = vsel %vm978_vm2, %v8439_v11, %v8433_v10 }
 0x612   : > { %3410 = vmatpush1.msra.mxu1 %v3359_v40  ;;  %6876 = vmatprep.subr.mxu0 %v3346_v41  ;;  %v3778_v40 = vsel %vm978_vm2, %v8447_v14, %v8439_v11  ;;  %v3776_v11 = vsel %vm978_vm2, %v8391_v21, %v8383_v33  ;;  %v6528_v14 = vld [vmem:[%s9666_s7 + $0x40] sm:$0xff] }
 0x613   : > { %v4504_v46 = vpop.permute.xlu0 %4503  ;;  %3411 = vmatprep.subr.mxu1 %v3358_v62  ;;  %6877 = vmatpush3.msra.mxu0 %v3346_v41  ;;  %v8503_v27 = vpop.permute.xlu1 %4015  ;;  %v6497_v41 = vld [vmem:[%s9666_s7 + $0x28] sm:$0xff]  ;;  %v3775_v62 = vsel %vm978_vm2, %v8349_v23, %v8343_v58 }
 0x614   : > { %v8507_v63 = vsel %vm1623_vm5, %v4504_v46, %v8493_v22  ;;  %3412 = vmatpush1.msra.mxu1 %v3357_v50  ;;  %6878 = vmatprep.subr.mxu0 %v8397_v2  ;;  %v3353_v46 = vsel %vm588_vm1, %v8341_v51, %v8333_v61  ;;  %v6498_v61 = vld [vmem:[%s9666_s7 + $0x30] sm:$0xff]  ;;  %v6529_v50 = vld [vmem:[%s9666_s7 + $0x48] sm:$0xff] }
 0x615   : > { %3413 = vmatprep.subr.mxu1 %v3356_v31  ;;  %6879 = vmatpush3.msra.mxu0 %v8397_v2  ;;  %v3780_v2 = vsel %vm978_vm2, %v8495_v38, %v8481_v26 }
 0x616   : > { %3414 = vmatpush1.msra.mxu1 %v3355_v25  ;;  %6880 = vmatprep.subr.mxu0 %v8335_v45 }
 0x617   : > { %v8527_v19 = vpop.permute.xlu0 %4501  ;;  %3415 = vmatprep.subr.mxu1 %v3354_v47  ;;  %6881 = vmatpush3.msra.mxu0 %v8335_v45  ;;  %v8535_v9 = vpop.permute.xlu1 %4264  ;;  %v4026_v47 = vsel %vm1193_vm3, %v8455_v5, %v8441_v17 }
 0x618   : > { %3416 = vmatpush1.msra.mxu1 %v3353_v46  ;;  %6883 = vmatmul.mubr.msk.f32.vlgmr.msra.gmra.mxu0 %vm2544_vm9, %v6497_v41 }
 0x619   : > { %3595 = vmatprep.subr.mxu0 %v8265_v57  ;;  %6500 = vmatmul.mubr.msk.f32.vlgmr.msra.gmra.mxu1 %vm2544_vm9, %v8286_v55  ;;  %v6499_v55 = vld [vmem:[%s9666_s7 + $0x38] sm:$0xff] }
 0x61a   : > { %6509 = vmatpush1.msk.msra.mxu0 %vm8531_vm12, %v8259_v56  ;;  %6888 = vmatprep.subr.msk.mxu1 %vm3307_vm11, %v8289_v20 }
 0x61b   : > { %3597 = vmatprep.subr.mxu0 %v8231_v18  ;;  %6889 = vmatpush3.msk.msra.mxu1 %vm3307_vm11, %v8289_v20  ;;  %v8552_v57 = vpop.permute.xlu0 %4493  ;;  %v8557_v45 = vpop.permute.xlu1 %4262 }
 0x61c   : > { %6885 = vmatprep.mubr.msk.f32.mxu0 %vm2544_vm9, %v6498_v61  ;;  %6511 = vmatpush1.msk.msra.mxu0 %vm8531_vm12, %v8220_v36 }
 0x61d   : > { %6890 = vmatprep.subr.msk.mxu1 %vm3307_vm11, %v8225_v42  ;;  %3455 = vmatprep.mubr.f32.mxu1 %v9743_v48 }
 0x61e   : > { %6886 = vmatmul.mubr.msk.f32.gmra.mxu0 %vm2544_vm9, %v6499_v55  ;;  %3599 = vmatprep.subr.mxu0 %v8179_v12  ;;  %v3312_v12 = vld [vmem:[%s9666_s7] sm:$0xff] }
 0x61f   : > { %6891 = vmatpush3.msk.msra.mxu1 %vm3307_vm11, %v8225_v42  ;;  %6513 = vmatpush1.msk.msra.mxu0 %vm8531_vm12, %v8173_v0  ;;  %v8573_v18 = vpop.permute.xlu0 %4491  ;;  %v8575_v56 = vpop.permute.xlu1 %4511  ;;  %v3314_v42 = vld [vmem:[%s9666_s7 + $0x10] sm:$0xff] }
 0x620   : > { %6501 = vmatmul.mubr.msk.f32.gmra.mxu1 %vm2544_vm9, %v6497_v41  ;;  %6892 = vmatprep.subr.msk.mxu1 %vm3307_vm11, %v8198_v34  ;;  %v4027_v41 = vsel %vm1193_vm3, %v8503_v27, %v8497_v16  ;;  %v4024_v27 = vsel %vm1193_vm3, %v8399_v54, %v8413_v60 }
 0x621   : > { %3601 = vmatprep.subr.mxu0 %v8149_v59  ;;  %6893 = vmatpush3.msk.msra.mxu1 %vm3307_vm11, %v8198_v34 }
 0x622   : > { %6515 = vmatpush1.msk.msra.mxu0 %vm8531_vm12, %v8142_v7  ;;  %3635 = vmatprep.mubr.f32.mxu0 %v9743_v48  ;;  %v3313_v7 = vld [vmem:[%s9666_s7 + $0x8] sm:$0xff] }
 0x623   : > { %6894 = vmatprep.subr.msk.mxu1 %vm3307_vm11, %v8145_v44  ;;  %3461 = vmatprep.mubr.f32.mxu1 %v9743_v48  ;;  %v8593_v0 = vpop.permute.xlu0 %4752  ;;  %v8598_v59 = vpop.permute.xlu1 %4509 }
 0x624   : > { %6516 = vmatmul.mubr.msk.f32.vlgmr.msra.gmra.mxu0 %vm2544_vm9, %v3312_v12  ;;  %6895 = vmatpush3.msk.msra.mxu1 %vm3307_vm11, %v8145_v44 }
 0x625   : > { %6502 = vmatmul.mubr.msk.f32.gmra.mxu1 %vm2544_vm9, %v6498_v61  ;;  %3641 = vmatprep.mubr.f32.mxu0 %v9743_v48  ;;  %v4023_v61 = vsel %vm1193_vm3, %v8407_v4, %v8399_v54  ;;  %v4021_v54 = vsel %vm1193_vm3, %v8373_v6, %v8365_v32  ;;  %v6540_v4 = vld [vmem:[%s9666_s7 + $0x60] sm:$0xff]  ;;  %v4274_v6 = vsel %vm1408_vm4, %v8557_v45, %v8535_v9 }
 0x626   : > { %3467 = vmatprep.mubr.f32.mxu1 %v9743_v48 }
 0x627   : > { %v3773_v34 = vpop.permute.xlu0 %3772  ;;  %v8607_v36 = vpop.permute.xlu1 %4499 }
 0x628   : > { %6517 = vmatmul.mubr.msk.f32.gmra.mxu0 %vm2544_vm9, %v3313_v7  ;;  %6902 = vmatprep.subr.mxu0 %v3773_v34  ;;  %v3781_v44 = vsel %vm978_vm2, %v8481_v26, %v3773_v34 }
 0x629   : > { %6503 = vmatmul.mubr.msk.f32.gmra.mxu1 %vm2544_vm9, %v6499_v55  ;;  %3647 = vmatprep.mubr.f32.mxu0 %v9743_v48 }
 0x62a   : > { %6896 = vmatprep.mubr.msk.f32.mxu1 %vm2544_vm9, %v3312_v12  ;;  %3830 = vmatprep.subr.mxu1 %v3781_v44  ;;  %v6542_v12 = vld [vmem:[%s9666_s7 + $0x70] sm:$0xff] }
 0x62b   : > { %6903 = vmatpush3.msra.mxu0 %v3773_v34  ;;  %v8617_v20 = vpop.permute.xlu0 %4750  ;;  %v8620_v51 = vpop.permute.xlu1 %4497  ;;  %v4273_v34 = vsel %vm1408_vm4, %v8469_v29, %v8449_v53 }
 0x62c   : > { %6518 = vmatmul.mubr.msk.f32.gmra.mxu0 %vm2544_vm9, %v3314_v42  ;;  %6904 = vmatprep.subr.mxu0 %v8433_v10 }
 0x62d   : > { %6897 = vmatmul.mubr.msk.f32.vlgmr.msra.gmra.mxu1 %vm2544_vm9, %v3313_v7  ;;  %3653 = vmatprep.mubr.f32.mxu0 %v9743_v48 }
 0x62e   : > { %3831 = vmatpush1.msra.mxu1 %v3780_v2  ;;  %6905 = vmatpush3.msra.mxu0 %v8433_v10  ;;  %v3777_v10 = vsel %vm978_vm2, %v8383_v33, %v8405_v1  ;;  %v3774_v33 = vsel %vm978_vm2, %v8357_v13, %v8349_v23  ;;  %v4268_v2 = vsel %vm1408_vm4, %v8389_v35, %v8381_v30 }
 0x62f   : > { %3832 = vmatprep.subr.mxu1 %v3779_v39  ;;  %6899 = vmatprep.mubr.msk.f32.mxu1 %vm2544_vm9, %v3314_v42  ;;  %v8639_v26 = vpop.permute.xlu0 %4748  ;;  %v8642_v38 = vpop.permute.xlu1 %4495  ;;  %v4270_v42 = vsel %vm1408_vm4, %v8423_v49, %v8415_v8  ;;  %v4521_v39 = vsel %vm1623_vm5, %v8598_v59, %v8575_v56 }
 0x630   : > { %6519 = vmatmul.mubr.msk.f32.gmra.mxu0 %vm2544_vm9, %v3315_v43  ;;  %3833 = vmatpush1.msra.mxu1 %v3778_v40  ;;  %v9753_v40 = vld [vmem:[#allocation3_spill] sm:$0xff] }
 0x631   : > { %6906 = vmatprep.subr.mxu0 %v8405_v1  ;;  %6900 = vmatmul.mubr.msk.f32.gmra.mxu1 %vm2544_vm9, %v3315_v43 }
 0x632   : > { %3834 = vmatprep.subr.mxu1 %v3777_v10  ;;  %6907 = vmatpush3.msra.mxu0 %v8405_v1  ;;  %v6530_v1 = vld [vmem:[%s9666_s7 + $0x50] sm:$0xff] }
 0x633   : > { %3835 = vmatpush1.msra.mxu1 %v3776_v11  ;;  %6908 = vmatprep.subr.mxu0 %v8343_v58  ;;  %v4020_v31 = vpop.permute.xlu0 %4019  ;;  %v8667_v21 = vpop.permute.xlu1 %4758  ;;  %v6554_v10 = vld [vmem:[%s9666_s7 + $0x90] sm:$0xff]  ;;  %v4520_v11 = vsel %vm1623_vm5, %v8493_v22, %v9753_v40  ;;  %v4518_v22 = vsel %vm1623_vm5, %v8607_v36, %v8527_v19 }
 0x634   : > { %3836 = vmatprep.subr.mxu1 %v3775_v62  ;;  %6909 = vmatpush3.msra.mxu0 %v8343_v58  ;;  %v4028_v25 = vsel %vm1193_vm3, %v8497_v16, %v4020_v31  ;;  %v6531_v58 = vld [vmem:[%s9666_s7 + $0x58] sm:$0xff]  ;;  %v4517_v62 = vsel %vm1623_vm5, %v8620_v51, %v8607_v36 }
 0x635   : > { %6910 = vmatprep.mubr.msk.f32.mxu0 %vm2544_vm9, %v6528_v14  ;;  %3837 = vmatpush1.msra.mxu1 %v3774_v33  ;;  %v4515_v33 = vsel %vm1623_vm5, %v8573_v18, %v8552_v57 }
 0x636   : > { %3870 = vmatprep.mubr.f32.mxu1 %v9743_v48  ;;  %6911 = vmatmul.mubr.msk.f32.vlgmr.msra.gmra.mxu0 %vm2544_vm9, %v6529_v50 }
 0x637   : > { %6532 = vmatmul.mubr.msk.f32.vlgmr.msra.gmra.mxu1 %vm2544_vm9, %v6528_v14  ;;  %6913 = vmatprep.mubr.msk.f32.mxu0 %vm2544_vm9, %v6530_v1  ;;  %v8682_v23 = vpop.permute.xlu0 %4740  ;;  %v8685_v13 = vpop.permute.xlu1 %4756 }
 0x638   : > { %3876 = vmatprep.mubr.f32.mxu1 %v9743_v48  ;;  %6916 = vmatprep.subr.mxu1 %v4020_v31 }
 0x639   : > { %4077 = vmatprep.subr.mxu0 %v4028_v25  ;;  %6917 = vmatpush3.msra.mxu1 %v4020_v31 }
 0x63a   : > { %6914 = vmatmul.mubr.msk.f32.gmra.mxu0 %vm2544_vm9, %v6531_v58  ;;  %6918 = vmatprep.subr.mxu1 %v8441_v17 }
 0x63b   : > { %6533 = vmatmul.mubr.msk.f32.gmra.mxu1 %vm2544_vm9, %v6529_v50  ;;  %4078 = vmatpush1.msra.mxu0 %v4027_v41  ;;  %v8696_v46 = vpop.permute.xlu0 %4738  ;;  %v8702_v16 = vpop.permute.xlu1 %4754 }
 0x63c   : > { %4079 = vmatprep.subr.mxu0 %v4026_v47  ;;  %6919 = vmatpush3.msra.mxu1 %v8441_v17  ;;  %v4022_v17 = vsel %vm1193_vm3, %v8365_v32, %v8351_v37  ;;  %v4767_v25 = vsel %vm1838_vm6, %v8593_v0, %v8702_v16 }
 0x63d   : > { %3882 = vmatprep.mubr.f32.mxu1 %v9743_v48  ;;  %4080 = vmatpush1.msra.mxu0 %v4025_v28 }
 0x63e   : > { %6920 = vmatprep.subr.mxu1 %v8413_v60  ;;  %4081 = vmatprep.subr.mxu0 %v4024_v27  ;;  %v4762_v27 = vsel %vm1838_vm6, %v8696_v46, %v8682_v23 }
 0x63f   : > { %6534 = vmatmul.mubr.msk.f32.gmra.mxu1 %vm2544_vm9, %v6530_v1  ;;  %4082 = vmatpush1.msra.mxu0 %v4023_v61  ;;  %v4267_v5 = vpop.permute.xlu0 %4266  ;;  %v8717_v24 = vpop.permute.xlu1 %4746  ;;  %v6566_v1 = vld [vmem:[%s9666_s7 + $0xb0] sm:$0xff] }
 0x640   : > { %6921 = vmatpush3.msra.mxu1 %v8413_v60  ;;  %4083 = vmatprep.subr.mxu0 %v4022_v17  ;;  %v4275_v60 = vsel %vm1408_vm4, %v8535_v9, %v4267_v5  ;;  %v6543_v9 = vld [vmem:[%s9666_s7 + $0x78] sm:$0xff]  ;;  %v4765_v47 = vsel %vm1838_vm6, %v8717_v24, %v8639_v26 }
 0x641   : > { %6922 = vmatprep.subr.mxu1 %v8351_v37  ;;  %3888 = vmatprep.mubr.f32.mxu1 %v9743_v48 }
 0x642   : > { %6923 = vmatpush3.msra.mxu1 %v8351_v37  ;;  %4084 = vmatpush1.msra.mxu0 %v4021_v54  ;;  %v6541_v37 = vld [vmem:[%s9666_s7 + $0x68] sm:$0xff] }
 0x643   : > { %4117 = vmatprep.mubr.f32.mxu0 %v9743_v48  ;;  %6535 = vmatmul.mubr.msk.f32.gmra.mxu1 %vm2544_vm9, %v6531_v58  ;;  %v8732_v55 = vpop.permute.xlu0 %4999  ;;  %v8736_v32 = vpop.permute.xlu1 %4744 }
 0x644   : > { %6544 = vmatmul.mubr.msk.f32.vlgmr.msra.gmra.mxu0 %vm2544_vm9, %v6540_v4  ;;  %6924 = vmatprep.mubr.msk.f32.mxu1 %vm2544_vm9, %v6540_v4  ;;  %v4764_v28 = vsel %vm1838_vm6, %v8736_v32, %v8717_v24  ;;  %v6578_v24 = vld [vmem:[%s9666_s7 + $0xd0] sm:$0xff]  ;;  %v6579_v4 = vld [vmem:[%s9666_s7 + $0xd8] sm:$0xff] }
 0x645   : > { %4123 = vmatprep.mubr.f32.mxu0 %v9743_v48  ;;  %6930 = vmatprep.subr.mxu0 %v4267_v5 }
 0x646   : > { %4324 = vmatprep.subr.mxu1 %v4275_v60  ;;  %6931 = vmatpush3.msra.mxu0 %v4267_v5 }
 0x647   : > { %6925 = vmatmul.mubr.msk.f32.vlgmr.msra.gmra.mxu1 %vm2544_vm9, %v6541_v37  ;;  %6932 = vmatprep.subr.mxu0 %v8449_v53  ;;  %v8750_v7 = vpop.permute.xlu0 %4997  ;;  %v8756_v44 = vpop.permute.xlu1 %4742 }
 0x648   : > { %6545 = vmatmul.mubr.msk.f32.gmra.mxu0 %vm2544_vm9, %v6541_v37  ;;  %4325 = vmatpush1.msra.mxu1 %v4274_v6  ;;  %v5013_v60 = vsel %vm2053_vm7, %v8750_v7, %v8732_v55 }
 0x649   : > { %4326 = vmatprep.subr.mxu1 %v4273_v34  ;;  %6933 = vmatpush3.msra.mxu0 %v8449_v53  ;;  %v4271_v53 = vsel %vm1408_vm4, %v8415_v8, %v8421_v3  ;;  %v6552_v8 = vld [vmem:[%s9666_s7 + $0x80] sm:$0xff] }
 0x64a   : > { %4129 = vmatprep.mubr.f32.mxu0 %v9743_v48  ;;  %6927 = vmatprep.mubr.msk.f32.mxu1 %vm2544_vm9, %v6542_v12  ;;  %v6588_v34 = vld [vmem:[%s9666_s7 + $0xe0] sm:$0xff] }
 0x64b   : > { %4327 = vmatpush1.msra.mxu1 %v8485_v15  ;;  %6934 = vmatprep.subr.mxu0 %v8421_v3  ;;  %v4514_v45 = vpop.permute.xlu0 %4513  ;;  %v8771_v29 = vpop.permute.xlu1 %5005  ;;  %v4269_v15 = vsel %vm1408_vm4, %v8381_v30, %v8359_v52 }
 0x64c   : > { %6546 = vmatmul.mubr.msk.f32.gmra.mxu0 %vm2544_vm9, %v6542_v12  ;;  %6928 = vmatmul.mubr.msk.f32.gmra.mxu1 %vm2544_vm9, %v6543_v9  ;;  %v4522_v30 = vsel %vm1623_vm5, %v8575_v56, %v4514_v45  ;;  %v6555_v56 = vld [vmem:[%s9666_s7 + $0x98] sm:$0xff] }
 0x64d   : > { %4328 = vmatprep.subr.mxu1 %v4271_v53  ;;  %6935 = vmatpush3.msra.mxu0 %v8421_v3 }
 0x64e   : > { %4329 = vmatpush1.msra.mxu1 %v4270_v42  ;;  %6936 = vmatprep.subr.mxu0 %v8359_v52  ;;  %v6590_v42 = vld [vmem:[%s9666_s7 + $0xf0] sm:$0xff] }
 0x64f   : > { %4330 = vmatprep.subr.mxu1 %v4269_v15  ;;  %6937 = vmatpush3.msra.mxu0 %v8359_v52  ;;  %v8788_v49 = vpop.permute.xlu0 %4995  ;;  %v8791_v3 = vpop.permute.xlu1 %5003  ;;  %v6553_v52 = vld [vmem:[%s9666_s7 + $0x88] sm:$0xff] }
 0x650   : > { %4135 = vmatprep.mubr.f32.mxu0 %v9743_v48  ;;  %4331 = vmatpush1.msra.mxu1 %v4268_v2  ;;  %v5015_v5 = vsel %vm2053_vm7, %v8791_v3, %v8771_v29 }
 0x651   : > { %4364 = vmatprep.mubr.f32.mxu1 %v9743_v48  ;;  %6547 = vmatmul.mubr.msk.f32.gmra.mxu0 %vm2544_vm9, %v6543_v9 }
 0x652   : > { %6556 = vmatmul.mubr.msk.f32.vlgmr.msra.gmra.mxu1 %vm2544_vm9, %v6552_v8  ;;  %6938 = vmatprep.mubr.msk.f32.mxu0 %vm2544_vm9, %v6552_v8  ;;  %v6591_v8 = vld [vmem:[%s9666_s7 + $0xf8] sm:$0xff] }
 0x653   : > { %4370 = vmatprep.mubr.f32.mxu1 %v9743_v48  ;;  %6944 = vmatprep.subr.mxu1 %v4514_v45  ;;  %v8803_v35 = vpop.permute.xlu0 %4987  ;;  %v8805_v43 = vpop.permute.xlu1 %5001 }
 0x654   : > { %4571 = vmatprep.subr.mxu0 %v4522_v30  ;;  %6945 = vmatpush3.msra.mxu1 %v4514_v45  ;;  %v5014_v54 = vsel %vm2053_vm7, %v8732_v55, %v8805_v43  ;;  %v6589_v45 = vld [vmem:[%s9666_s7 + $0xe8] sm:$0xff] }
 0x655   : > { %6939 = vmatmul.mubr.msk.f32.vlgmr.msra.gmra.mxu0 %vm2544_vm9, %v6553_v52  ;;  %6946 = vmatprep.subr.mxu1 %v9753_v40 }
 0x656   : > { %6557 = vmatmul.mubr.msk.f32.gmra.mxu1 %vm2544_vm9, %v6553_v52  ;;  %4572 = vmatpush1.msra.mxu0 %v4521_v39  ;;  %v6600_v39 = vld [vmem:[%s9666_s7 + $0x100] sm:$0xff] }
 0x657   : > { %4573 = vmatprep.subr.mxu0 %v4520_v11  ;;  %6947 = vmatpush3.msra.mxu1 %v9753_v40  ;;  %v4761_v59 = vpop.permute.xlu0 %4760  ;;  %v8825_v14 = vpop.permute.xlu1 %4993  ;;  %v5505_v40 = vld [vmem:[%s9672_s13 + $0xf8] sm:$0xff]  ;;  %v6601_v11 = vld [vmem:[%s9666_s7 + $0x108] sm:$0xff] }
 0x658   : > { %4376 = vmatprep.mubr.f32.mxu1 %v9743_v48  ;;  %6941 = vmatprep.mubr.msk.f32.mxu0 %vm2544_vm9, %v6554_v10  ;;  %v4769_v36 = vsel %vm1838_vm6, %v8667_v21, %v4761_v59  ;;  %v5012_v37 = vsel %vm2053_vm7, %v8825_v14, %v8788_v49 }
 0x659   : > { %4574 = vmatpush1.msra.mxu0 %v8507_v63  ;;  %6948 = vmatprep.subr.mxu1 %v8527_v19  ;;  %v4516_v63 = vsel %vm1623_vm5, %v8552_v57, %v8642_v38  ;;  %v6565_v57 = vld [vmem:[%s9666_s7 + $0xa8] sm:$0xff] }
 0x65a   : > { %6558 = vmatmul.mubr.msk.f32.gmra.mxu1 %vm2544_vm9, %v6554_v10  ;;  %6942 = vmatmul.mubr.msk.f32.gmra.mxu0 %vm2544_vm9, %v6555_v56  ;;  %v5504_v10 = vld [vmem:[%s9672_s13 + $0xf0] sm:$0xff] }
 0x65b   : > { %4575 = vmatprep.subr.mxu0 %v4518_v22  ;;  %6949 = vmatpush3.msra.mxu1 %v8527_v19  ;;  %v8838_v50 = vpop.permute.xlu0 %4985  ;;  %v8844_v31 = vpop.permute.xlu1 %4991  ;;  %v6564_v19 = vld [vmem:[%s9666_s7 + $0xa0] sm:$0xff]  ;;  %v5501_v22 = vld [vmem:[%s9672_s13 + $0xd8] sm:$0xff] }
 0x65c   : > { %4576 = vmatpush1.msra.mxu0 %v4517_v62  ;;  %6950 = vmatprep.subr.mxu1 %v8642_v38  ;;  %v5011_v55 = vsel %vm2053_vm7, %v8844_v31, %v8825_v14  ;;  %v5009_v7 = vsel %vm2053_vm7, %v8838_v50, %v8803_v35  ;;  %v5502_v14 = vld [vmem:[%s9672_s13 + $0xe0] sm:$0xff]  ;;  %v6603_v62 = vld [vmem:[%s9666_s7 + $0x118] sm:$0xff]  ;;  %v5500_v50 = vld [vmem:[%s9672_s13 + $0xd0] sm:$0xff] }
 0x65d   : > { %4577 = vmatprep.subr.mxu0 %v4516_v63  ;;  %6951 = vmatpush3.msra.mxu1 %v8642_v38  ;;  %v4768_v38 = vsel %vm1838_vm6, %v8685_v13, %v8667_v21  ;;  %v6567_v21 = vld [vmem:[%s9666_s7 + $0xb8] sm:$0xff]  ;;  %v4766_v13 = vsel %vm1838_vm6, %v8617_v20, %v8593_v0  ;;  %v4763_v20 = vsel %vm1838_vm6, %v8682_v23, %v8756_v44  ;;  %v6577_v23 = vld [vmem:[%s9666_s7 + $0xc8] sm:$0xff]  ;;  %v5498_v31 = vld [vmem:[%s9672_s13 + $0xc0] sm:$0xff] }
 0x65e   : > { %4382 = vmatprep.mubr.f32.mxu1 %v9743_v48  ;;  %4578 = vmatpush1.msra.mxu0 %v4515_v33  ;;  %v5499_v63 = vld [vmem:[%s9672_s13 + $0xc8] sm:$0xff]  ;;  %v5497_v33 = vld [vmem:[%s9672_s13 + $0xb8] sm:$0xff] }
 0x65f   : > { %4611 = vmatprep.mubr.f32.mxu0 %v9743_v48  ;;  %6559 = vmatmul.mubr.msk.f32.gmra.mxu1 %vm2544_vm9, %v6555_v56  ;;  %v8858_v51 = vpop.permute.xlu0 %5246  ;;  %v8865_v18 = vpop.permute.xlu1 %4989  ;;  %v5503_v56 = vld [vmem:[%s9672_s13 + $0xe8] sm:$0xff] }
 0x660   : > { %6568 = vmatmul.mubr.msk.f32.vlgmr.msra.gmra.mxu0 %vm2544_vm9, %v6564_v19  ;;  %6952 = vmatprep.mubr.msk.f32.mxu1 %vm2544_vm9, %v6564_v19  ;;  %v5010_v12 = vsel %vm2053_vm7, %v8803_v35, %v8865_v18  ;;  %v5496_v19 = vld [vmem:[%s9672_s13 + $0xb0] sm:$0xff] }
 0x661   : > { %4617 = vmatprep.mubr.f32.mxu0 %v9743_v48  ;;  %6958 = vmatprep.subr.mxu0 %v4761_v59 }
 0x662   : > { %4818 = vmatprep.subr.mxu1 %v4769_v36  ;;  %6959 = vmatpush3.msra.mxu0 %v4761_v59  ;;  %v6602_v59 = vld [vmem:[%s9666_s7 + $0x110] sm:$0xff]  ;;  %v5495_v36 = vld [vmem:[%s9672_s13 + $0xa8] sm:$0xff] }
 0x663   : > { %6953 = vmatmul.mubr.msk.f32.vlgmr.msra.gmra.mxu1 %vm2544_vm9, %v6565_v57  ;;  %6960 = vmatprep.subr.mxu0 %v8702_v16  ;;  %v8880_v58 = vpop.permute.xlu1 %5252  ;;  %v5008_v41 = vpop.permute.xlu0 %5007 }
 0x664   : > { %6569 = vmatmul.mubr.msk.f32.gmra.mxu0 %vm2544_vm9, %v6565_v57  ;;  %4819 = vmatpush1.msra.mxu1 %v4768_v38  ;;  %v5016_v61 = vsel %vm2053_vm7, %v8771_v29, %v5008_v41  ;;  %v5493_v57 = vld [vmem:[%s9672_s13 + $0x98] sm:$0xff]  ;;  %v5491_v38 = vld [vmem:[%s9672_s13 + $0x88] sm:$0xff] }
 0x665   : > { %4820 = vmatprep.subr.mxu1 %v4767_v25  ;;  %6961 = vmatpush3.msra.mxu0 %v8702_v16  ;;  %v5489_v25 = vld [vmem:[%s9672_s13 + $0x78] sm:$0xff] }
 0x666   : > { %4623 = vmatprep.mubr.f32.mxu0 %v9743_v48  ;;  %6955 = vmatprep.mubr.msk.f32.mxu1 %vm2544_vm9, %v6566_v1 }
 0x667   : > { %4821 = vmatpush1.msra.mxu1 %v4766_v13  ;;  %6962 = vmatprep.subr.mxu0 %v8639_v26  ;;  %v8901_v0 = vpop.permute.xlu1 %5250  ;;  %v8907_v16 = vpop.permute.xlu0 %5244  ;;  %v5485_v13 = vld [vmem:[%s9672_s13 + $0x58] sm:$0xff] }
 0x668   : > { %6570 = vmatmul.mubr.msk.f32.gmra.mxu0 %vm2544_vm9, %v6566_v1  ;;  %6956 = vmatmul.mubr.msk.f32.gmra.mxu1 %vm2544_vm9, %v6567_v21  ;;  %v5262_v29 = vsel %vm2268_vm8, %v8901_v0, %v8880_v58  ;;  %v5490_v1 = vld [vmem:[%s9672_s13 + $0x80] sm:$0xff] }
 0x669   : > { %4822 = vmatprep.subr.mxu1 %v4765_v47  ;;  %6963 = vmatpush3.msra.mxu0 %v8639_v26  ;;  %v6576_v26 = vld [vmem:[%s9666_s7 + $0xc0] sm:$0xff]  ;;  %v5484_v47 = vld [vmem:[%s9672_s13 + $0x50] sm:$0xff] }
 0x66a   : > { %4823 = vmatpush1.msra.mxu1 %v4764_v28  ;;  %6964 = vmatprep.subr.mxu0 %v8756_v44  ;;  %v5483_v28 = vld [vmem:[%s9672_s13 + $0x48] sm:$0xff]  ;;  %v5482_v0 = vld [vmem:[%s9672_s13 + $0x40] sm:$0xff] }
 0x66b   : > { %4824 = vmatprep.subr.mxu1 %v4763_v20  ;;  %6965 = vmatpush3.msra.mxu0 %v8756_v44  ;;  %v5249_v46 = vpop.permute.xlu1 %5248  ;;  %v8927_v17 = vpop.permute.xlu0 %5242  ;;  %v5481_v20 = vld [vmem:[%s9672_s13 + $0x38] sm:$0xff] }
 0x66c   : > { %4629 = vmatprep.mubr.f32.mxu0 %v9743_v48  ;;  %4825 = vmatpush1.msra.mxu1 %v4762_v27  ;;  %v5261_v15 = vsel %vm2268_vm8, %v8858_v51, %v5249_v46  ;;  %v5479_v27 = vld [vmem:[%s9672_s13 + $0x28] sm:$0xff] }
 0x66d   : > { %4858 = vmatprep.mubr.f32.mxu1 %v9743_v48  ;;  %6571 = vmatmul.mubr.msk.f32.gmra.mxu0 %vm2544_vm9, %v6567_v21  ;;  %v5486_v21 = vld [vmem:[%s9672_s13 + $0x60] sm:$0xff] }
 0x66e   : > { %6580 = vmatmul.mubr.msk.f32.vlgmr.msra.gmra.mxu1 %vm2544_vm9, %v6576_v26  ;;  %6966 = vmatprep.mubr.msk.f32.mxu0 %vm2544_vm9, %v6576_v26  ;;  %v5478_v26 = vld [vmem:[%s9672_s13 + $0x20] sm:$0xff] }
 0x66f   : > { %4864 = vmatprep.mubr.f32.mxu1 %v9743_v48  ;;  %6972 = vmatprep.subr.mxu1 %v5008_v41  ;;  %v5241_v32 = vpop.permute.xlu1 %5240  ;;  %v5255_v6 = vpop.permute.xlu0 %5254 }
 0x670   : > { %5065 = vmatprep.subr.mxu0 %v5016_v61  ;;  %6973 = vmatpush3.msra.mxu1 %v5008_v41  ;;  %v5263_v9 = vsel %vm2268_vm8, %v8880_v58, %v5255_v6  ;;  %v5259_v30 = vsel %vm2268_vm8, %v5241_v32, %v8927_v17  ;;  %v5488_v58 = vld [vmem:[%s9672_s13 + $0x70] sm:$0xff]  ;;  %v5487_v41 = vld [vmem:[%s9672_s13 + $0x68] sm:$0xff]  ;;  %v5477_v61 = vld [vmem:[%s9672_s13 + $0x18] sm:$0xff] }
 0x671   : > { %6967 = vmatmul.mubr.msk.f32.vlgmr.msra.gmra.mxu0 %vm2544_vm9, %v6577_v23  ;;  %6974 = vmatprep.subr.mxu1 %v8805_v43 }
 0x672   : > { %6581 = vmatmul.mubr.msk.f32.gmra.mxu1 %vm2544_vm9, %v6577_v23  ;;  %5066 = vmatpush1.msra.mxu0 %v5015_v5  ;;  %v5476_v23 = vld [vmem:[%s9672_s13 + $0x10] sm:$0xff]  ;;  %v5537_v5 = vld [vmem:[%s9672_s13 + $0x1f8] sm:$0xff] }
 0x673   : > { %5067 = vmatprep.subr.mxu0 %v5014_v54  ;;  %6975 = vmatpush3.msra.mxu1 %v8805_v43  ;;  %v5239_v44 = vpop.permute.xlu1 %5238  ;;  %v5235_v53 = vpop.permute.xlu0 %5234  ;;  %v5535_v54 = vld [vmem:[%s9672_s13 + $0x1e8] sm:$0xff] }
 0x674   : > { %4870 = vmatprep.mubr.f32.mxu1 %v9743_v48  ;;  %6969 = vmatprep.mubr.msk.f32.mxu0 %vm2544_vm9, %v6578_v24  ;;  %v5258_v35 = vsel %vm2268_vm8, %v5239_v44, %v5241_v32  ;;  %v5532_v32 = vld [vmem:[%s9672_s13 + $0x1d0] sm:$0xff]  ;;  %v5525_v44 = vld [vmem:[%s9672_s13 + $0x198] sm:$0xff] }
 0x675   : > { %5068 = vmatpush1.msra.mxu0 %v5013_v60  ;;  %6976 = vmatprep.subr.mxu1 %v8788_v49  ;;  %v5533_v60 = vld [vmem:[%s9672_s13 + $0x1d8] sm:$0xff] }
 0x676   : > { %6582 = vmatmul.mubr.msk.f32.gmra.mxu1 %vm2544_vm9, %v6578_v24  ;;  %6970 = vmatmul.mubr.msk.f32.gmra.mxu0 %vm2544_vm9, %v6579_v4  ;;  %v5536_v24 = vld [vmem:[%s9672_s13 + $0x1f0] sm:$0xff] }
 0x677   : > { %5069 = vmatprep.subr.mxu0 %v5012_v37  ;;  %6977 = vmatpush3.msra.mxu1 %v8788_v49  ;;  %v5237_v2 = vpop.permute.xlu1 %5236  ;;  %v5260_v49 = vsel %vm2268_vm8, %v8907_v16, %v8858_v51  ;;  %v5233_v3 = vpop.permute.xlu0 %5232  ;;  %v5494_v51 = vld [vmem:[%s9672_s13 + $0xa0] sm:$0xff]  ;;  %v5480_v16 = vld [vmem:[%s9672_s13 + $0x30] sm:$0xff]  ;;  %v5531_v37 = vld [vmem:[%s9672_s13 + $0x1c8] sm:$0xff] }
 0x678   : > { %5070 = vmatpush1.msra.mxu0 %v5011_v55  ;;  %6978 = vmatprep.subr.mxu1 %v8865_v18  ;;  %v5257_v52 = vsel %vm2268_vm8, %v5235_v53, %v5237_v2  ;;  %v5256_v43 = vsel %vm2268_vm8, %v5233_v3, %v5235_v53  ;;  %v5529_v55 = vld [vmem:[%s9672_s13 + $0x1b8] sm:$0xff]  ;;  %v5522_v53 = vld [vmem:[%s9672_s13 + $0x180] sm:$0xff]  ;;  %v5515_v3 = vld [vmem:[%s9672_s13 + $0x148] sm:$0xff] }
 0x679   : > { %5071 = vmatprep.subr.mxu0 %v5010_v12  ;;  %6979 = vmatpush3.msra.mxu1 %v8865_v18  ;;  %v5492_v18 = vld [vmem:[%s9672_s13 + $0x90] sm:$0xff] }
 0x67a   : > { %4876 = vmatprep.mubr.f32.mxu1 %v9743_v48  ;;  %5072 = vmatpush1.msra.mxu0 %v5009_v7  ;;  %v5528_v12 = vld [vmem:[%s9672_s13 + $0x1b0] sm:$0xff]  ;;  %v5527_v7 = vld [vmem:[%s9672_s13 + $0x1a8] sm:$0xff] }
 0x67b   : > { %5105 = vmatprep.mubr.f32.mxu0 %v9743_v48  ;;  %6583 = vmatmul.mubr.msk.f32.gmra.mxu1 %vm2544_vm9, %v6579_v4  ;;  %v5534_v4 = vld [vmem:[%s9672_s13 + $0x1e0] sm:$0xff] }
 0x67c   : > { %6592 = vmatmul.mubr.msk.f32.vlgmr.msra.gmra.mxu0 %vm2544_vm9, %v6588_v34  ;;  %6980 = vmatprep.mubr.msk.f32.mxu1 %vm2544_vm9, %v6588_v34  ;;  %v5526_v34 = vld [vmem:[%s9672_s13 + $0x1a0] sm:$0xff] }
 0x67d   : > { %5111 = vmatprep.mubr.f32.mxu0 %v9743_v48  ;;  %6986 = vmatprep.subr.mxu0 %v5255_v6 }
 0x67e   : > { %5312 = vmatprep.subr.mxu1 %v5263_v9  ;;  %6987 = vmatpush3.msra.mxu0 %v5255_v6  ;;  %v5530_v6 = vld [vmem:[%s9672_s13 + $0x1c0] sm:$0xff]  ;;  %v5524_v9 = vld [vmem:[%s9672_s13 + $0x190] sm:$0xff] }
 0x67f   : > { %6981 = vmatmul.mubr.msk.f32.vlgmr.msra.gmra.mxu1 %vm2544_vm9, %v6589_v45  ;;  %6988 = vmatprep.subr.mxu0 %v5249_v46 }
 0x680   : > { %6593 = vmatmul.mubr.msk.f32.gmra.mxu0 %vm2544_vm9, %v6589_v45  ;;  %5313 = vmatpush1.msra.mxu1 %v5262_v29  ;;  %v5523_v45 = vld [vmem:[%s9672_s13 + $0x188] sm:$0xff]  ;;  %v5521_v29 = vld [vmem:[%s9672_s13 + $0x178] sm:$0xff] }
 0x681   : > { %5314 = vmatprep.subr.mxu1 %v5261_v15  ;;  %6989 = vmatpush3.msra.mxu0 %v5249_v46  ;;  %v5475_v46 = vld [vmem:[%s9672_s13 + $0x8] sm:$0xff] }
 0x682   : > { %5117 = vmatprep.mubr.f32.mxu0 %v9743_v48  ;;  %6983 = vmatprep.mubr.msk.f32.mxu1 %vm2544_vm9, %v6590_v42  ;;  %v5519_v15 = vld [vmem:[%s9672_s13 + $0x168] sm:$0xff] }
 0x683   : > { %5315 = vmatpush1.msra.mxu1 %v5260_v49  ;;  %6990 = vmatprep.subr.mxu0 %v8927_v17  ;;  %v5516_v49 = vld [vmem:[%s9672_s13 + $0x150] sm:$0xff] }
 0x684   : > { %6594 = vmatmul.mubr.msk.f32.gmra.mxu0 %vm2544_vm9, %v6590_v42  ;;  %6984 = vmatmul.mubr.msk.f32.gmra.mxu1 %vm2544_vm9, %v6591_v8  ;;  %v5520_v42 = vld [vmem:[%s9672_s13 + $0x170] sm:$0xff] }
 0x685   : > { %5316 = vmatprep.subr.mxu1 %v5259_v30  ;;  %6991 = vmatpush3.msra.mxu0 %v8927_v17  ;;  %v5474_v17 = vld [vmem:[%s9672_s13] sm:$0xff] }
 0x686   : > { %5317 = vmatpush1.msra.mxu1 %v5258_v35  ;;  %6992 = vmatprep.subr.mxu0 %v5237_v2  ;;  %v5514_v30 = vld [vmem:[%s9672_s13 + $0x140] sm:$0xff]  ;;  %v5512_v35 = vld [vmem:[%s9672_s13 + $0x130] sm:$0xff] }
 0x687   : > { %5318 = vmatprep.subr.mxu1 %v5257_v52  ;;  %6993 = vmatpush3.msra.mxu0 %v5237_v2  ;;  %v5518_v2 = vld [vmem:[%s9672_s13 + $0x160] sm:$0xff]  ;;  %v5513_v52 = vld [vmem:[%s9672_s13 + $0x138] sm:$0xff] }
 0x688   : > { %5123 = vmatprep.mubr.f32.mxu0 %v9743_v48  ;;  %5319 = vmatpush1.msra.mxu1 %v5256_v43  ;;  %v5511_v43 = vld [vmem:[%s9672_s13 + $0x128] sm:$0xff] }
 0x689   : > { %6595 = vmatmul.mubr.msk.f32.gmra.mxu0 %vm2544_vm9, %v6591_v8  ;;  %5352 = vmatprep.mubr.f32.mxu1 %v9743_v48  ;;  %v5517_v8 = vld [vmem:[%s9672_s13 + $0x158] sm:$0xff] }
 0x68a   : > { %6604 = vmatmul.mubr.msk.f32.vlgmr.msra.gmra.mxu1 %vm2544_vm9, %v6600_v39  ;;  %6994 = vmatprep.mubr.msk.f32.mxu0 %vm2544_vm9, %v6600_v39  ;;  %v5545_v39 = vld [vmem:[%s9672_s13 + $0x238] sm:$0xff] }
 0x68b   : > { %5358 = vmatprep.mubr.f32.mxu1 %v9743_v48  ;;  %5582 = vmatprep.subr.mxu1 %v5505_v40  ;;  %v5510_v40 = vld [vmem:[%s9672_s13 + $0x120] sm:$0xff] }
 0x68c   : > { %5583 = vmatpush1.msra.mxu1 %v5504_v10  ;;  %5695 = vmatprep.subr.mxu0 %v5545_v39  ;;  %v5544_v10 = vld [vmem:[%s9672_s13 + $0x230] sm:$0xff] }
 0x68d   : > { %6995 = vmatmul.mubr.msk.f32.vlgmr.msra.gmra.mxu0 %vm2544_vm9, %v6601_v11  ;;  %5584 = vmatprep.subr.mxu1 %v5503_v56  ;;  %v5543_v56 = vld [vmem:[%s9672_s13 + $0x228] sm:$0xff] }
 0x68e   : > { %6605 = vmatmul.mubr.msk.f32.gmra.mxu1 %vm2544_vm9, %v6601_v11  ;;  %6997 = vmatprep.mubr.msk.f32.mxu0 %vm2544_vm9, %v6602_v59  ;;  %v5509_v11 = vld [vmem:[%s9672_s13 + $0x118] sm:$0xff] }
 0x68f   : > { %5364 = vmatprep.mubr.f32.mxu1 %v9743_v48  ;;  %5585 = vmatpush1.msra.mxu1 %v5502_v14  ;;  %v5542_v14 = vld [vmem:[%s9672_s13 + $0x220] sm:$0xff] }
 0x690   : > { %5586 = vmatprep.subr.mxu1 %v5501_v22  ;;  %5696 = vmatpush1.msra.mxu0 %v5544_v10  ;;  %v5507_v22 = vld [vmem:[%s9672_s13 + $0x108] sm:$0xff] }
 0x691   : > { %6998 = vmatmul.mubr.msk.f32.gmra.mxu0 %vm2544_vm9, %v6603_v62  ;;  %5587 = vmatpush1.msra.mxu1 %v5500_v50  ;;  %v5506_v50 = vld [vmem:[%s9672_s13 + $0x100] sm:$0xff] }
 0x692   : > { %6606 = vmatmul.mubr.msk.f32.gmra.mxu1 %vm2544_vm9, %v6602_v59  ;;  %5588 = vmatprep.subr.mxu1 %v5499_v63  ;;  %v5508_v59 = vld [vmem:[%s9672_s13 + $0x110] sm:$0xff] }
 0x693   : > { %5370 = vmatprep.mubr.f32.mxu1 %v9743_v48  ;;  %5589 = vmatpush1.msra.mxu1 %v5498_v31  ;;  %v5540_v63 = vld [vmem:[%s9672_s13 + $0x210] sm:$0xff]  ;;  %v5539_v31 = vld [vmem:[%s9672_s13 + $0x208] sm:$0xff] }
 0x694   : > { %5590 = vmatprep.subr.mxu1 %v5497_v33  ;;  %5735 = vmatprep.mubr.f32.mxu0 %v9743_v48  ;;  %v5538_v33 = vld [vmem:[%s9672_s13 + $0x200] sm:$0xff] }
 0x695   : > { %5591 = vmatpush1.msra.mxu1 %v5496_v19  ;;  %5697 = vmatprep.subr.mxu0 %v5543_v56 }
 0x696   : > { %6607 = vmatmul.mubr.msk.f32.gmra.mxu1 %vm2544_vm9, %v6603_v62  ;;  %5592 = vmatprep.subr.mxu1 %v5495_v36  ;;  %v5541_v62 = vld [vmem:[%s9672_s13 + $0x218] sm:$0xff] }
 0x697   : > { %5593 = vmatpush1.msra.mxu1 %v5494_v51  ;;  %5698 = vmatpush1.msra.mxu0 %v5542_v14 }
 0x698   : > { %5594 = vmatprep.subr.mxu1 %v5493_v57  ;;  %5699 = vmatprep.subr.mxu0 %v5541_v62 }
 0x699   : > { %5595 = vmatpush1.msra.mxu1 %v5492_v18  ;;  %5700 = vmatpush1.msra.mxu0 %v5540_v63 }
 0x69a   : > { %5596 = vmatprep.subr.mxu1 %v5491_v38  ;;  %5701 = vmatprep.subr.mxu0 %v5539_v31 }
 0x69b   : > { %5597 = vmatpush1.msra.mxu1 %v5490_v1  ;;  %5702 = vmatpush1.msra.mxu0 %v5538_v33 }
 0x69c   : > { %5598 = vmatprep.subr.mxu1 %v5489_v25 }
 0x69d   : > { %5599 = vmatpush1.msra.mxu1 %v5488_v58 }
 0x69e   : > { %5600 = vmatprep.subr.mxu1 %v5487_v41 }
 0x69f   : > { %5601 = vmatpush1.msra.mxu1 %v5486_v21 }
 0x6a0   : > { %5602 = vmatprep.subr.mxu1 %v5485_v13 }
 0x6a1   : > { %5603 = vmatpush1.msra.mxu1 %v5484_v47 }
 0x6a2   : > { %5604 = vmatprep.subr.mxu1 %v5483_v28 }
 0x6a3   : > { %5605 = vmatpush1.msra.mxu1 %v5482_v0 }
 0x6a4   : > { %5606 = vmatprep.subr.mxu1 %v5481_v20 }
 0x6a5   : > { %5607 = vmatpush1.msra.mxu1 %v5480_v16 }
 0x6a6   : > { %5608 = vmatprep.subr.mxu1 %v5479_v27 }
 0x6a7   : > { %5609 = vmatpush1.msra.mxu1 %v5478_v26 }
 0x6a8   : > { %5610 = vmatprep.subr.mxu1 %v5477_v61 }
 0x6a9   : > { %5611 = vmatpush1.msra.mxu1 %v5476_v23 }
 0x6aa   : > { %5612 = vmatprep.subr.mxu1 %v5475_v46 }
 0x6ab   : > { %5613 = vmatpush1.msra.mxu1 %v5474_v17 }
 0x6ac   : > { %5614 = vmatprep.subr.mxu1 %v5537_v5 }
 0x6ad   : > { %5615 = vmatpush2.msra.mxu1 %v5536_v24 }
 0x6ae   : > { %5616 = vmatprep.subr.mxu1 %v5535_v54 }
 0x6af   : > { %5617 = vmatpush2.msra.mxu1 %v5534_v4 }
 0x6b0   : > { %5618 = vmatprep.subr.mxu1 %v5533_v60 }
 0x6b1   : > { %5619 = vmatpush2.msra.mxu1 %v5532_v32 }
 0x6b2   : > { %5620 = vmatprep.subr.mxu1 %v5531_v37 }
 0x6b3   : > { %5621 = vmatpush2.msra.mxu1 %v5530_v6 }
 0x6b4   : > { %5622 = vmatprep.subr.mxu1 %v5529_v55 }
 0x6b5   : > { %5623 = vmatpush2.msra.mxu1 %v5528_v12 }
 0x6b6   : > { %5624 = vmatprep.subr.mxu1 %v5527_v7 }
 0x6b7   : > { %5625 = vmatpush2.msra.mxu1 %v5526_v34 }
 0x6b8   : > { %5626 = vmatprep.subr.mxu1 %v5525_v44 }
 0x6b9   : > { %5627 = vmatpush2.msra.mxu1 %v5524_v9 }
 0x6ba   : > { %5628 = vmatprep.subr.mxu1 %v5523_v45 }
 0x6bb   : > { %5629 = vmatpush2.msra.mxu1 %v5522_v53 }
 0x6bc   : > { %5630 = vmatprep.subr.mxu1 %v5521_v29 }
 0x6bd   : > { %5631 = vmatpush2.msra.mxu1 %v5520_v42 }
 0x6be   : > { %5632 = vmatprep.subr.mxu1 %v5519_v15 }
 0x6bf   : > { %5633 = vmatpush2.msra.mxu1 %v5518_v2 }
 0x6c0   : > { %5634 = vmatprep.subr.mxu1 %v5517_v8 }
 0x6c1   : > { %5635 = vmatpush2.msra.mxu1 %v5516_v49 }
 0x6c2   : > { %5636 = vmatprep.subr.mxu1 %v5515_v3 }
 0x6c3   : > { %5637 = vmatpush2.msra.mxu1 %v5514_v30 }
 0x6c4   : > { %5638 = vmatprep.subr.mxu1 %v5513_v52 }
 0x6c5   : > { %5639 = vmatpush2.msra.mxu1 %v5512_v35 }
 0x6c6   : > { %5640 = vmatprep.subr.mxu1 %v5511_v43 }
 0x6c7   : > { %5641 = vmatpush2.msra.mxu1 %v5510_v40 }
 0x6c8   : > { %5642 = vmatprep.subr.mxu1 %v5509_v11 }
 0x6c9   : > { %5643 = vmatpush2.msra.mxu1 %v5508_v59 }
 0x6ca   : > { %5644 = vmatprep.subr.mxu1 %v5507_v22 }
 0x6cb   : > { %5645 = vmatpush2.msra.mxu1 %v5506_v50 }
 0x6d8   : > { %v6884_v19 = vpop.f32.mrf.mxu0 }
 0x6d9   : > { %v3451_v36 = vpop.f32.mrf.mxu1 }
 0x6da   : > { %v3540_v51 = vpop.f32.mrf.mxu0 }
 0x6db   : > { %v3453_v57 = vpop.f32.mrf.mxu1 }
 0x6de   : > { %v6887_v18 = vpop.f32.mrf.mxu0 }
 0x6e0   : > { %v3457_v38 = vpop.f32.mrf.mxu1  ;;  %v3550_v1 = vpop.f32.mrf.mxu0 }
 0x6e2   : > { %v3459_v25 = vpop.f32.mrf.mxu1 }
 0x6e4   : > { %v3637_v58 = vpop.f32.mrf.mxu0 }
 0x6e5   : > { %v9252_v41 = vadd.f32 %v3637_v58, %v3451_v36  ;;  %v3463_v21 = vpop.f32.mrf.mxu1 }
 0x6e6   : > { %v3639_v13 = vpop.f32.mrf.mxu0 }
 0x6e7   : > { %v9254_v47 = vadd.f32 %v3639_v13, %v3453_v57  ;;  %v3465_v28 = vpop.f32.mrf.mxu1 }
 0x6e8   : > { %v3643_v0 = vpop.f32.mrf.mxu0 }
 0x6e9   : > { %v9256_v20 = vadd.f32 %v3643_v0, %v3457_v38  ;;  %v3469_v16 = vpop.f32.mrf.mxu1 }
 0x6ea   : > { %v3645_v27 = vpop.f32.mrf.mxu0 }
 0x6eb   : > { %v9258_v26 = vadd.f32 %v3645_v27, %v3459_v25  ;;  %v3471_v61 = vpop.f32.mrf.mxu1 }
 0x6ec   : > { %v3649_v23 = vpop.f32.mrf.mxu0 }
 0x6ed   : > { %v9260_v46 = vadd.f32 %v3649_v23, %v3463_v21  ;;  %v6898_v17 = vpop.f32.mrf.mxu1 }
 0x6ee   : > { %v3732_v5 = vadd.f32 %v6898_v17, %v6884_v19  ;;  %v3651_v24 = vpop.f32.mrf.mxu0 }
 0x6ef   : > { %v9262_v54 = vadd.f32 %v3651_v24, %v3465_v28  ;;  %v3726_v4 = vpop.f32.mrf.mxu1 }
 0x6f0   : > { %v9264_v60 = vadd.f32 %v3726_v4, %v3540_v51  ;;  %v3655_v32 = vpop.f32.mrf.mxu0 }
 0x6f1   : > { %v9266_v37 = vadd.f32 %v3655_v32, %v3469_v16  ;;  %v6901_v6 = vpop.f32.mrf.mxu1 }
 0x6f2   : > { %v3742_v55 = vadd.f32 %v6901_v6, %v6887_v18  ;;  %v3657_v12 = vpop.f32.mrf.mxu0 }
 0x6f3   : > { %v9268_v7 = vadd.f32 %v3657_v12, %v3471_v61  ;;  %v3736_v34 = vpop.f32.mrf.mxu1 }
 0x6f4   : > { %v3737_v44 = vadd.f32 %v3736_v34, %v3550_v1 }
 0x6f6   : > { %v6912_v9 = vpop.f32.mrf.mxu0 }
 0x6f7   : > { %v9270_v45 = vadd.f32 %v6912_v9, %v3732_v5  ;;  %v9272_v53 = vpop.f32.mrf.mxu1 }
 0x6f8   : > { %v9274_v29 = vpop.f32.mrf.mxu0 }
 0x6f9   : > { %v9276_v42 = vpop.f32.mrf.mxu1 }
 0x6fa   : > { %v6915_v15 = vpop.f32.mrf.mxu0 }
 0x6fb   : > { %v9278_v2 = vadd.f32 %v6915_v15, %v3742_v55  ;;  %v9280_v8 = vpop.f32.mrf.mxu1 }
 0x6fc   : > { %v3971_v49 = vpop.f32.mrf.mxu0 }
 0x6fd   : > { %v9282_v3 = vadd.f32 %v3971_v49, %v3737_v44  ;;  %v9284_v30 = vpop.f32.mrf.mxu1 }
 0x6ff   : > { %v9286_v52 = vpop.f32.mrf.mxu1 }
 0x701   : > { %v9288_v35 = vpop.f32.mrf.mxu1 }
 0x703   : > { %v9290_v43 = vpop.f32.mrf.mxu1 }
 0x704   : > { %v4119_v39 = vpop.f32.mrf.mxu0 }
 0x705   : > { %v9292_v40 = vpop.f32.mrf.mxu1 }
 0x706   : > { %v4121_v10 = vpop.f32.mrf.mxu0 }
 0x707   : > { %v9294_v11 = vpop.f32.mrf.mxu1 }
 0x708   : > { %v9296_v56 = vpop.f32.mrf.mxu0 }
 0x709   : > { %v4208_v59 = vpop.f32.mrf.mxu1 }
 0x70a   : > { %v9298_v14 = vpop.f32.mrf.mxu0 }
 0x70c   : > { %v9300_v22 = vpop.f32.mrf.mxu0  ;;  %v9302_v62 = vpop.f32.mrf.mxu1 }
 0x70e   : > { %v9304_v50 = vpop.f32.mrf.mxu0  ;;  %v9306_v63 = vpop.f32.mrf.mxu1 }
 0x711   : > { %v9308_v31 = vpop.f32.mrf.mxu0 }
 0x712   : > { %v4366_v33 = vpop.f32.mrf.mxu1 }
 0x713   : > { %v9310_v19 = vpop.f32.mrf.mxu0 }
 0x714   : > { %9754 = vst [vmem:[#allocation4_spill] sm:$0xff] %v9310_v19  ;;  %v4368_v36 = vpop.f32.mrf.mxu1 }
 0x715   : > { %v9312_v51 = vpop.f32.mrf.mxu0 }
 0x716   : > { %v9314_v57 = vpop.f32.mrf.mxu1 }
 0x717   : > { %v4455_v18 = vpop.f32.mrf.mxu0 }
 0x718   : > { %v9316_v38 = vpop.f32.mrf.mxu1 }
 0x71a   : > { %v9318_v1 = vpop.f32.mrf.mxu1  ;;  %v9320_v25 = vpop.f32.mrf.mxu0 }
 0x71b   : > { %9755 = vst [vmem:[#allocation5_spill] sm:$0xff] %v9320_v25 }
 0x71c   : > { %v9322_v58 = vpop.f32.mrf.mxu1  ;;  %v9324_v21 = vpop.f32.mrf.mxu0 }
 0x71d   : > { %9756 = vst [vmem:[#allocation8_spill] sm:$0xff] %v9324_v21 }
 0x71f   : > { %v9326_v13 = vpop.f32.mrf.mxu1 }
 0x720   : > { %9757 = vst [vmem:[#allocation10_spill] sm:$0xff] %v9326_v13  ;;  %v4613_v28 = vpop.f32.mrf.mxu0 }
 0x721   : > { %v9328_v0 = vpop.f32.mrf.mxu1 }
 0x722   : > { %9758 = vst [vmem:[#allocation11_spill] sm:$0xff] %v9328_v0  ;;  %v4615_v16 = vpop.f32.mrf.mxu0 }
 0x723   : > { %v9330_v27 = vpop.f32.mrf.mxu1 }
 0x724   : > { %v9332_v61 = vpop.f32.mrf.mxu0 }
 0x725   : > { %v4702_v23 = vpop.f32.mrf.mxu1 }
 0x726   : > { %v4621_v17 = vpop.f32.mrf.mxu0 }
 0x728   : > { %v9334_v5 = vpop.f32.mrf.mxu0  ;;  %v9336_v24 = vpop.f32.mrf.mxu1 }
 0x729   : > { %9759 = vst [vmem:[#allocation9_spill] sm:$0xff] %v9334_v5  ;;  %9760 = vst [vmem:[#allocation7_spill] sm:$0xff] %v9336_v24 }
 0x72a   : > { %v9338_v4 = vpop.f32.mrf.mxu0  ;;  %v9340_v32 = vpop.f32.mrf.mxu1 }
 0x72b   : > { %9761 = vst [vmem:[#allocation12_spill] sm:$0xff] %v9338_v4  ;;  %9762 = vst [vmem:[#allocation20_spill] sm:$0xff] %v9340_v32  ;;  %v3981_v4 = vadd.f32 %v9276_v42, %v9254_v47  ;;  %v3984_v47 = vadd.f32 %v9284_v30, %v9258_v26 }
 0x72d   : > { %v9342_v6 = vpop.f32.mrf.mxu0  ;;  %v4228_v21 = vadd.f32 %v4121_v10, %v3981_v4  ;;  %v4231_v26 = vadd.f32 %v9298_v14, %v3984_v47 }
 0x72e   : > { %9763 = vst [vmem:[#allocation22_spill] sm:$0xff] %v9342_v6  ;;  %v4860_v55 = vpop.f32.mrf.mxu1 }
 0x72f   : > { %v9344_v12 = vpop.f32.mrf.mxu0  ;;  %v4475_v42 = vadd.f32 %v4368_v36, %v4228_v21 }
 0x730   : > { %9764 = vst [vmem:[#allocation6_spill] sm:$0xff] %v9344_v12  ;;  %v4862_v34 = vpop.f32.mrf.mxu1 }
 0x731   : > { %v9346_v44 = vpop.f32.mrf.mxu0 }
 0x732   : > { %9765 = vst [vmem:[#allocation18_spill] sm:$0xff] %v9346_v44  ;;  %v9348_v9 = vpop.f32.mrf.mxu1 }
 0x733   : > { %v4949_v15 = vpop.f32.mrf.mxu0 }
 0x734   : > { %v4868_v49 = vpop.f32.mrf.mxu1 }
 0x736   : > { %v9350_v48 = vpop.f32.mrf.mxu1  ;;  %v9352_v25 = vpop.f32.mrf.mxu0 }
 0x737   : > { %9766 = vst [vmem:[#allocation16_spill] sm:$0xff] %v9350_v48  ;;  %9767 = vst [vmem:[#allocation24_spill] sm:$0xff] %v9352_v25  ;;  %v3980_v25 = vadd.f32 %v9272_v53, %v9252_v41  ;;  %v3986_v41 = vadd.f32 %v9286_v52, %v9260_v46  ;;  %v3987_v53 = vadd.f32 %v9288_v35, %v9262_v54 }
 0x738   : > { %v9354_v24 = vpop.f32.mrf.mxu1  ;;  %v9356_v0 = vpop.f32.mrf.mxu0  ;;  %v4232_v54 = vadd.f32 %v9294_v11, %v9270_v45  ;;  %v4235_v45 = vadd.f32 %v9306_v63, %v9282_v3 }
 0x739   : > { %9768 = vst [vmem:[#allocation26_spill] sm:$0xff] %v9354_v24  ;;  %9769 = vst [vmem:[#allocation14_spill] sm:$0xff] %v9356_v0  ;;  %v4227_v0 = vadd.f32 %v4119_v39, %v3980_v25  ;;  %v3989_v25 = vadd.f32 %v9290_v43, %v9266_v37  ;;  %v4233_v35 = vadd.f32 %v9300_v22, %v3986_v41 }
 0x73a   : > { %v4478_v37 = vadd.f32 %v9316_v38, %v4231_v26 }
 0x73b   : > { %v9358_v32 = vpop.f32.mrf.mxu1  ;;  %v4236_v11 = vadd.f32 %v9308_v31, %v3989_v25 }
 0x73c   : > { %9770 = vst [vmem:[#allocation15_spill] sm:$0xff] %v9358_v32  ;;  %v5107_v6 = vpop.f32.mrf.mxu0  ;;  %v3982_v32 = vadd.f32 %v9274_v29, %v9264_v60  ;;  %v4474_v60 = vadd.f32 %v4366_v33, %v4227_v0  ;;  %v4725_v22 = vadd.f32 %v4621_v17, %v4478_v37 }
 0x73d   : > { %v9360_v13 = vpop.f32.mrf.mxu1 }
 0x73e   : > { %9771 = vst [vmem:[#allocation25_spill] sm:$0xff] %v9360_v13  ;;  %v5109_v12 = vpop.f32.mrf.mxu0  ;;  %v4229_v10 = vadd.f32 %v4208_v59, %v3982_v32  ;;  %v4721_v52 = vadd.f32 %v4613_v28, %v4474_v60  ;;  %v4238_v59 = vadd.f32 %v9302_v62, %v9278_v2  ;;  %v4479_v62 = vadd.f32 %v9312_v51, %v4232_v54  ;;  %v9773_v51 = vld [vmem:[#allocation4_spill] sm:$0xff] }
 0x73f   : > { %v9362_v5 = vpop.f32.mrf.mxu1 }
 0x740   : > { %9772 = vst [vmem:[#allocation23_spill] sm:$0xff] %v9362_v5  ;;  %v9364_v44 = vpop.f32.mrf.mxu0  ;;  %v3983_v5 = vadd.f32 %v9280_v8, %v9256_v20  ;;  %v3990_v20 = vadd.f32 %v9292_v40, %v9268_v7  ;;  %v4722_v8 = vadd.f32 %v4615_v16, %v4475_v42  ;;  %v4476_v30 = vadd.f32 %v4455_v18, %v4229_v10  ;;  %v9780_v60 = vld [vmem:[#allocation26_spill] sm:$0xff] }
 0x741   : > { %v5196_v48 = vpop.f32.mrf.mxu1  ;;  %v4234_v7 = vadd.f32 %v9304_v50, %v3987_v53  ;;  %v4968_v14 = vadd.f32 %v4860_v55, %v4721_v52  ;;  %v4972_v16 = vadd.f32 %v4868_v49, %v4725_v22  ;;  %v4726_v3 = vadd.f32 %v9330_v27, %v4479_v62  ;;  %v9777_v49 = vld [vmem:[#allocation18_spill] sm:$0xff]  ;;  %v9779_v53 = vld [vmem:[#allocation11_spill] sm:$0xff] }
 0x742   : > { %v5115_v24 = vpop.f32.mrf.mxu0  ;;  %v4230_v46 = vadd.f32 %v9296_v56, %v3983_v5  ;;  %v4969_v43 = vadd.f32 %v4862_v34, %v4722_v8  ;;  %v4723_v56 = vadd.f32 %v4702_v23, %v4476_v30  ;;  %v4237_v32 = vadd.f32 %v9773_v51, %v3990_v20 }
 0x743   : > { %v5215_v28 = vadd.f32 %v5107_v6, %v4968_v14  ;;  %v4481_v0 = vadd.f32 %v9322_v58, %v4234_v7  ;;  %v9775_v6 = vld [vmem:[#allocation12_spill] sm:$0xff]  ;;  %v5219_v34 = vadd.f32 %v5115_v24, %v4972_v16  ;;  %v9776_v58 = vld [vmem:[#allocation9_spill] sm:$0xff]  ;;  %v4973_v47 = vadd.f32 %v9777_v49, %v4726_v3  ;;  %v9785_v7 = vld [vmem:[#allocation6_spill] sm:$0xff]  ;;  %v5568_v49 = vpop.permute.xlu1 %5567 }
 0x744   : > { %v9372_v19 = vpop.f32.mrf.mxu0  ;;  %v9374_v13 = vpop.f32.mrf.mxu1  ;;  %v4477_v40 = vadd.f32 %v9314_v57, %v4230_v46  ;;  %v5216_v18 = vadd.f32 %v5109_v12, %v4969_v43  ;;  %v4970_v21 = vadd.f32 %v4949_v15, %v4723_v56  ;;  %v4480_v57 = vadd.f32 %v9318_v1, %v4233_v35  ;;  %v9781_v24 = vld [vmem:[#allocation20_spill] sm:$0xff]  ;;  %v9791_v16 = vld [vmem:[#allocation15_spill] sm:$0xff] }
 0x745   : > { %v4728_v12 = vadd.f32 %v9775_v6, %v4481_v0  ;;  %v4484_v10 = vadd.f32 %v9779_v53, %v4237_v32  ;;  %v9782_v46 = vld [vmem:[#allocation16_spill] sm:$0xff]  ;;  %v9786_v14 = vmov 0.0  }
 0x746   : > { %v9384_v29 = vpop.f32.mrf.mxu0  ;;  %v9386_v39 = vpop.f32.mrf.mxu1  ;;  %v4724_v38 = vadd.f32 %v9332_v61, %v4477_v40  ;;  %v5217_v31 = vadd.f32 %v5196_v48, %v4970_v21  ;;  %v9774_v61 = vld [vmem:[#allocation8_spill] sm:$0xff]  ;;  %v4727_v15 = vadd.f32 %v9776_v58, %v4480_v57  ;;  %v9778_v48 = vld [vmem:[#allocation10_spill] sm:$0xff]  ;;  %v9789_v21 = vld [vmem:[#allocation25_spill] sm:$0xff] }
 0x747   : > { %v4482_v55 = vadd.f32 %v9774_v61, %v4235_v45  ;;  %v4483_v41 = vadd.f32 %v9778_v48, %v4236_v11  ;;  %v4975_v25 = vadd.f32 %v9780_v60, %v4728_v12  ;;  %v9783_v30 = vld [vmem:[#allocation23_spill] sm:$0xff]  ;;  %v4731_v40 = vadd.f32 %v9785_v7, %v4484_v10  ;;  %v9788_v11 = vld [vmem:[#allocation14_spill] sm:$0xff] }
 0x748   : > { %v4971_v63 = vadd.f32 %v9348_v9, %v4724_v38  ;;  %v4974_v54 = vadd.f32 %v9782_v46, %v4727_v15  ;;  %v5220_v52 = vadd.f32 %v9783_v30, %v4973_v47  ;;  %v9790_v57 = vld [vmem:[#allocation7_spill] sm:$0xff] }
 0x749   : > { %v9400_v33 = vpop.f32.mrf.mxu0  ;;  %v4729_v8 = vadd.f32 %v9781_v24, %v4482_v55  ;;  %v5222_v56 = vadd.f32 %v9384_v29, %v4975_v25 }
 0x74a   : > { %v5354_v36 = vpop.f32.mrf.mxu1  ;;  %v5218_v27 = vadd.f32 %v9364_v44, %v4971_v63  ;;  %v9784_v44 = vld [vmem:[#allocation5_spill] sm:$0xff] }
 0x74b   : > { %v5127_v2 = vpop.f32.mrf.mxu0  ;;  %v5462_v17 = vadd.f32 %v5354_v36, %v5215_v28  ;;  %v4485_v43 = vadd.f32 %v9784_v44, %v4238_v59  ;;  %v9787_v36 = vld [vmem:[#allocation22_spill] sm:$0xff]  ;;  %v4976_v22 = vadd.f32 %v9788_v11, %v4729_v8  ;;  %v4978_v28 = vadd.f32 %v9789_v21, %v4731_v40  ;;  %v9472_v11 = vld [vmem:[%s9670_s11 + $0x8] sm:$0xff] }
 0x74c   : > { %v5356_v50 = vpop.f32.mrf.mxu1  ;;  %v4730_v45 = vadd.f32 %v9787_v36, %v4483_v41 }
 0x74d   : > { %v5463_v23 = vadd.f32 %v5356_v50, %v5216_v18  ;;  %v6996_v5 = vpop.f32.mrf.mxu0  ;;  %v5221_v18 = vadd.f32 %v9372_v19, %v4974_v54  ;;  %v4732_v0 = vadd.f32 %v9790_v57, %v4485_v43  ;;  %v9792_v19 = vld [vmem:[#allocation24_spill] sm:$0xff] }
 0x74e   : > { %v5360_v4 = vpop.f32.mrf.mxu1  ;;  %v5467_v62 = vadd.f32 %v6996_v5, %v5220_v52  ;;  %v4977_v29 = vadd.f32 %v9791_v16, %v4730_v45  ;;  %v9464_v45 = vld [vmem:[%s9670_s11] sm:$0xff] }
 0x74f   : > { %v5443_v1 = vpop.f32.mrf.mxu0  ;;  %5646 = vmatprep.mubr.f32.mxu1 %v5463_v23  ;;  %v5465_v35 = vadd.f32 %v5360_v4, %v5218_v27  ;;  %v5223_v23 = vadd.f32 %v9386_v39, %v4976_v22  ;;  %v4979_v5 = vadd.f32 %v9792_v19, %v4732_v0  ;;  %v9480_v22 = vld [vmem:[%s9670_s11 + $0x10] sm:$0xff] }
 0x750   : > { %v5464_v42 = vadd.f32 %v5443_v1, %v5217_v31  ;;  %v5362_v9 = vpop.f32.mrf.mxu1  ;;  %5647 = vmatmul.mubr.f32.vlgmr.msra.gmra.mxu1 %v5462_v17  ;;  %v5225_v31 = vadd.f32 %v5127_v2, %v4978_v28  ;;  %v5224_v17 = vadd.f32 %v9400_v33, %v4977_v29  ;;  %v5762_v19 = vld [vmem:[%s9668_s9 + $0x10] sm:$0xff] }
 0x751   : > { %v5466_v20 = vadd.f32 %v5362_v9, %v5219_v34  ;;  %v6999_v26 = vpop.f32.mrf.mxu0  ;;  %v5226_v61 = vadd.f32 %v9374_v13, %v4979_v5  ;;  %v5763_v5 = vld [vmem:[%s9668_s9 + $0x18] sm:$0xff] }
 0x752   : > { %v5366_v37 = vpop.f32.mrf.mxu1  ;;  %6612 = vmatmul.mubr.msk.f32.vlgmr.msra.gmra.mxu0 %vm2544_vm9, %v5464_v42  ;;  %v5563_v42 = vpop.permute.xlu0 %5562 }
 0x753   : > { %5652 = vmatprep.mubr.f32.mxu1 %v5466_v20  ;;  %5741 = vmatprep.mubr.f32.mxu0 %v9786_v14  ;;  %v5453_v50 = vpop.f32.mrf.mxu0  ;;  %v5468_v3 = vadd.f32 %v5366_v37, %v5221_v18  ;;  %v5473_v39 = vadd.f32 %v6999_v26, %v5226_v61  ;;  %v5558_v20 = vpop.permute.xlu1 %5557  ;;  %v9488_v18 = vld [vmem:[%s9670_s11 + $0x18] sm:$0xff] }
 0x754   : > { %v5368_v38 = vpop.f32.mrf.mxu1  ;;  %5653 = vmatmul.mubr.f32.gmra.mxu1 %v5465_v35  ;;  %v5470_v4 = vadd.f32 %v5453_v50, %v5223_v23 }
 0x755   : > { %v5469_v59 = vadd.f32 %v5368_v38, %v5222_v56 }
 0x756   : > { %v5372_v63 = vpop.f32.mrf.mxu1  ;;  %6613 = vmatmul.mubr.msk.f32.gmra.mxu0 %vm2544_vm9, %v5467_v62  ;;  %v5553_v54 = vpop.permute.xlu0 %5552 }
 0x757   : > { %5658 = vmatprep.mubr.f32.mxu1 %v5469_v59  ;;  %5747 = vmatprep.mubr.f32.mxu0 %v9786_v14  ;;  %v5471_v55 = vadd.f32 %v5372_v63, %v5224_v17  ;;  %v5761_v63 = vld [vmem:[%s9668_s9 + $0x8] sm:$0xff]  ;;  %v5764_v17 = vld [vmem:[%s9669_s10] sm:$0xff] }
 0x758   : > { %v5374_v51 = vpop.f32.mrf.mxu1  ;;  %5659 = vmatmul.mubr.f32.gmra.mxu1 %v5468_v3 }
 0x759   : > { %v5472_v32 = vadd.f32 %v5374_v51, %v5225_v31  ;;  %v5760_v31 = vld [vmem:[%s9668_s9] sm:$0xff] }
 0x75a   : > { %6614 = vmatmul.mubr.msk.f32.gmra.mxu0 %vm2544_vm9, %v5470_v4  ;;  %v5765_v4 = vld [vmem:[%s9669_s10 + $0x8] sm:$0xff] }
 0x75b   : > { %5664 = vmatprep.mubr.f32.mxu1 %v5472_v32  ;;  %5753 = vmatprep.mubr.f32.mxu0 %v9786_v14 }
 0x75c   : > { %5665 = vmatmul.mubr.f32.gmra.mxu1 %v5471_v55 }
 0x75e   : > { %6615 = vmatmul.mubr.msk.f32.gmra.mxu0 %vm2544_vm9, %v5473_v39 }
 0x75f   : > { %5832 = vmatprep.mubr.f32.mxu0 %v9786_v14 }
 0x810   : > { %v5648_v2 = vpop.f32.mrf.mxu1 }
 0x811   : > { %v5649_v44 = vadd.f32 %v5648_v2, %v5553_v54 }
 0x812   : > { %v5650_v33 = vpop.f32.mrf.mxu1  ;;  %v5737_v6 = vpop.f32.mrf.mxu0 }
 0x813   : > { %v5651_v35 = vadd.f32 %v5650_v33, %v5553_v54  ;;  %v9456_v36 = vadd.f32 %v5737_v6, %v5649_v44 }
 0x814   : > { %v5654_v12 = vpop.f32.mrf.mxu1  ;;  %v5739_v34 = vpop.f32.mrf.mxu0 }
 0x815   : > { %v5655_v30 = vadd.f32 %v5654_v12, %v5558_v20  ;;  %v9454_v56 = vadd.f32 %v5739_v34, %v5651_v35 }
 0x816   : > { %v5656_v1 = vpop.f32.mrf.mxu1  ;;  %v5743_v58 = vpop.f32.mrf.mxu0 }
 0x817   : > { %v5657_v8 = vadd.f32 %v5656_v1, %v5558_v20  ;;  %v9452_v40 = vadd.f32 %v5743_v58, %v5655_v30  ;;  %v6126_v20 = vld [vmem:[%s551_s27] sm:$0xff] }
 0x818   : > { %v5660_v13 = vpop.f32.mrf.mxu1  ;;  %v5745_v15 = vpop.f32.mrf.mxu0 }
 0x819   : > { %v5661_v26 = vadd.f32 %v5660_v13, %v5563_v42  ;;  %v5746_v7 = vadd.f32 %v5745_v15, %v5657_v8  ;;  %v6124_v8 = vld [vmem:[%s9673_s14 + $0x10] sm:$0xff] }
 0x81a   : > { %v5662_v47 = vpop.f32.mrf.mxu1  ;;  %v5749_v27 = vpop.f32.mrf.mxu0 }
 0x81b   : > { %v5663_v60 = vadd.f32 %v5662_v47, %v5563_v42  ;;  %v5750_v43 = vadd.f32 %v5749_v27, %v5661_v26  ;;  %v6122_v26 = vld [vmem:[%s9673_s14] sm:$0xff] }
 0x81c   : > { %v5666_v9 = vpop.f32.mrf.mxu1  ;;  %v5751_v48 = vpop.f32.mrf.mxu0 }
 0x81d   : > { %v5667_v41 = vadd.f32 %v5666_v9, %v5568_v49  ;;  %v5752_v37 = vadd.f32 %v5751_v48, %v5663_v60 }
 0x81e   : > { %v5668_v53 = vpop.f32.mrf.mxu1  ;;  %v5755_v10 = vpop.f32.mrf.mxu0 }
 0x81f   : > { %v5669_v25 = vadd.f32 %v5668_v53, %v5568_v49  ;;  %v9448_v52 = vadd.f32 %v5755_v10, %v5667_v41 }
 0x820   : > { %v5757_v24 = vpop.f32.mrf.mxu0 }
 0x821   : > { %v9446_v46 = vadd.f32 %v5757_v24, %v5669_v25  ;;  %v6127_v25 = vld [vmem:[%s551_s27 + $0x8] sm:$0xff] }
 0x822   : > { %v6123_v24 = vld [vmem:[%s9673_s14 + $0x8] sm:$0xff] }
 0x823   : > { %5792 = vmatprep.subr.mxu0 %v9446_v46 }
 0x824   : > { %5793 = vmatpush1.msra.mxu0 %v9448_v52 }
 0x825   : > { %5794 = vmatprep.subr.mxu0 %v5752_v37 }
 0x826   : > { %5795 = vmatpush1.msra.mxu0 %v5750_v43 }
 0x827   : > { %5796 = vmatprep.subr.mxu0 %v5746_v7 }
 0x828   : > { %5797 = vmatpush1.msra.mxu0 %v9452_v40 }
 0x829   : > { %5798 = vmatprep.subr.mxu0 %v9454_v56 }
 0x82a   : > { %5799 = vmatpush1.msra.mxu0 %v9456_v36 }
 0x82b   : > { %6616 = vmatmul.mubr.msk.f32.vlgmr.msra.gmra.mxu0 %vm2544_vm9, %v9464_v45 }
 0x82c   : > { %5838 = vmatprep.mubr.f32.mxu0 %v9786_v14 }
 0x82f   : > { %6617 = vmatmul.mubr.msk.f32.gmra.mxu0 %vm2544_vm9, %v9472_v11 }
 0x830   : > { %5844 = vmatprep.mubr.f32.mxu0 %v9786_v14 }
 0x833   : > { %6618 = vmatmul.mubr.msk.f32.gmra.mxu0 %vm2544_vm9, %v9480_v22 }
 0x834   : > { %5850 = vmatprep.mubr.f32.mxu0 %v9786_v14 }
 0x837   : > { %6619 = vmatmul.mubr.msk.f32.gmra.mxu0 %vm2544_vm9, %v9488_v18 }
 0x838   : > { %5953 = vmatprep.mubr.f32.mxu0 %v9786_v14 }
 0x8eb   : > { %v5834_v62 = vpop.f32.mrf.mxu0 }
 0x8ed   : > { %v5836_v38 = vpop.f32.mrf.mxu0 }
 0x8ee   : > { %v5857_v3 = vadd.f32 %v5836_v38, %v5834_v62  ;;  %v6130_v62 = vld [vmem:[%s9674_s15 + $0x10] sm:$0xff]  ;;  %v6131_v38 = vld [vmem:[%s9674_s15 + $0x18] sm:$0xff] }
 0x8ef   : > { %v5840_v21 = vpop.f32.mrf.mxu0 }
 0x8f1   : > { %v5842_v28 = vpop.f32.mrf.mxu0 }
 0x8f2   : > { %v5860_v29 = vadd.f32 %v5842_v28, %v5840_v21 }
 0x8f3   : > { %v5846_v50 = vpop.f32.mrf.mxu0 }
 0x8f5   : > { %v5848_v59 = vpop.f32.mrf.mxu0 }
 0x8f6   : > { %v5863_v57 = vadd.f32 %v5848_v59, %v5846_v50 }
 0x8f7   : > { %v5852_v0 = vpop.f32.mrf.mxu0 }
 0x8f8   : > { %5864 = vadd.xlane.f32.xlu0 %v5863_v57 }
 0x8f9   : > { %v5854_v16 = vpop.f32.mrf.mxu0 }
 0x8fa   : > { %v5866_v23 = vadd.f32 %v5854_v16, %v5852_v0 }
 0x8fc   : > { %5861 = vadd.xlane.f32.xlu0 %v5860_v29  ;;  %5867 = vadd.xlane.f32.xlu1 %v5866_v23 }
 0x900   : > { %5858 = vadd.xlane.f32.xlu1 %v5857_v3 }
 0x911   : > { %6017 = vperm.xlu1 %7021, %v5761_v63  }
 0x912   : > { %6012 = vperm.xlu0 %7020, %v5760_v31  }
 0x915   : > { %6022 = vperm.xlu1 %7021, %v5762_v19  }
 0x916   : > { %6027 = vperm.xlu0 %7020, %v5763_v5  }
 0x919   : > { %6040 = vperm.xlu1 %7021, %v5764_v17  }
 0x91a   : > { %6045 = vperm.xlu0 %7020, %v5765_v4  }
 0x981   : > { %v5865_v51 = vpop.xlane.xlu0 %5864 }
 0x982   : > { %v5871_v32 = vmul.f32 0.00390625, %v5865_v51 }
 0x984   : > { %v9511_v33 = vsub.f32 %v5752_v37, %v5871_v32  ;;  %v9519_v34 = vsub.f32 %v5750_v43, %v5871_v32 }
 0x985   : > { %v5862_v61 = vpop.xlane.xlu0 %5861  ;;  %v5868_v55 = vpop.xlane.xlu1 %5867 }
 0x986   : > { %v5870_v39 = vmul.f32 0.00390625, %v5862_v61  ;;  %v5872_v2 = vmul.f32 0.00390625, %v5868_v55  ;;  %v5886_v42 = vmul.f32 %v9511_v33, %v9511_v33  ;;  %v5885_v9 = vmul.f32 %v9519_v34, %v9519_v34 }
 0x988   : > { %v9514_v6 = vsub.f32 %v9448_v52, %v5872_v2  ;;  %v9517_v12 = vsub.f32 %v9446_v46, %v5872_v2  ;;  %v9521_v58 = vsub.f32 %v5746_v7, %v5870_v39  ;;  %v9528_v47 = vsub.f32 %v9452_v40, %v5870_v39  ;;  %v6125_v46 = vld [vmem:[%s9673_s14 + $0x18] sm:$0xff] }
 0x989   : > { %v5859_v1 = vpop.xlane.xlu1 %5858 }
 0x98a   : > { %v5887_v13 = vmul.f32 %v9514_v6, %v9514_v6  ;;  %v5869_v15 = vmul.f32 0.00390625, %v5859_v1  ;;  %v5888_v49 = vmul.f32 %v9517_v12, %v9517_v12  ;;  %v5884_v41 = vmul.f32 %v9521_v58, %v9521_v58 }
 0x98b   : > { %v5883_v53 = vmul.f32 %v9528_v47, %v9528_v47 }
 0x98c   : > { %v9532_v27 = vsub.f32 %v9454_v56, %v5869_v15  ;;  %5913 = vmatprep.subr.mxu0 %v5888_v49  ;;  %v9539_v48 = vsub.f32 %v9456_v36, %v5869_v15 }
 0x98d   : > { %5914 = vmatpush1.msra.mxu0 %v5887_v13  ;;  %v6013_v21 = vpop.permute.xlu0 %6012  ;;  %v6018_v28 = vpop.permute.xlu1 %6017 }
 0x98e   : > { %5915 = vmatprep.subr.mxu0 %v5886_v42  ;;  %v5882_v10 = vmul.f32 %v9532_v27, %v9532_v27  ;;  %v5881_v60 = vmul.f32 %v9539_v48, %v9539_v48 }
 0x98f   : > { %5916 = vmatpush1.msra.mxu0 %v5885_v9 }
 0x990   : > { %5917 = vmatprep.subr.mxu0 %v5884_v41 }
 0x991   : > { %5918 = vmatpush1.msra.mxu0 %v5883_v53  ;;  %v6028_v50 = vpop.permute.xlu0 %6027  ;;  %v6023_v59 = vpop.permute.xlu1 %6022 }
 0x992   : > { %5919 = vmatprep.subr.mxu0 %v5882_v10 }
 0x993   : > { %5920 = vmatpush1.msra.mxu0 %v5881_v60 }
 0x994   : > { %6620 = vmatmul.mubr.msk.f32.vlgmr.msra.gmra.mxu0 %vm2544_vm9, %v9464_v45  ;;  %6194 = vmatprep.subr.mxu0 %v6127_v25  ;;  %v5766_v45 = vld [vmem:[%s9669_s10 + $0x10] sm:$0xff] }
 0x995   : > { %5959 = vmatprep.mubr.f32.mxu0 %v9786_v14  ;;  %6195 = vmatpush1.msra.mxu0 %v6126_v20  ;;  %v6046_v57 = vpop.permute.xlu0 %6045  ;;  %v6041_v0 = vpop.permute.xlu1 %6040 }
 0x998   : > { %6621 = vmatmul.mubr.msk.f32.gmra.mxu0 %vm2544_vm9, %v9472_v11  ;;  %v5767_v11 = vld [vmem:[%s9669_s10 + $0x18] sm:$0xff] }
 0x999   : > { %5965 = vmatprep.mubr.f32.mxu0 %v9786_v14 }
 0x99c   : > { %6622 = vmatmul.mubr.msk.f32.gmra.mxu0 %vm2544_vm9, %v9480_v22  ;;  %v6128_v22 = vld [vmem:[%s9674_s15] sm:$0xff] }
 0x99d   : > { %5971 = vmatprep.mubr.f32.mxu0 %v9786_v14 }
 0x9a0   : > { %6623 = vmatmul.mubr.msk.f32.gmra.mxu0 %vm2544_vm9, %v9488_v18  ;;  %v6129_v18 = vld [vmem:[%s9674_s15 + $0x8] sm:$0xff] }
 0x9a1   : > { %6228 = vmatprep.mubr.f32.mxu0 %v9786_v14 }
 0x9a4   : > { %6632 = vmatmul.mubr.msk.f32.vlgmr.msra.gmra.mxu0 %vm594_vm0, %v6122_v26 }
 0x9a5   : > { %6234 = vmatprep.mubr.f32.mxu0 %v9786_v14 }
 0x9a8   : > { %6633 = vmatmul.mubr.msk.f32.gmra.mxu0 %vm594_vm0, %v6123_v24 }
 0x9a9   : > { %6240 = vmatprep.mubr.f32.mxu0 %v9786_v14 }
 0x9ac   : > { %6634 = vmatmul.mubr.msk.f32.gmra.mxu0 %vm594_vm0, %v6124_v8 }
 0x9ad   : > { %6246 = vmatprep.mubr.f32.mxu0 %v9786_v14 }
 0x9b0   : > { %6635 = vmatmul.mubr.msk.f32.gmra.mxu0 %vm594_vm0, %v6125_v46 }
 0xa54   : > { %v5955_v54 = vpop.f32.mrf.mxu0 }
 0xa56   : > { %v5957_v30 = vpop.f32.mrf.mxu0 }
 0xa57   : > { %v5978_v52 = vadd.f32 %v5957_v30, %v5955_v54 }
 0xa58   : > { %v5961_v35 = vpop.f32.mrf.mxu0 }
 0xa59   : > { %5979 = vadd.xlane.f32.xlu0 %v5978_v52 }
 0xa5a   : > { %v5963_v37 = vpop.f32.mrf.mxu0 }
 0xa5b   : > { %v5981_v44 = vadd.f32 %v5963_v37, %v5961_v35 }
 0xa5c   : > { %v5967_v43 = vpop.f32.mrf.mxu0 }
 0xa5d   : > { %5982 = vadd.xlane.f32.xlu1 %v5981_v44 }
 0xa5e   : > { %v5969_v7 = vpop.f32.mrf.mxu0 }
 0xa5f   : > { %v5984_v40 = vadd.f32 %v5969_v7, %v5967_v43 }
 0xa60   : > { %v5973_v56 = vpop.f32.mrf.mxu0 }
 0xa61   : > { %5985 = vadd.xlane.f32.xlu0 %v5984_v40 }
 0xa62   : > { %v5975_v14 = vpop.f32.mrf.mxu0 }
 0xa63   : > { %v5987_v36 = vadd.f32 %v5975_v14, %v5973_v56 }
 0xa64   : > { %v6230_v14 = vpop.f32.mrf.mxu0 }
 0xa65   : > { %5988 = vadd.xlane.f32.xlu1 %v5987_v36 }
 0xa76   : > { %6050 = vperm.xlu1 %7021, %v5766_v45  }
 0xa77   : > { %6055 = vperm.xlu0 %7020, %v5767_v11  }
 0xa7a   : > { %6134 = vperm.xlu1 %7021, %v6128_v22   ;;  %v6232_v22 = vpop.f32.mrf.mxu0 }
 0xa7b   : > { %6139 = vperm.xlu0 %7020, %v6129_v18  }
 0xa7e   : > { %6144 = vperm.xlu1 %7021, %v6130_v62  }
 0xa7f   : > { %6149 = vperm.xlu0 %7020, %v6131_v38  }
 0xae2   : > { %v5980_v16 = vpop.xlane.xlu0 %5979 }
 0xae3   : > { %v5990_v29 = vmul.f32 0.00390625, %v5980_v16 }
 0xae5   : > { %v5994_v23 = vadd.f32 1e-05, %v5990_v29 }
 0xae6   : > { %v5983_v3 = vpop.xlane.xlu1 %5982 }
 0xae7   : > { %7078 = vrsqrt.f32 %v5994_v23  ;;  %v5991_v63 = vmul.f32 0.00390625, %v5983_v3 }
 0xae9   : > { %v5995_v31 = vadd.f32 1e-05, %v5991_v63 }
 0xaea   : > { %v5986_v19 = vpop.xlane.xlu0 %5985 }
 0xaeb   : > { %7080 = vrsqrt.f32 %v5995_v31  ;;  %v5992_v5 = vmul.f32 0.00390625, %v5986_v19 }
 0xaed   : > { %v5996_v17 = vadd.f32 1e-05, %v5992_v5 }
 0xaee   : > { %v5989_v4 = vpop.xlane.xlu1 %5988 }
 0xaef   : > { %7082 = vrsqrt.f32 %v5996_v17  ;;  %v5993_v51 = vmul.f32 0.00390625, %v5989_v4 }
 0xaf1   : > { %v5997_v32 = vadd.f32 1e-05, %v5993_v51 }
 0xaf2   : > { %v6051_v46 = vpop.permute.xlu1 %6050  ;;  %v6056_v7 = vpop.permute.xlu0 %6055 }
 0xaf3   : > { %7084 = vrsqrt.f32 %v5997_v32 }
 0xaf4   : > { %v7079_v61 = vpop.eup %7078 }
 0xaf5   : > { %v6002_v55 = vmul.f32 %v7079_v61, %v9539_v48  ;;  %v6003_v39 = vmul.f32 %v7079_v61, %v9532_v27 }
 0xaf6   : > { %v6135_v5 = vpop.permute.xlu1 %6134  ;;  %v6140_v61 = vpop.permute.xlu0 %6139 }
 0xaf7   : > { %v6030_v2 = vmul.f32 %v6013_v21, %v6002_v55  ;;  %v6031_v1 = vmul.f32 %v6013_v21, %v6003_v39  ;;  %v6231_v51 = vadd.f32 %v6230_v14, %v6135_v5 }
 0xaf8   : > { %v7081_v13 = vpop.eup %7080 }
 0xaf9   : > { %v6004_v15 = vmul.f32 %v7081_v13, %v9528_v47  ;;  %v6005_v49 = vmul.f32 %v7081_v13, %v9521_v58  ;;  %v9605_v42 = vadd.f32 %v6041_v0, %v6030_v2  ;;  %v9607_v9 = vadd.f32 %v6041_v0, %v6031_v1 }
 0xafa   : > { %v6233_v2 = vadd.f32 %v6232_v22, %v6135_v5 }
 0xafb   : > { %v6032_v41 = vmul.f32 %v6018_v28, %v6004_v15  ;;  %v6033_v53 = vmul.f32 %v6018_v28, %v6005_v49  ;;  %v6624_v10 = vmul.f32 -1.442695, %v9605_v42  ;;  %v6625_v48 = vmul.f32 -1.442695, %v9607_v9  ;;  %v6236_v28 = vpop.f32.mrf.mxu0 }
 0xafc   : > { %v7083_v60 = vpop.eup %7082  ;;  %v6237_v49 = vadd.f32 %v6236_v28, %v6140_v61 }
 0xafd   : > { %v6006_v27 = vmul.f32 %v7083_v60, %v9519_v34  ;;  %v6007_v25 = vmul.f32 %v7083_v60, %v9511_v33  ;;  %v9613_v20 = vadd.f32 %v6046_v57, %v6032_v41  ;;  %v9615_v47 = vadd.f32 %v6046_v57, %v6033_v53  ;;  %v6238_v29 = vpop.f32.mrf.mxu0  ;;  %v6145_v41 = vpop.permute.xlu1 %6144 }
 0xafe   : > { %7086 = vpow2.f32 %v6624_v10 }
 0xaff   : > { %v6034_v58 = vmul.f32 %v6023_v59, %v6006_v27  ;;  %v6035_v26 = vmul.f32 %v6023_v59, %v6007_v25  ;;  %v6626_v24 = vmul.f32 -1.442695, %v9613_v20  ;;  %v6627_v54 = vmul.f32 -1.442695, %v9615_v47  ;;  %v6242_v19 = vpop.f32.mrf.mxu0 }
 0xb00   : > { %v7085_v8 = vpop.eup %7084  ;;  %7088 = vpow2.f32 %v6625_v48  ;;  %v6239_v27 = vadd.f32 %v6238_v29, %v6140_v61 }
 0xb01   : > { %v6008_v30 = vmul.f32 %v7085_v8, %v9514_v6  ;;  %v6009_v34 = vmul.f32 %v7085_v8, %v9517_v12  ;;  %v9621_v52 = vadd.f32 %v6051_v46, %v6034_v58  ;;  %v9623_v33 = vadd.f32 %v6051_v46, %v6035_v26  ;;  %v6244_v55 = vpop.f32.mrf.mxu0  ;;  %v6150_v8 = vpop.permute.xlu0 %6149 }
 0xb02   : > { %7090 = vpow2.f32 %v6626_v24  ;;  %v6243_v26 = vadd.f32 %v6242_v19, %v6145_v41  ;;  %v6245_v46 = vadd.f32 %v6244_v55, %v6145_v41 }
 0xb03   : > { %v6036_v35 = vmul.f32 %v6028_v50, %v6008_v30  ;;  %v6037_v37 = vmul.f32 %v6028_v50, %v6009_v34  ;;  %v6628_v44 = vmul.f32 -1.442695, %v9621_v52  ;;  %v6629_v43 = vmul.f32 -1.442695, %v9623_v33  ;;  %v6248_v10 = vpop.f32.mrf.mxu0 }
 0xb04   : > { %7092 = vpow2.f32 %v6627_v54 }
 0xb05   : > { %v9627_v40 = vadd.f32 %v6056_v7, %v6036_v35  ;;  %v9629_v56 = vadd.f32 %v6056_v7, %v6037_v37  ;;  %7094 = vpow2.f32 %v6628_v44  ;;  %v6250_v54 = vpop.f32.mrf.mxu0  ;;  %v6249_v44 = vadd.f32 %v6248_v10, %v6150_v8 }
 0xb06   : > { %7096 = vpow2.f32 %v6629_v43 }
 0xb07   : > { %v6630_v6 = vmul.f32 -1.442695, %v9627_v40  ;;  %v6631_v12 = vmul.f32 -1.442695, %v9629_v56 }
 0xb09   : > { %7098 = vpow2.f32 %v6630_v6 }
 0xb0a   : > { %7100 = vpow2.f32 %v6631_v12 }
 0xb0b   : > { %v7087_v36 = vpop.eup %7086 }
 0xb0c   : > { %v6090_v45 = vadd.f32 1.0, %v7087_v36 }
 0xb0d   : > { %v7089_v11 = vpop.eup %7088 }
 0xb0e   : > { %v6091_v18 = vadd.f32 1.0, %v7089_v11  ;;  %7102 = vrcp.f32 %v6090_v45 }
 0xb0f   : > { %v7091_v62 = vpop.eup %7090 }
 0xb10   : > { %v6092_v38 = vadd.f32 1.0, %v7091_v62  ;;  %7104 = vrcp.f32 %v6091_v18 }
 0xb11   : > { %v7093_v21 = vpop.eup %7092 }
 0xb12   : > { %v7095_v50 = vpop.eup %7094  ;;  %v6093_v59 = vadd.f32 1.0, %v7093_v21  ;;  %7106 = vrcp.f32 %v6092_v38 }
 0xb13   : > { %v7097_v57 = vpop.eup %7096  ;;  %v6094_v0 = vadd.f32 1.0, %v7095_v50 }
 0xb14   : > { %v6095_v16 = vadd.f32 1.0, %v7097_v57  ;;  %7108 = vrcp.f32 %v6093_v59 }
 0xb15   : > { %7110 = vrcp.f32 %v6094_v0 }
 0xb16   : > { %v7099_v23 = vpop.eup %7098  ;;  %7112 = vrcp.f32 %v6095_v16 }
 0xb17   : > { %v7101_v3 = vpop.eup %7100  ;;  %v6096_v63 = vadd.f32 1.0, %v7099_v23 }
 0xb18   : > { %v6097_v31 = vadd.f32 1.0, %v7101_v3 }
 0xb19   : > { %7114 = vrcp.f32 %v6096_v63 }
 0xb1a   : > { %7116 = vrcp.f32 %v6097_v31 }
 0xb1b   : > { %v7103_v17 = vpop.eup %7102 }
 0xb1c   : > { %v6114_v4 = vmul.f32 %v7103_v17, %v9605_v42 }
 0xb1d   : > { %v7105_v32 = vpop.eup %7104 }
 0xb1e   : > { %v6115_v39 = vmul.f32 %v7105_v32, %v9607_v9  ;;  %v6253_v1 = vadd.f32 %v6231_v51, %v6114_v4 }
 0xb1f   : > { %v7107_v13 = vpop.eup %7106 }
 0xb20   : > { %v6116_v15 = vmul.f32 %v7107_v13, %v9613_v20  ;;  %v6254_v42 = vadd.f32 %v6233_v2, %v6115_v39  ;;  %6261 = vst [vmem:[%s9639_s29] sm:$0xff] %v6253_v1 }
 0xb21   : > { %v7109_v53 = vpop.eup %7108 }
 0xb22   : > { %v7111_v60 = vpop.eup %7110  ;;  %v6117_v48 = vmul.f32 %v7109_v53, %v9615_v47  ;;  %v6255_v25 = vadd.f32 %v6237_v49, %v6116_v15  ;;  %6262 = vst [vmem:[%s9639_s29 + $0x8] sm:$0xff] %v6254_v42 }
 0xb23   : > { %v7113_v9 = vpop.eup %7112  ;;  %v6118_v58 = vmul.f32 %v7111_v60, %v9621_v52 }
 0xb24   : > { %v6119_v20 = vmul.f32 %v7113_v9, %v9623_v33  ;;  %v6256_v24 = vadd.f32 %v6239_v27, %v6117_v48  ;;  %6263 = vst [vmem:[%s9639_s29 + $0x10] sm:$0xff] %v6255_v25  ;;  %v6251_v33 = vadd.f32 %v6250_v54, %v6150_v8 }
 0xb25   : > { %v6257_v30 = vadd.f32 %v6243_v26, %v6118_v58 }
 0xb26   : > { %v7115_v47 = vpop.eup %7114  ;;  %6264 = vst [vmem:[%s9639_s29 + $0x18] sm:$0xff] %v6256_v24  ;;  %v6258_v34 = vadd.f32 %v6245_v46, %v6119_v20 }
 0xb27   : > { %v7117_v35 = vpop.eup %7116  ;;  %v6120_v37 = vmul.f32 %v7115_v47, %v9627_v40  ;;  %6265 = vst [vmem:[%s9639_s29 + $0x20] sm:$0xff] %v6257_v30 }
 0xb28   : > { %v6121_v52 = vmul.f32 %v7117_v35, %v9629_v56  ;;  %6266 = vst [vmem:[%s9639_s29 + $0x28] sm:$0xff] %v6258_v34 }
 0xb29   : > { %v6259_v43 = vadd.f32 %v6249_v44, %v6120_v37 }
 0xb2a   : > { %v6260_v7 = vadd.f32 %v6251_v33, %v6121_v52 }
 0xb2b   : > { %6267 = vst [vmem:[%s9639_s29 + $0x30] sm:$0xff] %v6259_v43 }
 0xb2c   : > { %6268 = vst [vmem:[%s9639_s29 + $0x38] sm:$0xff] %v6260_v7 }
 0xb2d PF: > { %s26_s21 = sadd.s32 1, %s7128_s21  }
 0xb2e   : > { %p23_p4 = scmp.ge.s32.totalorder %s26_s21, 4  }
 0xb30   :  { %25 = sbr.rel (!%p23_p4) target bundleno = 2 (0x2), region = 137 }

</bundles_post_ra>
